<compile_context>
chip_gen: v6e
topology: v6e:2x2x1
jax: 0.10.0
libtpu: 0.0.40
codegen_flags: <defaults>
</compile_context>

<pallas_src>
import functools
import math

import numpy as np
import jax
import jax.numpy as jnp
from jax.experimental import pallas as pl
from jax.experimental.pallas import tpu as pltpu

BN_EPS = 1e-5
LANE = 128
VMEM_LIMIT = 32 * 1024 * 1024


# --------------------------------------------------------------------------
# small helpers
# --------------------------------------------------------------------------
def _round_up(v, m=LANE):
    return ((v + m - 1) // m) * m


def _largest_divisor_leq(n, cap):
    d = max(1, min(n, cap))
    while n % d:
        d -= 1
    return d


def _pad_axis(a, axis, target):
    pad = target - a.shape[axis]
    if pad <= 0:
        return a
    widths = [(0, 0)] * a.ndim
    widths[axis] = (0, pad)
    return jnp.pad(a, widths)


def _bilinear_matrix(out_size, in_size):
    """PyTorch F.interpolate(mode='bilinear', align_corners=False) as a matrix."""
    m = np.zeros((out_size, in_size), np.float32)
    if in_size == 1:
        m[:, 0] = 1.0
        return jnp.asarray(m)
    scale = in_size / out_size
    for i in range(out_size):
        src = max((i + 0.5) * scale - 0.5, 0.0)
        i0 = min(int(math.floor(src)), in_size - 1)
        i1 = min(i0 + 1, in_size - 1)
        w1 = src - i0
        m[i, i0] += 1.0 - w1
        m[i, i1] += w1
    return jnp.asarray(m)


# --------------------------------------------------------------------------
# Pallas kernel 1: fused bilinear upsample + 1x1 projection (BN+ReLU) + concat
# grid = (B, Hl // TH); each step writes one (TH, Wl, Ccat) row tile of `cat`.
# --------------------------------------------------------------------------
def _upsample_project_concat_kernel(rw_ref, x_ref, low_ref, wproj_ref, o_ref, *,
                                    th, hx, hl, cx_pad, bn_scale):
    i = pl.program_id(1)

    # --- low-level 1x1 projection + folded BN + ReLU  -> channels [cx_pad:] --
    low = low_ref[0]                                    # (th, Wl, Clp) bf16
    wl = low.shape[1]
    clp = low.shape[2]
    cpp = wproj_ref.shape[1]
    proj = jnp.dot(low.reshape(th * wl, clp), wproj_ref[...],
                   preferred_element_type=jnp.float32)
    proj = jnp.maximum(proj * bn_scale, 0.0)
    o_ref[0, :, :, cx_pad:] = proj.reshape(th, wl, cpp).astype(o_ref.dtype)

    # --- bilinear upsample of ASPP features (align_corners=False) -> [:cx_pad]
    rw = rw_ref[...]                                    # (Wl, Wx) f32 interp matrix
    scale_h = hx / hl
    for r in range(th):
        if hx == 1:
            row = x_ref[0, 0].astype(jnp.float32)       # (Wx, Cxp)
        else:
            g = (i * th + r).astype(jnp.float32)        # global output row index
            src = jnp.maximum((g + 0.5) * scale_h - 0.5, 0.0)
            i0f = jnp.minimum(jnp.floor(src), float(hx - 1))
            frac = src - i0f
            i0 = i0f.astype(jnp.int32)
            i1 = jnp.minimum(i0 + 1, hx - 1)
            r0 = x_ref[0, pl.ds(i0, 1)][0].astype(jnp.float32)   # (Wx, Cxp)
            r1 = x_ref[0, pl.ds(i1, 1)][0].astype(jnp.float32)
            row = (1.0 - frac) * r0 + frac * r1
        up = jnp.dot(rw, row, preferred_element_type=jnp.float32)  # (Wl, Cxp)
        o_ref[0, r, :, :cx_pad] = up.astype(o_ref.dtype)


def upsample_project_concat(x_p, low_p, w_proj_p, *, bn_scale, th):
    B, Hx, Wx, Cxp = x_p.shape
    _, Hl, Wl, Clp = low_p.shape
    Cpp = w_proj_p.shape[-1]
    n_tiles = Hl // th
    rw = _bilinear_matrix(Wl, Wx)                       # (Wl, Wx) f32

    kernel = functools.partial(
        _upsample_project_concat_kernel,
        th=th, hx=Hx, hl=Hl, cx_pad=Cxp, bn_scale=bn_scale)

    return pl.pallas_call(
        kernel,
        out_shape=jax.ShapeDtypeStruct((B, Hl, Wl, Cxp + Cpp), jnp.bfloat16),
        grid_spec=pltpu.PrefetchScalarGridSpec(
            num_scalar_prefetch=0,
            grid=(B, n_tiles),
            in_specs=[
                pl.BlockSpec((Wl, Wx), lambda b, i: (0, 0)),
                pl.BlockSpec((1, Hx, Wx, Cxp), lambda b, i: (b, 0, 0, 0)),
                pl.BlockSpec((1, th, Wl, Clp), lambda b, i: (b, i, 0, 0)),
                pl.BlockSpec((Clp, Cpp), lambda b, i: (0, 0)),
            ],
            out_specs=pl.BlockSpec((1, th, Wl, Cxp + Cpp),
                                   lambda b, i: (b, i, 0, 0)),
        ),
        compiler_params=pltpu.CompilerParams(
            dimension_semantics=("parallel", "arbitrary"),
            vmem_limit_bytes=VMEM_LIMIT),
    )(rw, x_p, low_p, w_proj_p)


# --------------------------------------------------------------------------
# Pallas kernel 2: row-tiled 3x3 conv (padding=1, no bias) + folded BN + ReLU,
# optionally fused with the final 1x1 classifier (with bias).
# grid = (B, H // TH).  The (TH+2)-row halo window is fetched with a manual
# DMA from HBM and zero-padded in VMEM; width taps are handled with shifted
# accumulations into a per-tile f32 VMEM accumulator.
# --------------------------------------------------------------------------
def _conv3x3_kernel(*refs, n_tiles, bn_scale, fuse_cls):
    if fuse_cls:
        x_hbm, w_ref, wcls_ref, bcls_ref, o_ref, xbuf, acc_ref, sem = refs
    else:
        x_hbm, w_ref, o_ref, xbuf, acc_ref, sem = refs
        wcls_ref = bcls_ref = None

    b = pl.program_id(0)
    i = pl.program_id(1)
    th = acc_ref.shape[0]
    wd = acc_ref.shape[1]
    cin = xbuf.shape[2]
    cout = w_ref.shape[3]

    # ---- fetch the (th + 2)-row halo window; zero-pad the H borders in VMEM --
    def copy_rows(src_row, dst_row, nrows):
        cp = pltpu.make_async_copy(x_hbm.at[b, pl.ds(src_row, nrows)],
                                   xbuf.at[pl.ds(dst_row, nrows)], sem)
        cp.start()
        cp.wait()

    zero_row = jnp.zeros((wd, cin), xbuf.dtype)
    if n_tiles == 1:
        xbuf[0] = zero_row
        xbuf[th + 1] = zero_row
        copy_rows(0, 1, th)
    else:
        r0 = i * th

        @pl.when(i == 0)
        def _():
            xbuf[0] = zero_row
            copy_rows(0, 1, th + 1)

        @pl.when(i == n_tiles - 1)
        def _():
            xbuf[th + 1] = zero_row
            copy_rows(r0 - 1, 0, th + 1)

        @pl.when(jnp.logical_and(i > 0, i < n_tiles - 1))
        def _():
            copy_rows(r0 - 1, 0, th + 2)

    # ---- conv: slabs sliced only along H; dx taps via shifted accumulation --
    def tap_sum(dx):
        y = None
        for dy in range(3):
            slab = xbuf[dy:dy + th].reshape(th * wd, cin)       # bf16
            contrib = jnp.dot(slab, w_ref[dy, dx],
                              preferred_element_type=jnp.float32)
            y = contrib if y is None else y + contrib
        return y.reshape(th, wd, cout)

    acc_ref[...] = tap_sum(1)                        # center taps (dx = 1)
    y_l = tap_sum(0)                                 # left taps -> columns >= 1
    acc_ref[:, 1:, :] += y_l[:, :wd - 1, :]
    y_r = tap_sum(2)                                 # right taps -> columns <= W-2
    acc_ref[:, :wd - 1, :] += y_r[:, 1:, :]

    h = jnp.maximum(acc_ref[...] * bn_scale, 0.0)    # folded eval-BN + ReLU (f32)

    if fuse_cls:
        ncp = wcls_ref.shape[1]
        logits = jnp.dot(h.reshape(th * wd, cout).astype(wcls_ref.dtype),
                         wcls_ref[...], preferred_element_type=jnp.float32)
        logits = logits + bcls_ref[0]
        o_ref[0] = logits.reshape(th, wd, ncp).astype(o_ref.dtype)
    else:
        o_ref[0] = h.astype(o_ref.dtype)


def conv3x3_bn_relu(x, w_hwio, *, bn_scale, th, wcls=None, bcls=None,
                    out_dtype=jnp.bfloat16):
    B, H, W, Cin = x.shape
    Cout = w_hwio.shape[-1]
    assert H % th == 0
    n_tiles = H // th
    fuse = wcls is not None
    o_ch = wcls.shape[-1] if fuse else Cout

    in_specs = [
        pl.BlockSpec(memory_space=pl.ANY),                          # raw HBM, manual DMA
        pl.BlockSpec((3, 3, Cin, Cout), lambda b, i: (0, 0, 0, 0)),
    ]
    args = [x, w_hwio]
    if fuse:
        in_specs += [
            pl.BlockSpec(wcls.shape, lambda b, i: (0, 0)),
            pl.BlockSpec(bcls.shape, lambda b, i: (0, 0)),
        ]
        args += [wcls, bcls]

    kernel = functools.partial(_conv3x3_kernel, n_tiles=n_tiles,
                               bn_scale=bn_scale, fuse_cls=fuse)

    return pl.pallas_call(
        kernel,
        out_shape=jax.ShapeDtypeStruct((B, H, W, o_ch), out_dtype),
        grid_spec=pltpu.PrefetchScalarGridSpec(
            num_scalar_prefetch=0,
            grid=(B, n_tiles),
            in_specs=in_specs,
            out_specs=pl.BlockSpec((1, th, W, o_ch), lambda b, i: (b, i, 0, 0)),
            scratch_shapes=[
                pltpu.VMEM((th + 2, W, Cin), x.dtype),    # halo row window
                pltpu.VMEM((th, W, Cout), jnp.float32),   # f32 conv accumulator
                pltpu.SemaphoreType.DMA,
            ]),
        compiler_params=pltpu.CompilerParams(
            dimension_semantics=("parallel", "arbitrary"),
            vmem_limit_bytes=VMEM_LIMIT),
    )(*args)


# --------------------------------------------------------------------------
# Parameter init (deterministic; mimics kaiming_normal fan_out + zero bias).
# --------------------------------------------------------------------------
def init_params(key, in_ch, low_ch, num_classes, proj_ch, hidden):
    ks = jax.random.split(key, 4)

    def kaiming(k, shape, fan_out):
        return jax.random.normal(k, shape, jnp.float32) * math.sqrt(2.0 / fan_out)

    return {
        # 1x1 conv weights stored as (Cin, Cout); 3x3 conv weights as HWIO
        "w_proj": kaiming(ks[0], (low_ch, proj_ch), proj_ch * 1 * 1),
        "w_dec1": kaiming(ks[1], (3, 3, in_ch + proj_ch, hidden), hidden * 9),
        "w_dec2": kaiming(ks[2], (3, 3, hidden, hidden), hidden * 9),
        "w_cls": kaiming(ks[3], (hidden, num_classes), num_classes * 1 * 1),
        "b_cls": jnp.zeros((num_classes,), jnp.float32),
    }


# --------------------------------------------------------------------------
# Full forward pass (NCHW in / NCHW out, matching the PyTorch module).
# --------------------------------------------------------------------------
def deeplabv3plus_decoder(params, x_nchw, low_nchw):
    x = jnp.transpose(x_nchw, (0, 2, 3, 1))       # NHWC
    low = jnp.transpose(low_nchw, (0, 2, 3, 1))   # NHWC
    B, Hx, Wx, Cx = x.shape
    _, Hl, Wl, Cl = low.shape

    w_proj = params["w_proj"]       # (Cl, proj)
    w_dec1 = params["w_dec1"]       # (3, 3, Cx + proj, hidden)
    w_dec2 = params["w_dec2"]       # (3, 3, hidden, hidden)
    w_cls = params["w_cls"]         # (hidden, classes)
    b_cls = params["b_cls"]         # (classes,)
    proj = w_proj.shape[1]
    hidden = w_dec1.shape[-1]
    ncls = w_cls.shape[-1]

    # lane-dense (multiple-of-128) channel padding for every kernel operand
    cxp, clp = _round_up(Cx), _round_up(Cl)
    cpp, hidp, nclsp = _round_up(proj), _round_up(hidden), _round_up(ncls)

    bn_scale = 1.0 / math.sqrt(1.0 + BN_EPS)      # eval-mode BN with default stats
    th = _largest_divisor_leq(Hl, 8)              # spatial row-tile height

    x_p = _pad_axis(x, 3, cxp).astype(jnp.bfloat16)
    low_p = _pad_axis(low, 3, clp).astype(jnp.bfloat16)

    w_proj_p = _pad_axis(_pad_axis(w_proj, 0, clp), 1, cpp).astype(jnp.bfloat16)
    # remap the first decoder conv's input channels onto the padded concat layout
    w1p = jnp.zeros((3, 3, cxp + cpp, hidp), jnp.float32)
    w1p = w1p.at[:, :, :Cx, :hidden].set(w_dec1[:, :, :Cx, :])
    w1p = w1p.at[:, :, cxp:cxp + proj, :hidden].set(w_dec1[:, :, Cx:, :])
    w1p = w1p.astype(jnp.bfloat16)
    w2p = _pad_axis(_pad_axis(w_dec2, 2, hidp), 3, hidp).astype(jnp.bfloat16)
    wclsp = _pad_axis(_pad_axis(w_cls, 0, hidp), 1, nclsp).astype(jnp.bfloat16)
    bclsp = _pad_axis(b_cls, 0, nclsp).reshape(1, nclsp).astype(jnp.float32)

    # 1) fused: bilinear upsample + low-level projection (1x1+BN+ReLU) + concat
    cat = upsample_project_concat(x_p, low_p, w_proj_p, bn_scale=bn_scale, th=th)
    # 2) decoder conv 3x3 + BN + ReLU
    h = conv3x3_bn_relu(cat, w1p, bn_scale=bn_scale, th=th)
    # 3) decoder conv 3x3 + BN + ReLU with the final 1x1 classifier fused in
    logits = conv3x3_bn_relu(h, w2p, bn_scale=bn_scale, th=th,
                             wcls=wclsp, bcls=bclsp, out_dtype=jnp.float32)

    out = logits[..., :ncls]
    # TODO(synk): keep NCHW output to match the PyTorch module; drop this
    # transpose if the downstream consumer accepts NHWC directly.
    return jnp.transpose(out, (0, 3, 1, 2))


if __name__ == "__main__":
    # small shapes consistent with the module's forward contract
    B = 2
    in_channels, Hx, Wx = 32, 8, 8            # ASPP output
    low_channels, Hl, Wl = 16, 16, 16         # low-level features
    num_classes = 8
    proj_ch = 48
    hidden = 32

    key = jax.random.PRNGKey(0)
    kx, kl, kp = jax.random.split(key, 3)
    x = jax.random.normal(kx, (B, in_channels, Hx, Wx), jnp.float32)
    low_level_feat = jax.random.normal(kl, (B, low_channels, Hl, Wl), jnp.float32)

    params = init_params(kp, in_channels, low_channels, num_classes,
                         proj_ch, hidden)

    fwd = jax.jit(deeplabv3plus_decoder)
    out = fwd(params, x, low_level_feat)
    out = jax.block_until_ready(out)

    assert out.shape == (B, num_classes, Hl, Wl), out.shape
    assert bool(jnp.all(jnp.isfinite(out)))
    print("KERNEL_OK")
</pallas_src>

<mosaic_0001>
module attributes {stable_mosaic.version = 11 : i64} {
  func.func @_conv3x3_kernel(%arg0: i32, %arg1: i32, %arg2: memref<2x16x16x256xbf16, #tpu.memory_space<any>>, %arg3: memref<3x3x256x128xbf16, #tpu.memory_space<vmem>>, %arg4: memref<1x8x16x128xbf16, #tpu.memory_space<vmem>>, %arg5: memref<10x16x256xbf16, #tpu.memory_space<vmem>>, %arg6: memref<8x16x128xf32, #tpu.memory_space<vmem>>, %arg7: memref<!tpu.dma_semaphore, #tpu.memory_space<semaphore_mem>>) attributes {dimension_semantics = [#tpu.dimension_semantics<parallel>, #tpu.dimension_semantics<arbitrary>], iteration_bounds = array<i64: 2, 2>, scalar_prefetch = 0 : i64, scratch_operands = 3 : i64, tpu.core_type = #tpu.core_type<tc>, window_params = [{}, {pipeline_mode = #tpu.pipeline_mode<synchronous>, transform_indices = @transform_1, window_bounds = array<i64: 3, 3, 256, 128>}, {transform_indices = @transform_2, window_bounds = array<i64: 1, 8, 16, 128>}]} {
    %cst = arith.constant 0.000000e+00 : bf16
    %0 = vector.broadcast %cst : bf16 to vector<16x256xbf16>
    %c8_i32 = arith.constant 8 : i32
    %1 = arith.muli %arg1, %c8_i32 : i32
    %c0_i32 = arith.constant 0 : i32
    %2 = arith.cmpi eq, %arg1, %c0_i32 : i32
    %3 = arith.extui %2 : i1 to i32
    %c0_i32_0 = arith.constant 0 : i32
    %4 = arith.cmpi ne, %3, %c0_i32_0 : i32
    scf.if %4 {
      %c0_98 = arith.constant 0 : index
      %c0_99 = arith.constant 0 : index
      %c0_100 = arith.constant 0 : index
      %85 = vector.load %arg5[%c0_98, %c0_99, %c0_100] : memref<10x16x256xbf16, #tpu.memory_space<vmem>>, vector<1x16x256xbf16>
      %86 = vector.shape_cast %85 : vector<1x16x256xbf16> to vector<16x256xbf16>
      %87 = vector.shape_cast %0 : vector<16x256xbf16> to vector<1x16x256xbf16>
      tpu.vector_store %arg5[%c0_98, %c0_99, %c0_100], %87 {strides = array<i32>} : memref<10x16x256xbf16, #tpu.memory_space<vmem>>, vector<1x16x256xbf16>,
      %c0_i32_101 = arith.constant 0 : i32
      %c0_i32_102 = arith.constant 0 : i32
      %c0_i32_103 = arith.constant 0 : i32
      %88 = tpu.memref_slice %arg2[%arg0, %c0_i32_101, %c0_i32_102, %c0_i32_103] : memref<2x16x16x256xbf16, #tpu.memory_space<any>> -> memref<1x9x16x256xbf16, #tpu.memory_space<any>>
      %89 = tpu.memref_squeeze %88 : memref<1x9x16x256xbf16, #tpu.memory_space<any>> -> memref<9x16x256xbf16, #tpu.memory_space<any>>
      %c1_i32_104 = arith.constant 1 : i32
      %c0_i32_105 = arith.constant 0 : i32
      %c0_i32_106 = arith.constant 0 : i32
      %90 = tpu.memref_slice %arg5[%c1_i32_104, %c0_i32_105, %c0_i32_106] : memref<10x16x256xbf16, #tpu.memory_space<vmem>> -> memref<9x16x256xbf16, #tpu.memory_space<vmem>>
      tpu.enqueue_dma source(%89 : memref<9x16x256xbf16, #tpu.memory_space<any>>) target(%90 : memref<9x16x256xbf16, #tpu.memory_space<vmem>>) target_semaphore(%arg7 : memref<!tpu.dma_semaphore, #tpu.memory_space<semaphore_mem>>)
      %c0_i32_107 = arith.constant 0 : i32
      %c0_i32_108 = arith.constant 0 : i32
      %c0_i32_109 = arith.constant 0 : i32
      %91 = tpu.memref_slice %arg2[%arg0, %c0_i32_107, %c0_i32_108, %c0_i32_109] : memref<2x16x16x256xbf16, #tpu.memory_space<any>> -> memref<1x9x16x256xbf16, #tpu.memory_space<any>>
      %92 = tpu.memref_squeeze %91 : memref<1x9x16x256xbf16, #tpu.memory_space<any>> -> memref<9x16x256xbf16, #tpu.memory_space<any>>
      %c1_i32_110 = arith.constant 1 : i32
      %c0_i32_111 = arith.constant 0 : i32
      %c0_i32_112 = arith.constant 0 : i32
      %93 = tpu.memref_slice %arg5[%c1_i32_110, %c0_i32_111, %c0_i32_112] : memref<10x16x256xbf16, #tpu.memory_space<vmem>> -> memref<9x16x256xbf16, #tpu.memory_space<vmem>>
      tpu.wait_dma2 semaphore(%arg7 : memref<!tpu.dma_semaphore, #tpu.memory_space<semaphore_mem>>) src(%92 : memref<9x16x256xbf16, #tpu.memory_space<any>>) dst(%93 : memref<9x16x256xbf16, #tpu.memory_space<vmem>>)
    } else {
    }
    %c1_i32 = arith.constant 1 : i32
    %5 = arith.cmpi eq, %arg1, %c1_i32 : i32
    %6 = arith.extui %5 : i1 to i32
    %c0_i32_1 = arith.constant 0 : i32
    %7 = arith.cmpi ne, %6, %c0_i32_1 : i32
    scf.if %7 {
      %c9 = arith.constant 9 : index
      %c0_98 = arith.constant 0 : index
      %c0_99 = arith.constant 0 : index
      %85 = vector.load %arg5[%c9, %c0_98, %c0_99] : memref<10x16x256xbf16, #tpu.memory_space<vmem>>, vector<1x16x256xbf16>
      %86 = vector.shape_cast %85 : vector<1x16x256xbf16> to vector<16x256xbf16>
      %87 = vector.shape_cast %0 : vector<16x256xbf16> to vector<1x16x256xbf16>
      tpu.vector_store %arg5[%c9, %c0_98, %c0_99], %87 {strides = array<i32>} : memref<10x16x256xbf16, #tpu.memory_space<vmem>>, vector<1x16x256xbf16>,
      %c1_i32_100 = arith.constant 1 : i32
      %88 = arith.subi %1, %c1_i32_100 : i32
      %c0_i32_101 = arith.constant 0 : i32
      %c0_i32_102 = arith.constant 0 : i32
      %89 = tpu.memref_slice %arg2[%arg0, %88, %c0_i32_101, %c0_i32_102] : memref<2x16x16x256xbf16, #tpu.memory_space<any>> -> memref<1x9x16x256xbf16, #tpu.memory_space<any>>
      %90 = tpu.memref_squeeze %89 : memref<1x9x16x256xbf16, #tpu.memory_space<any>> -> memref<9x16x256xbf16, #tpu.memory_space<any>>
      %c0_i32_103 = arith.constant 0 : i32
      %c0_i32_104 = arith.constant 0 : i32
      %c0_i32_105 = arith.constant 0 : i32
      %91 = tpu.memref_slice %arg5[%c0_i32_103, %c0_i32_104, %c0_i32_105] : memref<10x16x256xbf16, #tpu.memory_space<vmem>> -> memref<9x16x256xbf16, #tpu.memory_space<vmem>>
      tpu.enqueue_dma source(%90 : memref<9x16x256xbf16, #tpu.memory_space<any>>) target(%91 : memref<9x16x256xbf16, #tpu.memory_space<vmem>>) target_semaphore(%arg7 : memref<!tpu.dma_semaphore, #tpu.memory_space<semaphore_mem>>)
      %c0_i32_106 = arith.constant 0 : i32
      %c0_i32_107 = arith.constant 0 : i32
      %92 = tpu.memref_slice %arg2[%arg0, %88, %c0_i32_106, %c0_i32_107] : memref<2x16x16x256xbf16, #tpu.memory_space<any>> -> memref<1x9x16x256xbf16, #tpu.memory_space<any>>
      %93 = tpu.memref_squeeze %92 : memref<1x9x16x256xbf16, #tpu.memory_space<any>> -> memref<9x16x256xbf16, #tpu.memory_space<any>>
      %c0_i32_108 = arith.constant 0 : i32
      %c0_i32_109 = arith.constant 0 : i32
      %c0_i32_110 = arith.constant 0 : i32
      %94 = tpu.memref_slice %arg5[%c0_i32_108, %c0_i32_109, %c0_i32_110] : memref<10x16x256xbf16, #tpu.memory_space<vmem>> -> memref<9x16x256xbf16, #tpu.memory_space<vmem>>
      tpu.wait_dma2 semaphore(%arg7 : memref<!tpu.dma_semaphore, #tpu.memory_space<semaphore_mem>>) src(%93 : memref<9x16x256xbf16, #tpu.memory_space<any>>) dst(%94 : memref<9x16x256xbf16, #tpu.memory_space<vmem>>)
    } else {
    }
    %c0_i32_2 = arith.constant 0 : i32
    %8 = arith.cmpi sgt, %arg1, %c0_i32_2 : i32
    %c1_i32_3 = arith.constant 1 : i32
    %9 = arith.cmpi slt, %arg1, %c1_i32_3 : i32
    %10 = arith.andi %8, %9 : i1
    %11 = arith.extui %10 : i1 to i32
    %c0_i32_4 = arith.constant 0 : i32
    %12 = arith.cmpi ne, %11, %c0_i32_4 : i32
    scf.if %12 {
      %c1_i32_98 = arith.constant 1 : i32
      %85 = arith.subi %1, %c1_i32_98 : i32
      %c0_i32_99 = arith.constant 0 : i32
      %c0_i32_100 = arith.constant 0 : i32
      %86 = tpu.memref_slice %arg2[%arg0, %85, %c0_i32_99, %c0_i32_100] : memref<2x16x16x256xbf16, #tpu.memory_space<any>> -> memref<1x10x16x256xbf16, #tpu.memory_space<any>>
      %87 = tpu.memref_squeeze %86 : memref<1x10x16x256xbf16, #tpu.memory_space<any>> -> memref<10x16x256xbf16, #tpu.memory_space<any>>
      %c0_i32_101 = arith.constant 0 : i32
      %c0_i32_102 = arith.constant 0 : i32
      %c0_i32_103 = arith.constant 0 : i32
      %88 = tpu.memref_slice %arg5[%c0_i32_101, %c0_i32_102, %c0_i32_103] : memref<10x16x256xbf16, #tpu.memory_space<vmem>> -> memref<10x16x256xbf16, #tpu.memory_space<vmem>>
      tpu.enqueue_dma source(%87 : memref<10x16x256xbf16, #tpu.memory_space<any>>) target(%88 : memref<10x16x256xbf16, #tpu.memory_space<vmem>>) target_semaphore(%arg7 : memref<!tpu.dma_semaphore, #tpu.memory_space<semaphore_mem>>)
      %c0_i32_104 = arith.constant 0 : i32
      %c0_i32_105 = arith.constant 0 : i32
      %89 = tpu.memref_slice %arg2[%arg0, %85, %c0_i32_104, %c0_i32_105] : memref<2x16x16x256xbf16, #tpu.memory_space<any>> -> memref<1x10x16x256xbf16, #tpu.memory_space<any>>
      %90 = tpu.memref_squeeze %89 : memref<1x10x16x256xbf16, #tpu.memory_space<any>> -> memref<10x16x256xbf16, #tpu.memory_space<any>>
      %c0_i32_106 = arith.constant 0 : i32
      %c0_i32_107 = arith.constant 0 : i32
      %c0_i32_108 = arith.constant 0 : i32
      %91 = tpu.memref_slice %arg5[%c0_i32_106, %c0_i32_107, %c0_i32_108] : memref<10x16x256xbf16, #tpu.memory_space<vmem>> -> memref<10x16x256xbf16, #tpu.memory_space<vmem>>
      tpu.wait_dma2 semaphore(%arg7 : memref<!tpu.dma_semaphore, #tpu.memory_space<semaphore_mem>>) src(%90 : memref<10x16x256xbf16, #tpu.memory_space<any>>) dst(%91 : memref<10x16x256xbf16, #tpu.memory_space<vmem>>)
    } else {
    }
    %c0 = arith.constant 0 : index
    %c0_5 = arith.constant 0 : index
    %c0_6 = arith.constant 0 : index
    %13 = vector.load %arg5[%c0, %c0_5, %c0_6] : memref<10x16x256xbf16, #tpu.memory_space<vmem>>, vector<8x16x256xbf16>
    %14 = vector.shape_cast %13 : vector<8x16x256xbf16> to vector<128x256xbf16>
    %c0_7 = arith.constant 0 : index
    %c1 = arith.constant 1 : index
    %c0_8 = arith.constant 0 : index
    %c0_9 = arith.constant 0 : index
    %15 = vector.load %arg3[%c0_7, %c1, %c0_8, %c0_9] : memref<3x3x256x128xbf16, #tpu.memory_space<vmem>>, vector<1x1x256x128xbf16>
    %16 = vector.shape_cast %15 : vector<1x1x256x128xbf16> to vector<256x128xbf16>
    %cst_10 = arith.constant dense<0.000000e+00> : vector<128x128xf32>
    %17 = tpu.matmul %14, %16, %cst_10 {dimension_numbers = #tpu.dot_dimension_numbers<[1], [0], [0], [1], [0, 0, 1, 1], [], []>} : vector<128x256xbf16>, vector<256x128xbf16>, vector<128x128xf32> -> vector<128x128xf32>
    %c1_11 = arith.constant 1 : index
    %c0_12 = arith.constant 0 : index
    %c0_13 = arith.constant 0 : index
    %18 = vector.load %arg5[%c1_11, %c0_12, %c0_13] : memref<10x16x256xbf16, #tpu.memory_space<vmem>>, vector<8x16x256xbf16>
    %19 = vector.shape_cast %18 : vector<8x16x256xbf16> to vector<128x256xbf16>
    %c1_14 = arith.constant 1 : index
    %c1_15 = arith.constant 1 : index
    %c0_16 = arith.constant 0 : index
    %c0_17 = arith.constant 0 : index
    %20 = vector.load %arg3[%c1_14, %c1_15, %c0_16, %c0_17] : memref<3x3x256x128xbf16, #tpu.memory_space<vmem>>, vector<1x1x256x128xbf16>
    %21 = vector.shape_cast %20 : vector<1x1x256x128xbf16> to vector<256x128xbf16>
    %cst_18 = arith.constant dense<0.000000e+00> : vector<128x128xf32>
    %22 = tpu.matmul %19, %21, %cst_18 {dimension_numbers = #tpu.dot_dimension_numbers<[1], [0], [0], [1], [0, 0, 1, 1], [], []>} : vector<128x256xbf16>, vector<256x128xbf16>, vector<128x128xf32> -> vector<128x128xf32>
    %23 = arith.addf %17, %22 : vector<128x128xf32>
    %c2 = arith.constant 2 : index
    %c0_19 = arith.constant 0 : index
    %c0_20 = arith.constant 0 : index
    %24 = vector.load %arg5[%c2, %c0_19, %c0_20] : memref<10x16x256xbf16, #tpu.memory_space<vmem>>, vector<8x16x256xbf16>
    %25 = vector.shape_cast %24 : vector<8x16x256xbf16> to vector<128x256xbf16>
    %c2_21 = arith.constant 2 : index
    %c1_22 = arith.constant 1 : index
    %c0_23 = arith.constant 0 : index
    %c0_24 = arith.constant 0 : index
    %26 = vector.load %arg3[%c2_21, %c1_22, %c0_23, %c0_24] : memref<3x3x256x128xbf16, #tpu.memory_space<vmem>>, vector<1x1x256x128xbf16>
    %27 = vector.shape_cast %26 : vector<1x1x256x128xbf16> to vector<256x128xbf16>
    %cst_25 = arith.constant dense<0.000000e+00> : vector<128x128xf32>
    %28 = tpu.matmul %25, %27, %cst_25 {dimension_numbers = #tpu.dot_dimension_numbers<[1], [0], [0], [1], [0, 0, 1, 1], [], []>} : vector<128x256xbf16>, vector<256x128xbf16>, vector<128x128xf32> -> vector<128x128xf32>
    %29 = arith.addf %23, %28 : vector<128x128xf32>
    %30 = vector.shape_cast %29 : vector<128x128xf32> to vector<8x16x128xf32>
    %c0_26 = arith.constant 0 : index
    %c0_27 = arith.constant 0 : index
    %c0_28 = arith.constant 0 : index
    %31 = vector.load %arg6[%c0_26, %c0_27, %c0_28] : memref<8x16x128xf32, #tpu.memory_space<vmem>>, vector<8x16x128xf32>
    tpu.vector_store %arg6[%c0_26, %c0_27, %c0_28], %30 {strides = array<i32>} : memref<8x16x128xf32, #tpu.memory_space<vmem>>, vector<8x16x128xf32>,
    %c0_29 = arith.constant 0 : index
    %c0_30 = arith.constant 0 : index
    %c0_31 = arith.constant 0 : index
    %32 = vector.load %arg5[%c0_29, %c0_30, %c0_31] : memref<10x16x256xbf16, #tpu.memory_space<vmem>>, vector<8x16x256xbf16>
    %33 = vector.shape_cast %32 : vector<8x16x256xbf16> to vector<128x256xbf16>
    %c0_32 = arith.constant 0 : index
    %c0_33 = arith.constant 0 : index
    %c0_34 = arith.constant 0 : index
    %c0_35 = arith.constant 0 : index
    %34 = vector.load %arg3[%c0_32, %c0_33, %c0_34, %c0_35] : memref<3x3x256x128xbf16, #tpu.memory_space<vmem>>, vector<1x1x256x128xbf16>
    %35 = vector.shape_cast %34 : vector<1x1x256x128xbf16> to vector<256x128xbf16>
    %cst_36 = arith.constant dense<0.000000e+00> : vector<128x128xf32>
    %36 = tpu.matmul %33, %35, %cst_36 {dimension_numbers = #tpu.dot_dimension_numbers<[1], [0], [0], [1], [0, 0, 1, 1], [], []>} : vector<128x256xbf16>, vector<256x128xbf16>, vector<128x128xf32> -> vector<128x128xf32>
    %c1_37 = arith.constant 1 : index
    %c0_38 = arith.constant 0 : index
    %c0_39 = arith.constant 0 : index
    %37 = vector.load %arg5[%c1_37, %c0_38, %c0_39] : memref<10x16x256xbf16, #tpu.memory_space<vmem>>, vector<8x16x256xbf16>
    %38 = vector.shape_cast %37 : vector<8x16x256xbf16> to vector<128x256xbf16>
    %c1_40 = arith.constant 1 : index
    %c0_41 = arith.constant 0 : index
    %c0_42 = arith.constant 0 : index
    %c0_43 = arith.constant 0 : index
    %39 = vector.load %arg3[%c1_40, %c0_41, %c0_42, %c0_43] : memref<3x3x256x128xbf16, #tpu.memory_space<vmem>>, vector<1x1x256x128xbf16>
    %40 = vector.shape_cast %39 : vector<1x1x256x128xbf16> to vector<256x128xbf16>
    %cst_44 = arith.constant dense<0.000000e+00> : vector<128x128xf32>
    %41 = tpu.matmul %38, %40, %cst_44 {dimension_numbers = #tpu.dot_dimension_numbers<[1], [0], [0], [1], [0, 0, 1, 1], [], []>} : vector<128x256xbf16>, vector<256x128xbf16>, vector<128x128xf32> -> vector<128x128xf32>
    %42 = arith.addf %36, %41 : vector<128x128xf32>
    %c2_45 = arith.constant 2 : index
    %c0_46 = arith.constant 0 : index
    %c0_47 = arith.constant 0 : index
    %43 = vector.load %arg5[%c2_45, %c0_46, %c0_47] : memref<10x16x256xbf16, #tpu.memory_space<vmem>>, vector<8x16x256xbf16>
    %44 = vector.shape_cast %43 : vector<8x16x256xbf16> to vector<128x256xbf16>
    %c2_48 = arith.constant 2 : index
    %c0_49 = arith.constant 0 : index
    %c0_50 = arith.constant 0 : index
    %c0_51 = arith.constant 0 : index
    %45 = vector.load %arg3[%c2_48, %c0_49, %c0_50, %c0_51] : memref<3x3x256x128xbf16, #tpu.memory_space<vmem>>, vector<1x1x256x128xbf16>
    %46 = vector.shape_cast %45 : vector<1x1x256x128xbf16> to vector<256x128xbf16>
    %cst_52 = arith.constant dense<0.000000e+00> : vector<128x128xf32>
    %47 = tpu.matmul %44, %46, %cst_52 {dimension_numbers = #tpu.dot_dimension_numbers<[1], [0], [0], [1], [0, 0, 1, 1], [], []>} : vector<128x256xbf16>, vector<256x128xbf16>, vector<128x128xf32> -> vector<128x128xf32>
    %48 = arith.addf %42, %47 : vector<128x128xf32>
    %49 = vector.shape_cast %48 : vector<128x128xf32> to vector<8x16x128xf32>
    %c0_53 = arith.constant 0 : index
    %c1_54 = arith.constant 1 : index
    %c0_55 = arith.constant 0 : index
    %50 = vector.load %arg6[%c0_53, %c1_54, %c0_55] : memref<8x16x128xf32, #tpu.memory_space<vmem>>, vector<8x15x128xf32>
    %51 = vector.extract_strided_slice %49 {offsets = [0, 0, 0], sizes = [8, 15, 128], strides = [1, 1, 1]} : vector<8x16x128xf32> to vector<8x15x128xf32>
    %52 = arith.addf %50, %51 : vector<8x15x128xf32>
    %c0_56 = arith.constant 0 : index
    %c1_57 = arith.constant 1 : index
    %c0_58 = arith.constant 0 : index
    %53 = vector.load %arg6[%c0_56, %c1_57, %c0_58] : memref<8x16x128xf32, #tpu.memory_space<vmem>>, vector<8x15x128xf32>
    tpu.vector_store %arg6[%c0_56, %c1_57, %c0_58], %52 {strides = array<i32>} : memref<8x16x128xf32, #tpu.memory_space<vmem>>, vector<8x15x128xf32>,
    %c0_59 = arith.constant 0 : index
    %c0_60 = arith.constant 0 : index
    %c0_61 = arith.constant 0 : index
    %54 = vector.load %arg5[%c0_59, %c0_60, %c0_61] : memref<10x16x256xbf16, #tpu.memory_space<vmem>>, vector<8x16x256xbf16>
    %55 = vector.shape_cast %54 : vector<8x16x256xbf16> to vector<128x256xbf16>
    %c0_62 = arith.constant 0 : index
    %c2_63 = arith.constant 2 : index
    %c0_64 = arith.constant 0 : index
    %c0_65 = arith.constant 0 : index
    %56 = vector.load %arg3[%c0_62, %c2_63, %c0_64, %c0_65] : memref<3x3x256x128xbf16, #tpu.memory_space<vmem>>, vector<1x1x256x128xbf16>
    %57 = vector.shape_cast %56 : vector<1x1x256x128xbf16> to vector<256x128xbf16>
    %cst_66 = arith.constant dense<0.000000e+00> : vector<128x128xf32>
    %58 = tpu.matmul %55, %57, %cst_66 {dimension_numbers = #tpu.dot_dimension_numbers<[1], [0], [0], [1], [0, 0, 1, 1], [], []>} : vector<128x256xbf16>, vector<256x128xbf16>, vector<128x128xf32> -> vector<128x128xf32>
    %c1_67 = arith.constant 1 : index
    %c0_68 = arith.constant 0 : index
    %c0_69 = arith.constant 0 : index
    %59 = vector.load %arg5[%c1_67, %c0_68, %c0_69] : memref<10x16x256xbf16, #tpu.memory_space<vmem>>, vector<8x16x256xbf16>
    %60 = vector.shape_cast %59 : vector<8x16x256xbf16> to vector<128x256xbf16>
    %c1_70 = arith.constant 1 : index
    %c2_71 = arith.constant 2 : index
    %c0_72 = arith.constant 0 : index
    %c0_73 = arith.constant 0 : index
    %61 = vector.load %arg3[%c1_70, %c2_71, %c0_72, %c0_73] : memref<3x3x256x128xbf16, #tpu.memory_space<vmem>>, vector<1x1x256x128xbf16>
    %62 = vector.shape_cast %61 : vector<1x1x256x128xbf16> to vector<256x128xbf16>
    %cst_74 = arith.constant dense<0.000000e+00> : vector<128x128xf32>
    %63 = tpu.matmul %60, %62, %cst_74 {dimension_numbers = #tpu.dot_dimension_numbers<[1], [0], [0], [1], [0, 0, 1, 1], [], []>} : vector<128x256xbf16>, vector<256x128xbf16>, vector<128x128xf32> -> vector<128x128xf32>
    %64 = arith.addf %58, %63 : vector<128x128xf32>
    %c2_75 = arith.constant 2 : index
    %c0_76 = arith.constant 0 : index
    %c0_77 = arith.constant 0 : index
    %65 = vector.load %arg5[%c2_75, %c0_76, %c0_77] : memref<10x16x256xbf16, #tpu.memory_space<vmem>>, vector<8x16x256xbf16>
    %66 = vector.shape_cast %65 : vector<8x16x256xbf16> to vector<128x256xbf16>
    %c2_78 = arith.constant 2 : index
    %c2_79 = arith.constant 2 : index
    %c0_80 = arith.constant 0 : index
    %c0_81 = arith.constant 0 : index
    %67 = vector.load %arg3[%c2_78, %c2_79, %c0_80, %c0_81] : memref<3x3x256x128xbf16, #tpu.memory_space<vmem>>, vector<1x1x256x128xbf16>
    %68 = vector.shape_cast %67 : vector<1x1x256x128xbf16> to vector<256x128xbf16>
    %cst_82 = arith.constant dense<0.000000e+00> : vector<128x128xf32>
    %69 = tpu.matmul %66, %68, %cst_82 {dimension_numbers = #tpu.dot_dimension_numbers<[1], [0], [0], [1], [0, 0, 1, 1], [], []>} : vector<128x256xbf16>, vector<256x128xbf16>, vector<128x128xf32> -> vector<128x128xf32>
    %70 = arith.addf %64, %69 : vector<128x128xf32>
    %71 = vector.shape_cast %70 : vector<128x128xf32> to vector<8x16x128xf32>
    %c0_83 = arith.constant 0 : index
    %c0_84 = arith.constant 0 : index
    %c0_85 = arith.constant 0 : index
    %72 = vector.load %arg6[%c0_83, %c0_84, %c0_85] : memref<8x16x128xf32, #tpu.memory_space<vmem>>, vector<8x15x128xf32>
    %73 = vector.extract_strided_slice %71 {offsets = [0, 1, 0], sizes = [8, 15, 128], strides = [1, 1, 1]} : vector<8x16x128xf32> to vector<8x15x128xf32>
    %74 = arith.addf %72, %73 : vector<8x15x128xf32>
    %c0_86 = arith.constant 0 : index
    %c0_87 = arith.constant 0 : index
    %c0_88 = arith.constant 0 : index
    %75 = vector.load %arg6[%c0_86, %c0_87, %c0_88] : memref<8x16x128xf32, #tpu.memory_space<vmem>>, vector<8x15x128xf32>
    tpu.vector_store %arg6[%c0_86, %c0_87, %c0_88], %74 {strides = array<i32>} : memref<8x16x128xf32, #tpu.memory_space<vmem>>, vector<8x15x128xf32>,
    %c0_89 = arith.constant 0 : index
    %c0_90 = arith.constant 0 : index
    %c0_91 = arith.constant 0 : index
    %76 = vector.load %arg6[%c0_89, %c0_90, %c0_91] : memref<8x16x128xf32, #tpu.memory_space<vmem>>, vector<8x16x128xf32>
    %cst_92 = arith.constant 0.999994993 : f32
    %77 = vector.broadcast %cst_92 : f32 to vector<8x16x128xf32>
    %78 = arith.mulf %76, %77 : vector<8x16x128xf32>
    %cst_93 = arith.constant 0.000000e+00 : f32
    %79 = vector.broadcast %cst_93 : f32 to vector<8x16x128xf32>
    %80 = arith.maximumf %78, %79 : vector<8x16x128xf32>
    %81 = arith.truncf %80 : vector<8x16x128xf32> to vector<8x16x128xbf16>
    %c0_94 = arith.constant 0 : index
    %c0_95 = arith.constant 0 : index
    %c0_96 = arith.constant 0 : index
    %c0_97 = arith.constant 0 : index
    %82 = vector.load %arg4[%c0_94, %c0_95, %c0_96, %c0_97] : memref<1x8x16x128xbf16, #tpu.memory_space<vmem>>, vector<1x8x16x128xbf16>
    %83 = vector.shape_cast %82 : vector<1x8x16x128xbf16> to vector<8x16x128xbf16>
    %84 = vector.shape_cast %81 : vector<8x16x128xbf16> to vector<1x8x16x128xbf16>
    tpu.vector_store %arg4[%c0_94, %c0_95, %c0_96, %c0_97], %84 {strides = array<i32>} : memref<1x8x16x128xbf16, #tpu.memory_space<vmem>>, vector<1x8x16x128xbf16>,
    return
  }
  func.func @transform_1(%arg0: i32, %arg1: i32) -> (i32, i32, i32, i32) {
    %c0_i32 = arith.constant 0 : i32
    %c0_i32_0 = arith.constant 0 : i32
    %c0_i32_1 = arith.constant 0 : i32
    %c0_i32_2 = arith.constant 0 : i32
    %c0_i32_3 = arith.constant 0 : i32
    return %c0_i32, %c0_i32_0, %c0_i32_1, %c0_i32_2 : i32, i32, i32, i32
  }
  func.func @transform_2(%arg0: i32, %arg1: i32) -> (i32, i32, i32, i32) {
    %c0_i32 = arith.constant 0 : i32
    %c0_i32_0 = arith.constant 0 : i32
    %c0_i32_1 = arith.constant 0 : i32
    return %arg0, %arg1, %c0_i32, %c0_i32_0 : i32, i32, i32, i32
  }
}

module attributes {stable_mosaic.version = 11 : i64} {
  func.func @_upsample_project_concat_kernel(%arg0: i32, %arg1: i32, %arg2: memref<16x8xf32, #tpu.memory_space<vmem>>, %arg3: memref<1x8x8x128xbf16, #tpu.memory_space<vmem>>, %arg4: memref<1x8x16x128xbf16, #tpu.memory_space<vmem>>, %arg5: memref<128x128xbf16, #tpu.memory_space<vmem>>, %arg6: memref<1x8x16x256xbf16, #tpu.memory_space<vmem>>) attributes {dimension_semantics = [#tpu.dimension_semantics<parallel>, #tpu.dimension_semantics<arbitrary>], iteration_bounds = array<i64: 2, 2>, scalar_prefetch = 0 : i64, scratch_operands = 0 : i64, tpu.core_type = #tpu.core_type<tc>, window_params = [{pipeline_mode = #tpu.pipeline_mode<synchronous>, transform_indices = @transform_0, window_bounds = array<i64: 16, 8>}, {transform_indices = @transform_1, window_bounds = array<i64: 1, 8, 8, 128>}, {transform_indices = @transform_2, window_bounds = array<i64: 1, 8, 16, 128>}, {pipeline_mode = #tpu.pipeline_mode<synchronous>, transform_indices = @transform_3, window_bounds = array<i64: 128, 128>}, {transform_indices = @transform_4, window_bounds = array<i64: 1, 8, 16, 256>}]} {
    %c0 = arith.constant 0 : index
    %c0_0 = arith.constant 0 : index
    %c0_1 = arith.constant 0 : index
    %c0_2 = arith.constant 0 : index
    %0 = vector.load %arg4[%c0, %c0_0, %c0_1, %c0_2] : memref<1x8x16x128xbf16, #tpu.memory_space<vmem>>, vector<1x8x16x128xbf16>
    %1 = vector.shape_cast %0 : vector<1x8x16x128xbf16> to vector<8x16x128xbf16>
    %2 = vector.shape_cast %1 : vector<8x16x128xbf16> to vector<128x128xbf16>
    %c0_3 = arith.constant 0 : index
    %c0_4 = arith.constant 0 : index
    %3 = vector.load %arg5[%c0_3, %c0_4] : memref<128x128xbf16, #tpu.memory_space<vmem>>, vector<128x128xbf16>
    %cst = arith.constant dense<0.000000e+00> : vector<128x128xf32>
    %4 = tpu.matmul %2, %3, %cst {dimension_numbers = #tpu.dot_dimension_numbers<[1], [0], [0], [1], [0, 0, 1, 1], [], []>} : vector<128x128xbf16>, vector<128x128xbf16>, vector<128x128xf32> -> vector<128x128xf32>
    %cst_5 = arith.constant 0.999994993 : f32
    %5 = vector.broadcast %cst_5 : f32 to vector<128x128xf32>
    %6 = arith.mulf %4, %5 : vector<128x128xf32>
    %cst_6 = arith.constant 0.000000e+00 : f32
    %7 = vector.broadcast %cst_6 : f32 to vector<128x128xf32>
    %8 = arith.maximumf %6, %7 : vector<128x128xf32>
    %9 = vector.shape_cast %8 : vector<128x128xf32> to vector<8x16x128xf32>
    %10 = arith.truncf %9 : vector<8x16x128xf32> to vector<8x16x128xbf16>
    %c0_7 = arith.constant 0 : index
    %c0_8 = arith.constant 0 : index
    %c0_9 = arith.constant 0 : index
    %c128 = arith.constant 128 : index
    %11 = vector.load %arg6[%c0_7, %c0_8, %c0_9, %c128] : memref<1x8x16x256xbf16, #tpu.memory_space<vmem>>, vector<1x8x16x128xbf16>
    %12 = vector.shape_cast %11 : vector<1x8x16x128xbf16> to vector<8x16x128xbf16>
    %13 = vector.shape_cast %10 : vector<8x16x128xbf16> to vector<1x8x16x128xbf16>
    tpu.vector_store %arg6[%c0_7, %c0_8, %c0_9, %c128], %13 {strides = array<i32>} : memref<1x8x16x256xbf16, #tpu.memory_space<vmem>>, vector<1x8x16x128xbf16>,
    %c0_10 = arith.constant 0 : index
    %c0_11 = arith.constant 0 : index
    %14 = vector.load %arg2[%c0_10, %c0_11] : memref<16x8xf32, #tpu.memory_space<vmem>>, vector<16x8xf32>
    %c8_i32 = arith.constant 8 : i32
    %15 = arith.muli %arg1, %c8_i32 : i32
    %c0_i32 = arith.constant 0 : i32
    %16 = arith.addi %15, %c0_i32 : i32
    %17 = arith.sitofp %16 : i32 to f32
    %cst_12 = arith.constant 5.000000e-01 : f32
    %18 = arith.addf %17, %cst_12 : f32
    %cst_13 = arith.constant 5.000000e-01 : f32
    %19 = arith.mulf %18, %cst_13 : f32
    %cst_14 = arith.constant 5.000000e-01 : f32
    %20 = arith.subf %19, %cst_14 : f32
    %cst_15 = arith.constant 0.000000e+00 : f32
    %21 = arith.maximumf %20, %cst_15 : f32
    %22 = math.floor %21 : f32
    %cst_16 = arith.constant 7.000000e+00 : f32
    %23 = arith.minimumf %22, %cst_16 : f32
    %24 = arith.subf %21, %23 : f32
    %25 = arith.fptosi %23 : f32 to i32
    %c1_i32 = arith.constant 1 : i32
    %26 = arith.addi %25, %c1_i32 : i32
    %c7_i32 = arith.constant 7 : i32
    %27 = arith.minsi %26, %c7_i32 : i32
    %c0_17 = arith.constant 0 : index
    %28 = arith.index_cast %25 : i32 to index
    %c0_18 = arith.constant 0 : index
    %c0_19 = arith.constant 0 : index
    %29 = vector.load %arg3[%c0_17, %28, %c0_18, %c0_19] : memref<1x8x8x128xbf16, #tpu.memory_space<vmem>>, vector<1x1x8x128xbf16>
    %30 = vector.shape_cast %29 : vector<1x1x8x128xbf16> to vector<1x8x128xbf16>
    %31 = vector.shape_cast %30 : vector<1x8x128xbf16> to vector<8x128xbf16>
    %32 = arith.extf %31 : vector<8x128xbf16> to vector<8x128xf32>
    %c0_20 = arith.constant 0 : index
    %33 = arith.index_cast %27 : i32 to index
    %c0_21 = arith.constant 0 : index
    %c0_22 = arith.constant 0 : index
    %34 = vector.load %arg3[%c0_20, %33, %c0_21, %c0_22] : memref<1x8x8x128xbf16, #tpu.memory_space<vmem>>, vector<1x1x8x128xbf16>
    %35 = vector.shape_cast %34 : vector<1x1x8x128xbf16> to vector<1x8x128xbf16>
    %36 = vector.shape_cast %35 : vector<1x8x128xbf16> to vector<8x128xbf16>
    %37 = arith.extf %36 : vector<8x128xbf16> to vector<8x128xf32>
    %cst_23 = arith.constant 1.000000e+00 : f32
    %38 = arith.subf %cst_23, %24 : f32
    %39 = vector.broadcast %38 : f32 to vector<8x128xf32>
    %40 = arith.mulf %39, %32 : vector<8x128xf32>
    %41 = vector.broadcast %24 : f32 to vector<8x128xf32>
    %42 = arith.mulf %41, %37 : vector<8x128xf32>
    %43 = arith.addf %40, %42 : vector<8x128xf32>
    %cst_24 = arith.constant dense<0.000000e+00> : vector<16x128xf32>
    %44 = tpu.matmul %14, %43, %cst_24 {dimension_numbers = #tpu.dot_dimension_numbers<[1], [0], [0], [1], [0, 0, 1, 1], [], []>} : vector<16x8xf32>, vector<8x128xf32>, vector<16x128xf32> -> vector<16x128xf32>
    %45 = arith.truncf %44 : vector<16x128xf32> to vector<16x128xbf16>
    %c0_25 = arith.constant 0 : index
    %c0_26 = arith.constant 0 : index
    %c0_27 = arith.constant 0 : index
    %c0_28 = arith.constant 0 : index
    %46 = vector.load %arg6[%c0_25, %c0_26, %c0_27, %c0_28] : memref<1x8x16x256xbf16, #tpu.memory_space<vmem>>, vector<1x1x16x128xbf16>
    %47 = vector.shape_cast %46 : vector<1x1x16x128xbf16> to vector<16x128xbf16>
    %48 = vector.shape_cast %45 : vector<16x128xbf16> to vector<1x1x16x128xbf16>
    tpu.vector_store %arg6[%c0_25, %c0_26, %c0_27, %c0_28], %48 {strides = array<i32>} : memref<1x8x16x256xbf16, #tpu.memory_space<vmem>>, vector<1x1x16x128xbf16>,
    %c8_i32_29 = arith.constant 8 : i32
    %49 = arith.muli %arg1, %c8_i32_29 : i32
    %c1_i32_30 = arith.constant 1 : i32
    %50 = arith.addi %49, %c1_i32_30 : i32
    %51 = arith.sitofp %50 : i32 to f32
    %cst_31 = arith.constant 5.000000e-01 : f32
    %52 = arith.addf %51, %cst_31 : f32
    %cst_32 = arith.constant 5.000000e-01 : f32
    %53 = arith.mulf %52, %cst_32 : f32
    %cst_33 = arith.constant 5.000000e-01 : f32
    %54 = arith.subf %53, %cst_33 : f32
    %cst_34 = arith.constant 0.000000e+00 : f32
    %55 = arith.maximumf %54, %cst_34 : f32
    %56 = math.floor %55 : f32
    %cst_35 = arith.constant 7.000000e+00 : f32
    %57 = arith.minimumf %56, %cst_35 : f32
    %58 = arith.subf %55, %57 : f32
    %59 = arith.fptosi %57 : f32 to i32
    %c1_i32_36 = arith.constant 1 : i32
    %60 = arith.addi %59, %c1_i32_36 : i32
    %c7_i32_37 = arith.constant 7 : i32
    %61 = arith.minsi %60, %c7_i32_37 : i32
    %c0_38 = arith.constant 0 : index
    %62 = arith.index_cast %59 : i32 to index
    %c0_39 = arith.constant 0 : index
    %c0_40 = arith.constant 0 : index
    %63 = vector.load %arg3[%c0_38, %62, %c0_39, %c0_40] : memref<1x8x8x128xbf16, #tpu.memory_space<vmem>>, vector<1x1x8x128xbf16>
    %64 = vector.shape_cast %63 : vector<1x1x8x128xbf16> to vector<1x8x128xbf16>
    %65 = vector.shape_cast %64 : vector<1x8x128xbf16> to vector<8x128xbf16>
    %66 = arith.extf %65 : vector<8x128xbf16> to vector<8x128xf32>
    %c0_41 = arith.constant 0 : index
    %67 = arith.index_cast %61 : i32 to index
    %c0_42 = arith.constant 0 : index
    %c0_43 = arith.constant 0 : index
    %68 = vector.load %arg3[%c0_41, %67, %c0_42, %c0_43] : memref<1x8x8x128xbf16, #tpu.memory_space<vmem>>, vector<1x1x8x128xbf16>
    %69 = vector.shape_cast %68 : vector<1x1x8x128xbf16> to vector<1x8x128xbf16>
    %70 = vector.shape_cast %69 : vector<1x8x128xbf16> to vector<8x128xbf16>
    %71 = arith.extf %70 : vector<8x128xbf16> to vector<8x128xf32>
    %cst_44 = arith.constant 1.000000e+00 : f32
    %72 = arith.subf %cst_44, %58 : f32
    %73 = vector.broadcast %72 : f32 to vector<8x128xf32>
    %74 = arith.mulf %73, %66 : vector<8x128xf32>
    %75 = vector.broadcast %58 : f32 to vector<8x128xf32>
    %76 = arith.mulf %75, %71 : vector<8x128xf32>
    %77 = arith.addf %74, %76 : vector<8x128xf32>
    %cst_45 = arith.constant dense<0.000000e+00> : vector<16x128xf32>
    %78 = tpu.matmul %14, %77, %cst_45 {dimension_numbers = #tpu.dot_dimension_numbers<[1], [0], [0], [1], [0, 0, 1, 1], [], []>} : vector<16x8xf32>, vector<8x128xf32>, vector<16x128xf32> -> vector<16x128xf32>
    %79 = arith.truncf %78 : vector<16x128xf32> to vector<16x128xbf16>
    %c0_46 = arith.constant 0 : index
    %c1 = arith.constant 1 : index
    %c0_47 = arith.constant 0 : index
    %c0_48 = arith.constant 0 : index
    %80 = vector.load %arg6[%c0_46, %c1, %c0_47, %c0_48] : memref<1x8x16x256xbf16, #tpu.memory_space<vmem>>, vector<1x1x16x128xbf16>
    %81 = vector.shape_cast %80 : vector<1x1x16x128xbf16> to vector<16x128xbf16>
    %82 = vector.shape_cast %79 : vector<16x128xbf16> to vector<1x1x16x128xbf16>
    tpu.vector_store %arg6[%c0_46, %c1, %c0_47, %c0_48], %82 {strides = array<i32>} : memref<1x8x16x256xbf16, #tpu.memory_space<vmem>>, vector<1x1x16x128xbf16>,
    %c8_i32_49 = arith.constant 8 : i32
    %83 = arith.muli %arg1, %c8_i32_49 : i32
    %c2_i32 = arith.constant 2 : i32
    %84 = arith.addi %83, %c2_i32 : i32
    %85 = arith.sitofp %84 : i32 to f32
    %cst_50 = arith.constant 5.000000e-01 : f32
    %86 = arith.addf %85, %cst_50 : f32
    %cst_51 = arith.constant 5.000000e-01 : f32
    %87 = arith.mulf %86, %cst_51 : f32
    %cst_52 = arith.constant 5.000000e-01 : f32
    %88 = arith.subf %87, %cst_52 : f32
    %cst_53 = arith.constant 0.000000e+00 : f32
    %89 = arith.maximumf %88, %cst_53 : f32
    %90 = math.floor %89 : f32
    %cst_54 = arith.constant 7.000000e+00 : f32
    %91 = arith.minimumf %90, %cst_54 : f32
    %92 = arith.subf %89, %91 : f32
    %93 = arith.fptosi %91 : f32 to i32
    %c1_i32_55 = arith.constant 1 : i32
    %94 = arith.addi %93, %c1_i32_55 : i32
    %c7_i32_56 = arith.constant 7 : i32
    %95 = arith.minsi %94, %c7_i32_56 : i32
    %c0_57 = arith.constant 0 : index
    %96 = arith.index_cast %93 : i32 to index
    %c0_58 = arith.constant 0 : index
    %c0_59 = arith.constant 0 : index
    %97 = vector.load %arg3[%c0_57, %96, %c0_58, %c0_59] : memref<1x8x8x128xbf16, #tpu.memory_space<vmem>>, vector<1x1x8x128xbf16>
    %98 = vector.shape_cast %97 : vector<1x1x8x128xbf16> to vector<1x8x128xbf16>
    %99 = vector.shape_cast %98 : vector<1x8x128xbf16> to vector<8x128xbf16>
    %100 = arith.extf %99 : vector<8x128xbf16> to vector<8x128xf32>
    %c0_60 = arith.constant 0 : index
    %101 = arith.index_cast %95 : i32 to index
    %c0_61 = arith.constant 0 : index
    %c0_62 = arith.constant 0 : index
    %102 = vector.load %arg3[%c0_60, %101, %c0_61, %c0_62] : memref<1x8x8x128xbf16, #tpu.memory_space<vmem>>, vector<1x1x8x128xbf16>
    %103 = vector.shape_cast %102 : vector<1x1x8x128xbf16> to vector<1x8x128xbf16>
    %104 = vector.shape_cast %103 : vector<1x8x128xbf16> to vector<8x128xbf16>
    %105 = arith.extf %104 : vector<8x128xbf16> to vector<8x128xf32>
    %cst_63 = arith.constant 1.000000e+00 : f32
    %106 = arith.subf %cst_63, %92 : f32
    %107 = vector.broadcast %106 : f32 to vector<8x128xf32>
    %108 = arith.mulf %107, %100 : vector<8x128xf32>
    %109 = vector.broadcast %92 : f32 to vector<8x128xf32>
    %110 = arith.mulf %109, %105 : vector<8x128xf32>
    %111 = arith.addf %108, %110 : vector<8x128xf32>
    %cst_64 = arith.constant dense<0.000000e+00> : vector<16x128xf32>
    %112 = tpu.matmul %14, %111, %cst_64 {dimension_numbers = #tpu.dot_dimension_numbers<[1], [0], [0], [1], [0, 0, 1, 1], [], []>} : vector<16x8xf32>, vector<8x128xf32>, vector<16x128xf32> -> vector<16x128xf32>
    %113 = arith.truncf %112 : vector<16x128xf32> to vector<16x128xbf16>
    %c0_65 = arith.constant 0 : index
    %c2 = arith.constant 2 : index
    %c0_66 = arith.constant 0 : index
    %c0_67 = arith.constant 0 : index
    %114 = vector.load %arg6[%c0_65, %c2, %c0_66, %c0_67] : memref<1x8x16x256xbf16, #tpu.memory_space<vmem>>, vector<1x1x16x128xbf16>
    %115 = vector.shape_cast %114 : vector<1x1x16x128xbf16> to vector<16x128xbf16>
    %116 = vector.shape_cast %113 : vector<16x128xbf16> to vector<1x1x16x128xbf16>
    tpu.vector_store %arg6[%c0_65, %c2, %c0_66, %c0_67], %116 {strides = array<i32>} : memref<1x8x16x256xbf16, #tpu.memory_space<vmem>>, vector<1x1x16x128xbf16>,
    %c8_i32_68 = arith.constant 8 : i32
    %117 = arith.muli %arg1, %c8_i32_68 : i32
    %c3_i32 = arith.constant 3 : i32
    %118 = arith.addi %117, %c3_i32 : i32
    %119 = arith.sitofp %118 : i32 to f32
    %cst_69 = arith.constant 5.000000e-01 : f32
    %120 = arith.addf %119, %cst_69 : f32
    %cst_70 = arith.constant 5.000000e-01 : f32
    %121 = arith.mulf %120, %cst_70 : f32
    %cst_71 = arith.constant 5.000000e-01 : f32
    %122 = arith.subf %121, %cst_71 : f32
    %cst_72 = arith.constant 0.000000e+00 : f32
    %123 = arith.maximumf %122, %cst_72 : f32
    %124 = math.floor %123 : f32
    %cst_73 = arith.constant 7.000000e+00 : f32
    %125 = arith.minimumf %124, %cst_73 : f32
    %126 = arith.subf %123, %125 : f32
    %127 = arith.fptosi %125 : f32 to i32
    %c1_i32_74 = arith.constant 1 : i32
    %128 = arith.addi %127, %c1_i32_74 : i32
    %c7_i32_75 = arith.constant 7 : i32
    %129 = arith.minsi %128, %c7_i32_75 : i32
    %c0_76 = arith.constant 0 : index
    %130 = arith.index_cast %127 : i32 to index
    %c0_77 = arith.constant 0 : index
    %c0_78 = arith.constant 0 : index
    %131 = vector.load %arg3[%c0_76, %130, %c0_77, %c0_78] : memref<1x8x8x128xbf16, #tpu.memory_space<vmem>>, vector<1x1x8x128xbf16>
    %132 = vector.shape_cast %131 : vector<1x1x8x128xbf16> to vector<1x8x128xbf16>
    %133 = vector.shape_cast %132 : vector<1x8x128xbf16> to vector<8x128xbf16>
    %134 = arith.extf %133 : vector<8x128xbf16> to vector<8x128xf32>
    %c0_79 = arith.constant 0 : index
    %135 = arith.index_cast %129 : i32 to index
    %c0_80 = arith.constant 0 : index
    %c0_81 = arith.constant 0 : index
    %136 = vector.load %arg3[%c0_79, %135, %c0_80, %c0_81] : memref<1x8x8x128xbf16, #tpu.memory_space<vmem>>, vector<1x1x8x128xbf16>
    %137 = vector.shape_cast %136 : vector<1x1x8x128xbf16> to vector<1x8x128xbf16>
    %138 = vector.shape_cast %137 : vector<1x8x128xbf16> to vector<8x128xbf16>
    %139 = arith.extf %138 : vector<8x128xbf16> to vector<8x128xf32>
    %cst_82 = arith.constant 1.000000e+00 : f32
    %140 = arith.subf %cst_82, %126 : f32
    %141 = vector.broadcast %140 : f32 to vector<8x128xf32>
    %142 = arith.mulf %141, %134 : vector<8x128xf32>
    %143 = vector.broadcast %126 : f32 to vector<8x128xf32>
    %144 = arith.mulf %143, %139 : vector<8x128xf32>
    %145 = arith.addf %142, %144 : vector<8x128xf32>
    %cst_83 = arith.constant dense<0.000000e+00> : vector<16x128xf32>
    %146 = tpu.matmul %14, %145, %cst_83 {dimension_numbers = #tpu.dot_dimension_numbers<[1], [0], [0], [1], [0, 0, 1, 1], [], []>} : vector<16x8xf32>, vector<8x128xf32>, vector<16x128xf32> -> vector<16x128xf32>
    %147 = arith.truncf %146 : vector<16x128xf32> to vector<16x128xbf16>
    %c0_84 = arith.constant 0 : index
    %c3 = arith.constant 3 : index
    %c0_85 = arith.constant 0 : index
    %c0_86 = arith.constant 0 : index
    %148 = vector.load %arg6[%c0_84, %c3, %c0_85, %c0_86] : memref<1x8x16x256xbf16, #tpu.memory_space<vmem>>, vector<1x1x16x128xbf16>
    %149 = vector.shape_cast %148 : vector<1x1x16x128xbf16> to vector<16x128xbf16>
    %150 = vector.shape_cast %147 : vector<16x128xbf16> to vector<1x1x16x128xbf16>
    tpu.vector_store %arg6[%c0_84, %c3, %c0_85, %c0_86], %150 {strides = array<i32>} : memref<1x8x16x256xbf16, #tpu.memory_space<vmem>>, vector<1x1x16x128xbf16>,
    %c8_i32_87 = arith.constant 8 : i32
    %151 = arith.muli %arg1, %c8_i32_87 : i32
    %c4_i32 = arith.constant 4 : i32
    %152 = arith.addi %151, %c4_i32 : i32
    %153 = arith.sitofp %152 : i32 to f32
    %cst_88 = arith.constant 5.000000e-01 : f32
    %154 = arith.addf %153, %cst_88 : f32
    %cst_89 = arith.constant 5.000000e-01 : f32
    %155 = arith.mulf %154, %cst_89 : f32
    %cst_90 = arith.constant 5.000000e-01 : f32
    %156 = arith.subf %155, %cst_90 : f32
    %cst_91 = arith.constant 0.000000e+00 : f32
    %157 = arith.maximumf %156, %cst_91 : f32
    %158 = math.floor %157 : f32
    %cst_92 = arith.constant 7.000000e+00 : f32
    %159 = arith.minimumf %158, %cst_92 : f32
    %160 = arith.subf %157, %159 : f32
    %161 = arith.fptosi %159 : f32 to i32
    %c1_i32_93 = arith.constant 1 : i32
    %162 = arith.addi %161, %c1_i32_93 : i32
    %c7_i32_94 = arith.constant 7 : i32
    %163 = arith.minsi %162, %c7_i32_94 : i32
    %c0_95 = arith.constant 0 : index
    %164 = arith.index_cast %161 : i32 to index
    %c0_96 = arith.constant 0 : index
    %c0_97 = arith.constant 0 : index
    %165 = vector.load %arg3[%c0_95, %164, %c0_96, %c0_97] : memref<1x8x8x128xbf16, #tpu.memory_space<vmem>>, vector<1x1x8x128xbf16>
    %166 = vector.shape_cast %165 : vector<1x1x8x128xbf16> to vector<1x8x128xbf16>
    %167 = vector.shape_cast %166 : vector<1x8x128xbf16> to vector<8x128xbf16>
    %168 = arith.extf %167 : vector<8x128xbf16> to vector<8x128xf32>
    %c0_98 = arith.constant 0 : index
    %169 = arith.index_cast %163 : i32 to index
    %c0_99 = arith.constant 0 : index
    %c0_100 = arith.constant 0 : index
    %170 = vector.load %arg3[%c0_98, %169, %c0_99, %c0_100] : memref<1x8x8x128xbf16, #tpu.memory_space<vmem>>, vector<1x1x8x128xbf16>
    %171 = vector.shape_cast %170 : vector<1x1x8x128xbf16> to vector<1x8x128xbf16>
    %172 = vector.shape_cast %171 : vector<1x8x128xbf16> to vector<8x128xbf16>
    %173 = arith.extf %172 : vector<8x128xbf16> to vector<8x128xf32>
    %cst_101 = arith.constant 1.000000e+00 : f32
    %174 = arith.subf %cst_101, %160 : f32
    %175 = vector.broadcast %174 : f32 to vector<8x128xf32>
    %176 = arith.mulf %175, %168 : vector<8x128xf32>
    %177 = vector.broadcast %160 : f32 to vector<8x128xf32>
    %178 = arith.mulf %177, %173 : vector<8x128xf32>
    %179 = arith.addf %176, %178 : vector<8x128xf32>
    %cst_102 = arith.constant dense<0.000000e+00> : vector<16x128xf32>
    %180 = tpu.matmul %14, %179, %cst_102 {dimension_numbers = #tpu.dot_dimension_numbers<[1], [0], [0], [1], [0, 0, 1, 1], [], []>} : vector<16x8xf32>, vector<8x128xf32>, vector<16x128xf32> -> vector<16x128xf32>
    %181 = arith.truncf %180 : vector<16x128xf32> to vector<16x128xbf16>
    %c0_103 = arith.constant 0 : index
    %c4 = arith.constant 4 : index
    %c0_104 = arith.constant 0 : index
    %c0_105 = arith.constant 0 : index
    %182 = vector.load %arg6[%c0_103, %c4, %c0_104, %c0_105] : memref<1x8x16x256xbf16, #tpu.memory_space<vmem>>, vector<1x1x16x128xbf16>
    %183 = vector.shape_cast %182 : vector<1x1x16x128xbf16> to vector<16x128xbf16>
    %184 = vector.shape_cast %181 : vector<16x128xbf16> to vector<1x1x16x128xbf16>
    tpu.vector_store %arg6[%c0_103, %c4, %c0_104, %c0_105], %184 {strides = array<i32>} : memref<1x8x16x256xbf16, #tpu.memory_space<vmem>>, vector<1x1x16x128xbf16>,
    %c8_i32_106 = arith.constant 8 : i32
    %185 = arith.muli %arg1, %c8_i32_106 : i32
    %c5_i32 = arith.constant 5 : i32
    %186 = arith.addi %185, %c5_i32 : i32
    %187 = arith.sitofp %186 : i32 to f32
    %cst_107 = arith.constant 5.000000e-01 : f32
    %188 = arith.addf %187, %cst_107 : f32
    %cst_108 = arith.constant 5.000000e-01 : f32
    %189 = arith.mulf %188, %cst_108 : f32
    %cst_109 = arith.constant 5.000000e-01 : f32
    %190 = arith.subf %189, %cst_109 : f32
    %cst_110 = arith.constant 0.000000e+00 : f32
    %191 = arith.maximumf %190, %cst_110 : f32
    %192 = math.floor %191 : f32
    %cst_111 = arith.constant 7.000000e+00 : f32
    %193 = arith.minimumf %192, %cst_111 : f32
    %194 = arith.subf %191, %193 : f32
    %195 = arith.fptosi %193 : f32 to i32
    %c1_i32_112 = arith.constant 1 : i32
    %196 = arith.addi %195, %c1_i32_112 : i32
    %c7_i32_113 = arith.constant 7 : i32
    %197 = arith.minsi %196, %c7_i32_113 : i32
    %c0_114 = arith.constant 0 : index
    %198 = arith.index_cast %195 : i32 to index
    %c0_115 = arith.constant 0 : index
    %c0_116 = arith.constant 0 : index
    %199 = vector.load %arg3[%c0_114, %198, %c0_115, %c0_116] : memref<1x8x8x128xbf16, #tpu.memory_space<vmem>>, vector<1x1x8x128xbf16>
    %200 = vector.shape_cast %199 : vector<1x1x8x128xbf16> to vector<1x8x128xbf16>
    %201 = vector.shape_cast %200 : vector<1x8x128xbf16> to vector<8x128xbf16>
    %202 = arith.extf %201 : vector<8x128xbf16> to vector<8x128xf32>
    %c0_117 = arith.constant 0 : index
    %203 = arith.index_cast %197 : i32 to index
    %c0_118 = arith.constant 0 : index
    %c0_119 = arith.constant 0 : index
    %204 = vector.load %arg3[%c0_117, %203, %c0_118, %c0_119] : memref<1x8x8x128xbf16, #tpu.memory_space<vmem>>, vector<1x1x8x128xbf16>
    %205 = vector.shape_cast %204 : vector<1x1x8x128xbf16> to vector<1x8x128xbf16>
    %206 = vector.shape_cast %205 : vector<1x8x128xbf16> to vector<8x128xbf16>
    %207 = arith.extf %206 : vector<8x128xbf16> to vector<8x128xf32>
    %cst_120 = arith.constant 1.000000e+00 : f32
    %208 = arith.subf %cst_120, %194 : f32
    %209 = vector.broadcast %208 : f32 to vector<8x128xf32>
    %210 = arith.mulf %209, %202 : vector<8x128xf32>
    %211 = vector.broadcast %194 : f32 to vector<8x128xf32>
    %212 = arith.mulf %211, %207 : vector<8x128xf32>
    %213 = arith.addf %210, %212 : vector<8x128xf32>
    %cst_121 = arith.constant dense<0.000000e+00> : vector<16x128xf32>
    %214 = tpu.matmul %14, %213, %cst_121 {dimension_numbers = #tpu.dot_dimension_numbers<[1], [0], [0], [1], [0, 0, 1, 1], [], []>} : vector<16x8xf32>, vector<8x128xf32>, vector<16x128xf32> -> vector<16x128xf32>
    %215 = arith.truncf %214 : vector<16x128xf32> to vector<16x128xbf16>
    %c0_122 = arith.constant 0 : index
    %c5 = arith.constant 5 : index
    %c0_123 = arith.constant 0 : index
    %c0_124 = arith.constant 0 : index
    %216 = vector.load %arg6[%c0_122, %c5, %c0_123, %c0_124] : memref<1x8x16x256xbf16, #tpu.memory_space<vmem>>, vector<1x1x16x128xbf16>
    %217 = vector.shape_cast %216 : vector<1x1x16x128xbf16> to vector<16x128xbf16>
    %218 = vector.shape_cast %215 : vector<16x128xbf16> to vector<1x1x16x128xbf16>
    tpu.vector_store %arg6[%c0_122, %c5, %c0_123, %c0_124], %218 {strides = array<i32>} : memref<1x8x16x256xbf16, #tpu.memory_space<vmem>>, vector<1x1x16x128xbf16>,
    %c8_i32_125 = arith.constant 8 : i32
    %219 = arith.muli %arg1, %c8_i32_125 : i32
    %c6_i32 = arith.constant 6 : i32
    %220 = arith.addi %219, %c6_i32 : i32
    %221 = arith.sitofp %220 : i32 to f32
    %cst_126 = arith.constant 5.000000e-01 : f32
    %222 = arith.addf %221, %cst_126 : f32
    %cst_127 = arith.constant 5.000000e-01 : f32
    %223 = arith.mulf %222, %cst_127 : f32
    %cst_128 = arith.constant 5.000000e-01 : f32
    %224 = arith.subf %223, %cst_128 : f32
    %cst_129 = arith.constant 0.000000e+00 : f32
    %225 = arith.maximumf %224, %cst_129 : f32
    %226 = math.floor %225 : f32
    %cst_130 = arith.constant 7.000000e+00 : f32
    %227 = arith.minimumf %226, %cst_130 : f32
    %228 = arith.subf %225, %227 : f32
    %229 = arith.fptosi %227 : f32 to i32
    %c1_i32_131 = arith.constant 1 : i32
    %230 = arith.addi %229, %c1_i32_131 : i32
    %c7_i32_132 = arith.constant 7 : i32
    %231 = arith.minsi %230, %c7_i32_132 : i32
    %c0_133 = arith.constant 0 : index
    %232 = arith.index_cast %229 : i32 to index
    %c0_134 = arith.constant 0 : index
    %c0_135 = arith.constant 0 : index
    %233 = vector.load %arg3[%c0_133, %232, %c0_134, %c0_135] : memref<1x8x8x128xbf16, #tpu.memory_space<vmem>>, vector<1x1x8x128xbf16>
    %234 = vector.shape_cast %233 : vector<1x1x8x128xbf16> to vector<1x8x128xbf16>
    %235 = vector.shape_cast %234 : vector<1x8x128xbf16> to vector<8x128xbf16>
    %236 = arith.extf %235 : vector<8x128xbf16> to vector<8x128xf32>
    %c0_136 = arith.constant 0 : index
    %237 = arith.index_cast %231 : i32 to index
    %c0_137 = arith.constant 0 : index
    %c0_138 = arith.constant 0 : index
    %238 = vector.load %arg3[%c0_136, %237, %c0_137, %c0_138] : memref<1x8x8x128xbf16, #tpu.memory_space<vmem>>, vector<1x1x8x128xbf16>
    %239 = vector.shape_cast %238 : vector<1x1x8x128xbf16> to vector<1x8x128xbf16>
    %240 = vector.shape_cast %239 : vector<1x8x128xbf16> to vector<8x128xbf16>
    %241 = arith.extf %240 : vector<8x128xbf16> to vector<8x128xf32>
    %cst_139 = arith.constant 1.000000e+00 : f32
    %242 = arith.subf %cst_139, %228 : f32
    %243 = vector.broadcast %242 : f32 to vector<8x128xf32>
    %244 = arith.mulf %243, %236 : vector<8x128xf32>
    %245 = vector.broadcast %228 : f32 to vector<8x128xf32>
    %246 = arith.mulf %245, %241 : vector<8x128xf32>
    %247 = arith.addf %244, %246 : vector<8x128xf32>
    %cst_140 = arith.constant dense<0.000000e+00> : vector<16x128xf32>
    %248 = tpu.matmul %14, %247, %cst_140 {dimension_numbers = #tpu.dot_dimension_numbers<[1], [0], [0], [1], [0, 0, 1, 1], [], []>} : vector<16x8xf32>, vector<8x128xf32>, vector<16x128xf32> -> vector<16x128xf32>
    %249 = arith.truncf %248 : vector<16x128xf32> to vector<16x128xbf16>
    %c0_141 = arith.constant 0 : index
    %c6 = arith.constant 6 : index
    %c0_142 = arith.constant 0 : index
    %c0_143 = arith.constant 0 : index
    %250 = vector.load %arg6[%c0_141, %c6, %c0_142, %c0_143] : memref<1x8x16x256xbf16, #tpu.memory_space<vmem>>, vector<1x1x16x128xbf16>
    %251 = vector.shape_cast %250 : vector<1x1x16x128xbf16> to vector<16x128xbf16>
    %252 = vector.shape_cast %249 : vector<16x128xbf16> to vector<1x1x16x128xbf16>
    tpu.vector_store %arg6[%c0_141, %c6, %c0_142, %c0_143], %252 {strides = array<i32>} : memref<1x8x16x256xbf16, #tpu.memory_space<vmem>>, vector<1x1x16x128xbf16>,
    %c8_i32_144 = arith.constant 8 : i32
    %253 = arith.muli %arg1, %c8_i32_144 : i32
    %c7_i32_145 = arith.constant 7 : i32
    %254 = arith.addi %253, %c7_i32_145 : i32
    %255 = arith.sitofp %254 : i32 to f32
    %cst_146 = arith.constant 5.000000e-01 : f32
    %256 = arith.addf %255, %cst_146 : f32
    %cst_147 = arith.constant 5.000000e-01 : f32
    %257 = arith.mulf %256, %cst_147 : f32
    %cst_148 = arith.constant 5.000000e-01 : f32
    %258 = arith.subf %257, %cst_148 : f32
    %cst_149 = arith.constant 0.000000e+00 : f32
    %259 = arith.maximumf %258, %cst_149 : f32
    %260 = math.floor %259 : f32
    %cst_150 = arith.constant 7.000000e+00 : f32
    %261 = arith.minimumf %260, %cst_150 : f32
    %262 = arith.subf %259, %261 : f32
    %263 = arith.fptosi %261 : f32 to i32
    %c1_i32_151 = arith.constant 1 : i32
    %264 = arith.addi %263, %c1_i32_151 : i32
    %c7_i32_152 = arith.constant 7 : i32
    %265 = arith.minsi %264, %c7_i32_152 : i32
    %c0_153 = arith.constant 0 : index
    %266 = arith.index_cast %263 : i32 to index
    %c0_154 = arith.constant 0 : index
    %c0_155 = arith.constant 0 : index
    %267 = vector.load %arg3[%c0_153, %266, %c0_154, %c0_155] : memref<1x8x8x128xbf16, #tpu.memory_space<vmem>>, vector<1x1x8x128xbf16>
    %268 = vector.shape_cast %267 : vector<1x1x8x128xbf16> to vector<1x8x128xbf16>
    %269 = vector.shape_cast %268 : vector<1x8x128xbf16> to vector<8x128xbf16>
    %270 = arith.extf %269 : vector<8x128xbf16> to vector<8x128xf32>
    %c0_156 = arith.constant 0 : index
    %271 = arith.index_cast %265 : i32 to index
    %c0_157 = arith.constant 0 : index
    %c0_158 = arith.constant 0 : index
    %272 = vector.load %arg3[%c0_156, %271, %c0_157, %c0_158] : memref<1x8x8x128xbf16, #tpu.memory_space<vmem>>, vector<1x1x8x128xbf16>
    %273 = vector.shape_cast %272 : vector<1x1x8x128xbf16> to vector<1x8x128xbf16>
    %274 = vector.shape_cast %273 : vector<1x8x128xbf16> to vector<8x128xbf16>
    %275 = arith.extf %274 : vector<8x128xbf16> to vector<8x128xf32>
    %cst_159 = arith.constant 1.000000e+00 : f32
    %276 = arith.subf %cst_159, %262 : f32
    %277 = vector.broadcast %276 : f32 to vector<8x128xf32>
    %278 = arith.mulf %277, %270 : vector<8x128xf32>
    %279 = vector.broadcast %262 : f32 to vector<8x128xf32>
    %280 = arith.mulf %279, %275 : vector<8x128xf32>
    %281 = arith.addf %278, %280 : vector<8x128xf32>
    %cst_160 = arith.constant dense<0.000000e+00> : vector<16x128xf32>
    %282 = tpu.matmul %14, %281, %cst_160 {dimension_numbers = #tpu.dot_dimension_numbers<[1], [0], [0], [1], [0, 0, 1, 1], [], []>} : vector<16x8xf32>, vector<8x128xf32>, vector<16x128xf32> -> vector<16x128xf32>
    %283 = arith.truncf %282 : vector<16x128xf32> to vector<16x128xbf16>
    %c0_161 = arith.constant 0 : index
    %c7 = arith.constant 7 : index
    %c0_162 = arith.constant 0 : index
    %c0_163 = arith.constant 0 : index
    %284 = vector.load %arg6[%c0_161, %c7, %c0_162, %c0_163] : memref<1x8x16x256xbf16, #tpu.memory_space<vmem>>, vector<1x1x16x128xbf16>
    %285 = vector.shape_cast %284 : vector<1x1x16x128xbf16> to vector<16x128xbf16>
    %286 = vector.shape_cast %283 : vector<16x128xbf16> to vector<1x1x16x128xbf16>
    tpu.vector_store %arg6[%c0_161, %c7, %c0_162, %c0_163], %286 {strides = array<i32>} : memref<1x8x16x256xbf16, #tpu.memory_space<vmem>>, vector<1x1x16x128xbf16>,
    return
  }
  func.func @transform_0(%arg0: i32, %arg1: i32) -> (i32, i32) {
    %c0_i32 = arith.constant 0 : i32
    %c0_i32_0 = arith.constant 0 : i32
    %c0_i32_1 = arith.constant 0 : i32
    return %c0_i32, %c0_i32_0 : i32, i32
  }
  func.func @transform_1(%arg0: i32, %arg1: i32) -> (i32, i32, i32, i32) {
    %c0_i32 = arith.constant 0 : i32
    %c0_i32_0 = arith.constant 0 : i32
    %c0_i32_1 = arith.constant 0 : i32
    %c0_i32_2 = arith.constant 0 : i32
    return %arg0, %c0_i32, %c0_i32_0, %c0_i32_1 : i32, i32, i32, i32
  }
  func.func @transform_2(%arg0: i32, %arg1: i32) -> (i32, i32, i32, i32) {
    %c0_i32 = arith.constant 0 : i32
    %c0_i32_0 = arith.constant 0 : i32
    %c0_i32_1 = arith.constant 0 : i32
    return %arg0, %arg1, %c0_i32, %c0_i32_0 : i32, i32, i32, i32
  }
  func.func @transform_3(%arg0: i32, %arg1: i32) -> (i32, i32) {
    %c0_i32 = arith.constant 0 : i32
    %c0_i32_0 = arith.constant 0 : i32
    %c0_i32_1 = arith.constant 0 : i32
    return %c0_i32, %c0_i32_0 : i32, i32
  }
  func.func @transform_4(%arg0: i32, %arg1: i32) -> (i32, i32, i32, i32) {
    %c0_i32 = arith.constant 0 : i32
    %c0_i32_0 = arith.constant 0 : i32
    %c0_i32_1 = arith.constant 0 : i32
    return %arg0, %arg1, %c0_i32, %c0_i32_0 : i32, i32, i32, i32
  }
}

module attributes {stable_mosaic.version = 11 : i64} {
  func.func @_conv3x3_kernel(%arg0: i32, %arg1: i32, %arg2: memref<2x16x16x128xbf16, #tpu.memory_space<any>>, %arg3: memref<3x3x128x128xbf16, #tpu.memory_space<vmem>>, %arg4: memref<128x128xbf16, #tpu.memory_space<vmem>>, %arg5: memref<1x128xf32, #tpu.memory_space<vmem>>, %arg6: memref<1x8x16x128xf32, #tpu.memory_space<vmem>>, %arg7: memref<10x16x128xbf16, #tpu.memory_space<vmem>>, %arg8: memref<8x16x128xf32, #tpu.memory_space<vmem>>, %arg9: memref<!tpu.dma_semaphore, #tpu.memory_space<semaphore_mem>>) attributes {dimension_semantics = [#tpu.dimension_semantics<parallel>, #tpu.dimension_semantics<arbitrary>], iteration_bounds = array<i64: 2, 2>, scalar_prefetch = 0 : i64, scratch_operands = 3 : i64, tpu.core_type = #tpu.core_type<tc>, window_params = [{}, {pipeline_mode = #tpu.pipeline_mode<synchronous>, transform_indices = @transform_1, window_bounds = array<i64: 3, 3, 128, 128>}, {pipeline_mode = #tpu.pipeline_mode<synchronous>, transform_indices = @transform_2, window_bounds = array<i64: 128, 128>}, {pipeline_mode = #tpu.pipeline_mode<synchronous>, transform_indices = @transform_3, window_bounds = array<i64: 1, 128>}, {transform_indices = @transform_4, window_bounds = array<i64: 1, 8, 16, 128>}]} {
    %cst = arith.constant 0.000000e+00 : bf16
    %0 = vector.broadcast %cst : bf16 to vector<16x128xbf16>
    %c8_i32 = arith.constant 8 : i32
    %1 = arith.muli %arg1, %c8_i32 : i32
    %c0_i32 = arith.constant 0 : i32
    %2 = arith.cmpi eq, %arg1, %c0_i32 : i32
    %3 = arith.extui %2 : i1 to i32
    %c0_i32_0 = arith.constant 0 : i32
    %4 = arith.cmpi ne, %3, %c0_i32_0 : i32
    scf.if %4 {
      %c0_103 = arith.constant 0 : index
      %c0_104 = arith.constant 0 : index
      %c0_105 = arith.constant 0 : index
      %94 = vector.load %arg7[%c0_103, %c0_104, %c0_105] : memref<10x16x128xbf16, #tpu.memory_space<vmem>>, vector<1x16x128xbf16>
      %95 = vector.shape_cast %94 : vector<1x16x128xbf16> to vector<16x128xbf16>
      %96 = vector.shape_cast %0 : vector<16x128xbf16> to vector<1x16x128xbf16>
      tpu.vector_store %arg7[%c0_103, %c0_104, %c0_105], %96 {strides = array<i32>} : memref<10x16x128xbf16, #tpu.memory_space<vmem>>, vector<1x16x128xbf16>,
      %c0_i32_106 = arith.constant 0 : i32
      %c0_i32_107 = arith.constant 0 : i32
      %c0_i32_108 = arith.constant 0 : i32
      %97 = tpu.memref_slice %arg2[%arg0, %c0_i32_106, %c0_i32_107, %c0_i32_108] : memref<2x16x16x128xbf16, #tpu.memory_space<any>> -> memref<1x9x16x128xbf16, #tpu.memory_space<any>>
      %98 = tpu.memref_squeeze %97 : memref<1x9x16x128xbf16, #tpu.memory_space<any>> -> memref<9x16x128xbf16, #tpu.memory_space<any>>
      %c1_i32_109 = arith.constant 1 : i32
      %c0_i32_110 = arith.constant 0 : i32
      %c0_i32_111 = arith.constant 0 : i32
      %99 = tpu.memref_slice %arg7[%c1_i32_109, %c0_i32_110, %c0_i32_111] : memref<10x16x128xbf16, #tpu.memory_space<vmem>> -> memref<9x16x128xbf16, #tpu.memory_space<vmem>>
      tpu.enqueue_dma source(%98 : memref<9x16x128xbf16, #tpu.memory_space<any>>) target(%99 : memref<9x16x128xbf16, #tpu.memory_space<vmem>>) target_semaphore(%arg9 : memref<!tpu.dma_semaphore, #tpu.memory_space<semaphore_mem>>)
      %c0_i32_112 = arith.constant 0 : i32
      %c0_i32_113 = arith.constant 0 : i32
      %c0_i32_114 = arith.constant 0 : i32
      %100 = tpu.memref_slice %arg2[%arg0, %c0_i32_112, %c0_i32_113, %c0_i32_114] : memref<2x16x16x128xbf16, #tpu.memory_space<any>> -> memref<1x9x16x128xbf16, #tpu.memory_space<any>>
      %101 = tpu.memref_squeeze %100 : memref<1x9x16x128xbf16, #tpu.memory_space<any>> -> memref<9x16x128xbf16, #tpu.memory_space<any>>
      %c1_i32_115 = arith.constant 1 : i32
      %c0_i32_116 = arith.constant 0 : i32
      %c0_i32_117 = arith.constant 0 : i32
      %102 = tpu.memref_slice %arg7[%c1_i32_115, %c0_i32_116, %c0_i32_117] : memref<10x16x128xbf16, #tpu.memory_space<vmem>> -> memref<9x16x128xbf16, #tpu.memory_space<vmem>>
      tpu.wait_dma2 semaphore(%arg9 : memref<!tpu.dma_semaphore, #tpu.memory_space<semaphore_mem>>) src(%101 : memref<9x16x128xbf16, #tpu.memory_space<any>>) dst(%102 : memref<9x16x128xbf16, #tpu.memory_space<vmem>>)
    } else {
    }
    %c1_i32 = arith.constant 1 : i32
    %5 = arith.cmpi eq, %arg1, %c1_i32 : i32
    %6 = arith.extui %5 : i1 to i32
    %c0_i32_1 = arith.constant 0 : i32
    %7 = arith.cmpi ne, %6, %c0_i32_1 : i32
    scf.if %7 {
      %c9 = arith.constant 9 : index
      %c0_103 = arith.constant 0 : index
      %c0_104 = arith.constant 0 : index
      %94 = vector.load %arg7[%c9, %c0_103, %c0_104] : memref<10x16x128xbf16, #tpu.memory_space<vmem>>, vector<1x16x128xbf16>
      %95 = vector.shape_cast %94 : vector<1x16x128xbf16> to vector<16x128xbf16>
      %96 = vector.shape_cast %0 : vector<16x128xbf16> to vector<1x16x128xbf16>
      tpu.vector_store %arg7[%c9, %c0_103, %c0_104], %96 {strides = array<i32>} : memref<10x16x128xbf16, #tpu.memory_space<vmem>>, vector<1x16x128xbf16>,
      %c1_i32_105 = arith.constant 1 : i32
      %97 = arith.subi %1, %c1_i32_105 : i32
      %c0_i32_106 = arith.constant 0 : i32
      %c0_i32_107 = arith.constant 0 : i32
      %98 = tpu.memref_slice %arg2[%arg0, %97, %c0_i32_106, %c0_i32_107] : memref<2x16x16x128xbf16, #tpu.memory_space<any>> -> memref<1x9x16x128xbf16, #tpu.memory_space<any>>
      %99 = tpu.memref_squeeze %98 : memref<1x9x16x128xbf16, #tpu.memory_space<any>> -> memref<9x16x128xbf16, #tpu.memory_space<any>>
      %c0_i32_108 = arith.constant 0 : i32
      %c0_i32_109 = arith.constant 0 : i32
      %c0_i32_110 = arith.constant 0 : i32
      %100 = tpu.memref_slice %arg7[%c0_i32_108, %c0_i32_109, %c0_i32_110] : memref<10x16x128xbf16, #tpu.memory_space<vmem>> -> memref<9x16x128xbf16, #tpu.memory_space<vmem>>
      tpu.enqueue_dma source(%99 : memref<9x16x128xbf16, #tpu.memory_space<any>>) target(%100 : memref<9x16x128xbf16, #tpu.memory_space<vmem>>) target_semaphore(%arg9 : memref<!tpu.dma_semaphore, #tpu.memory_space<semaphore_mem>>)
      %c0_i32_111 = arith.constant 0 : i32
      %c0_i32_112 = arith.constant 0 : i32
      %101 = tpu.memref_slice %arg2[%arg0, %97, %c0_i32_111, %c0_i32_112] : memref<2x16x16x128xbf16, #tpu.memory_space<any>> -> memref<1x9x16x128xbf16, #tpu.memory_space<any>>
      %102 = tpu.memref_squeeze %101 : memref<1x9x16x128xbf16, #tpu.memory_space<any>> -> memref<9x16x128xbf16, #tpu.memory_space<any>>
      %c0_i32_113 = arith.constant 0 : i32
      %c0_i32_114 = arith.constant 0 : i32
      %c0_i32_115 = arith.constant 0 : i32
      %103 = tpu.memref_slice %arg7[%c0_i32_113, %c0_i32_114, %c0_i32_115] : memref<10x16x128xbf16, #tpu.memory_space<vmem>> -> memref<9x16x128xbf16, #tpu.memory_space<vmem>>
      tpu.wait_dma2 semaphore(%arg9 : memref<!tpu.dma_semaphore, #tpu.memory_space<semaphore_mem>>) src(%102 : memref<9x16x128xbf16, #tpu.memory_space<any>>) dst(%103 : memref<9x16x128xbf16, #tpu.memory_space<vmem>>)
    } else {
    }
    %c0_i32_2 = arith.constant 0 : i32
    %8 = arith.cmpi sgt, %arg1, %c0_i32_2 : i32
    %c1_i32_3 = arith.constant 1 : i32
    %9 = arith.cmpi slt, %arg1, %c1_i32_3 : i32
    %10 = arith.andi %8, %9 : i1
    %11 = arith.extui %10 : i1 to i32
    %c0_i32_4 = arith.constant 0 : i32
    %12 = arith.cmpi ne, %11, %c0_i32_4 : i32
    scf.if %12 {
      %c1_i32_103 = arith.constant 1 : i32
      %94 = arith.subi %1, %c1_i32_103 : i32
      %c0_i32_104 = arith.constant 0 : i32
      %c0_i32_105 = arith.constant 0 : i32
      %95 = tpu.memref_slice %arg2[%arg0, %94, %c0_i32_104, %c0_i32_105] : memref<2x16x16x128xbf16, #tpu.memory_space<any>> -> memref<1x10x16x128xbf16, #tpu.memory_space<any>>
      %96 = tpu.memref_squeeze %95 : memref<1x10x16x128xbf16, #tpu.memory_space<any>> -> memref<10x16x128xbf16, #tpu.memory_space<any>>
      %c0_i32_106 = arith.constant 0 : i32
      %c0_i32_107 = arith.constant 0 : i32
      %c0_i32_108 = arith.constant 0 : i32
      %97 = tpu.memref_slice %arg7[%c0_i32_106, %c0_i32_107, %c0_i32_108] : memref<10x16x128xbf16, #tpu.memory_space<vmem>> -> memref<10x16x128xbf16, #tpu.memory_space<vmem>>
      tpu.enqueue_dma source(%96 : memref<10x16x128xbf16, #tpu.memory_space<any>>) target(%97 : memref<10x16x128xbf16, #tpu.memory_space<vmem>>) target_semaphore(%arg9 : memref<!tpu.dma_semaphore, #tpu.memory_space<semaphore_mem>>)
      %c0_i32_109 = arith.constant 0 : i32
      %c0_i32_110 = arith.constant 0 : i32
      %98 = tpu.memref_slice %arg2[%arg0, %94, %c0_i32_109, %c0_i32_110] : memref<2x16x16x128xbf16, #tpu.memory_space<any>> -> memref<1x10x16x128xbf16, #tpu.memory_space<any>>
      %99 = tpu.memref_squeeze %98 : memref<1x10x16x128xbf16, #tpu.memory_space<any>> -> memref<10x16x128xbf16, #tpu.memory_space<any>>
      %c0_i32_111 = arith.constant 0 : i32
      %c0_i32_112 = arith.constant 0 : i32
      %c0_i32_113 = arith.constant 0 : i32
      %100 = tpu.memref_slice %arg7[%c0_i32_111, %c0_i32_112, %c0_i32_113] : memref<10x16x128xbf16, #tpu.memory_space<vmem>> -> memref<10x16x128xbf16, #tpu.memory_space<vmem>>
      tpu.wait_dma2 semaphore(%arg9 : memref<!tpu.dma_semaphore, #tpu.memory_space<semaphore_mem>>) src(%99 : memref<10x16x128xbf16, #tpu.memory_space<any>>) dst(%100 : memref<10x16x128xbf16, #tpu.memory_space<vmem>>)
    } else {
    }
    %c0 = arith.constant 0 : index
    %c0_5 = arith.constant 0 : index
    %c0_6 = arith.constant 0 : index
    %13 = vector.load %arg7[%c0, %c0_5, %c0_6] : memref<10x16x128xbf16, #tpu.memory_space<vmem>>, vector<8x16x128xbf16>
    %14 = vector.shape_cast %13 : vector<8x16x128xbf16> to vector<128x128xbf16>
    %c0_7 = arith.constant 0 : index
    %c1 = arith.constant 1 : index
    %c0_8 = arith.constant 0 : index
    %c0_9 = arith.constant 0 : index
    %15 = vector.load %arg3[%c0_7, %c1, %c0_8, %c0_9] : memref<3x3x128x128xbf16, #tpu.memory_space<vmem>>, vector<1x1x128x128xbf16>
    %16 = vector.shape_cast %15 : vector<1x1x128x128xbf16> to vector<128x128xbf16>
    %cst_10 = arith.constant dense<0.000000e+00> : vector<128x128xf32>
    %17 = tpu.matmul %14, %16, %cst_10 {dimension_numbers = #tpu.dot_dimension_numbers<[1], [0], [0], [1], [0, 0, 1, 1], [], []>} : vector<128x128xbf16>, vector<128x128xbf16>, vector<128x128xf32> -> vector<128x128xf32>
    %c1_11 = arith.constant 1 : index
    %c0_12 = arith.constant 0 : index
    %c0_13 = arith.constant 0 : index
    %18 = vector.load %arg7[%c1_11, %c0_12, %c0_13] : memref<10x16x128xbf16, #tpu.memory_space<vmem>>, vector<8x16x128xbf16>
    %19 = vector.shape_cast %18 : vector<8x16x128xbf16> to vector<128x128xbf16>
    %c1_14 = arith.constant 1 : index
    %c1_15 = arith.constant 1 : index
    %c0_16 = arith.constant 0 : index
    %c0_17 = arith.constant 0 : index
    %20 = vector.load %arg3[%c1_14, %c1_15, %c0_16, %c0_17] : memref<3x3x128x128xbf16, #tpu.memory_space<vmem>>, vector<1x1x128x128xbf16>
    %21 = vector.shape_cast %20 : vector<1x1x128x128xbf16> to vector<128x128xbf16>
    %cst_18 = arith.constant dense<0.000000e+00> : vector<128x128xf32>
    %22 = tpu.matmul %19, %21, %cst_18 {dimension_numbers = #tpu.dot_dimension_numbers<[1], [0], [0], [1], [0, 0, 1, 1], [], []>} : vector<128x128xbf16>, vector<128x128xbf16>, vector<128x128xf32> -> vector<128x128xf32>
    %23 = arith.addf %17, %22 : vector<128x128xf32>
    %c2 = arith.constant 2 : index
    %c0_19 = arith.constant 0 : index
    %c0_20 = arith.constant 0 : index
    %24 = vector.load %arg7[%c2, %c0_19, %c0_20] : memref<10x16x128xbf16, #tpu.memory_space<vmem>>, vector<8x16x128xbf16>
    %25 = vector.shape_cast %24 : vector<8x16x128xbf16> to vector<128x128xbf16>
    %c2_21 = arith.constant 2 : index
    %c1_22 = arith.constant 1 : index
    %c0_23 = arith.constant 0 : index
    %c0_24 = arith.constant 0 : index
    %26 = vector.load %arg3[%c2_21, %c1_22, %c0_23, %c0_24] : memref<3x3x128x128xbf16, #tpu.memory_space<vmem>>, vector<1x1x128x128xbf16>
    %27 = vector.shape_cast %26 : vector<1x1x128x128xbf16> to vector<128x128xbf16>
    %cst_25 = arith.constant dense<0.000000e+00> : vector<128x128xf32>
    %28 = tpu.matmul %25, %27, %cst_25 {dimension_numbers = #tpu.dot_dimension_numbers<[1], [0], [0], [1], [0, 0, 1, 1], [], []>} : vector<128x128xbf16>, vector<128x128xbf16>, vector<128x128xf32> -> vector<128x128xf32>
    %29 = arith.addf %23, %28 : vector<128x128xf32>
    %30 = vector.shape_cast %29 : vector<128x128xf32> to vector<8x16x128xf32>
    %c0_26 = arith.constant 0 : index
    %c0_27 = arith.constant 0 : index
    %c0_28 = arith.constant 0 : index
    %31 = vector.load %arg8[%c0_26, %c0_27, %c0_28] : memref<8x16x128xf32, #tpu.memory_space<vmem>>, vector<8x16x128xf32>
    tpu.vector_store %arg8[%c0_26, %c0_27, %c0_28], %30 {strides = array<i32>} : memref<8x16x128xf32, #tpu.memory_space<vmem>>, vector<8x16x128xf32>,
    %c0_29 = arith.constant 0 : index
    %c0_30 = arith.constant 0 : index
    %c0_31 = arith.constant 0 : index
    %32 = vector.load %arg7[%c0_29, %c0_30, %c0_31] : memref<10x16x128xbf16, #tpu.memory_space<vmem>>, vector<8x16x128xbf16>
    %33 = vector.shape_cast %32 : vector<8x16x128xbf16> to vector<128x128xbf16>
    %c0_32 = arith.constant 0 : index
    %c0_33 = arith.constant 0 : index
    %c0_34 = arith.constant 0 : index
    %c0_35 = arith.constant 0 : index
    %34 = vector.load %arg3[%c0_32, %c0_33, %c0_34, %c0_35] : memref<3x3x128x128xbf16, #tpu.memory_space<vmem>>, vector<1x1x128x128xbf16>
    %35 = vector.shape_cast %34 : vector<1x1x128x128xbf16> to vector<128x128xbf16>
    %cst_36 = arith.constant dense<0.000000e+00> : vector<128x128xf32>
    %36 = tpu.matmul %33, %35, %cst_36 {dimension_numbers = #tpu.dot_dimension_numbers<[1], [0], [0], [1], [0, 0, 1, 1], [], []>} : vector<128x128xbf16>, vector<128x128xbf16>, vector<128x128xf32> -> vector<128x128xf32>
    %c1_37 = arith.constant 1 : index
    %c0_38 = arith.constant 0 : index
    %c0_39 = arith.constant 0 : index
    %37 = vector.load %arg7[%c1_37, %c0_38, %c0_39] : memref<10x16x128xbf16, #tpu.memory_space<vmem>>, vector<8x16x128xbf16>
    %38 = vector.shape_cast %37 : vector<8x16x128xbf16> to vector<128x128xbf16>
    %c1_40 = arith.constant 1 : index
    %c0_41 = arith.constant 0 : index
    %c0_42 = arith.constant 0 : index
    %c0_43 = arith.constant 0 : index
    %39 = vector.load %arg3[%c1_40, %c0_41, %c0_42, %c0_43] : memref<3x3x128x128xbf16, #tpu.memory_space<vmem>>, vector<1x1x128x128xbf16>
    %40 = vector.shape_cast %39 : vector<1x1x128x128xbf16> to vector<128x128xbf16>
    %cst_44 = arith.constant dense<0.000000e+00> : vector<128x128xf32>
    %41 = tpu.matmul %38, %40, %cst_44 {dimension_numbers = #tpu.dot_dimension_numbers<[1], [0], [0], [1], [0, 0, 1, 1], [], []>} : vector<128x128xbf16>, vector<128x128xbf16>, vector<128x128xf32> -> vector<128x128xf32>
    %42 = arith.addf %36, %41 : vector<128x128xf32>
    %c2_45 = arith.constant 2 : index
    %c0_46 = arith.constant 0 : index
    %c0_47 = arith.constant 0 : index
    %43 = vector.load %arg7[%c2_45, %c0_46, %c0_47] : memref<10x16x128xbf16, #tpu.memory_space<vmem>>, vector<8x16x128xbf16>
    %44 = vector.shape_cast %43 : vector<8x16x128xbf16> to vector<128x128xbf16>
    %c2_48 = arith.constant 2 : index
    %c0_49 = arith.constant 0 : index
    %c0_50 = arith.constant 0 : index
    %c0_51 = arith.constant 0 : index
    %45 = vector.load %arg3[%c2_48, %c0_49, %c0_50, %c0_51] : memref<3x3x128x128xbf16, #tpu.memory_space<vmem>>, vector<1x1x128x128xbf16>
    %46 = vector.shape_cast %45 : vector<1x1x128x128xbf16> to vector<128x128xbf16>
    %cst_52 = arith.constant dense<0.000000e+00> : vector<128x128xf32>
    %47 = tpu.matmul %44, %46, %cst_52 {dimension_numbers = #tpu.dot_dimension_numbers<[1], [0], [0], [1], [0, 0, 1, 1], [], []>} : vector<128x128xbf16>, vector<128x128xbf16>, vector<128x128xf32> -> vector<128x128xf32>
    %48 = arith.addf %42, %47 : vector<128x128xf32>
    %49 = vector.shape_cast %48 : vector<128x128xf32> to vector<8x16x128xf32>
    %c0_53 = arith.constant 0 : index
    %c1_54 = arith.constant 1 : index
    %c0_55 = arith.constant 0 : index
    %50 = vector.load %arg8[%c0_53, %c1_54, %c0_55] : memref<8x16x128xf32, #tpu.memory_space<vmem>>, vector<8x15x128xf32>
    %51 = vector.extract_strided_slice %49 {offsets = [0, 0, 0], sizes = [8, 15, 128], strides = [1, 1, 1]} : vector<8x16x128xf32> to vector<8x15x128xf32>
    %52 = arith.addf %50, %51 : vector<8x15x128xf32>
    %c0_56 = arith.constant 0 : index
    %c1_57 = arith.constant 1 : index
    %c0_58 = arith.constant 0 : index
    %53 = vector.load %arg8[%c0_56, %c1_57, %c0_58] : memref<8x16x128xf32, #tpu.memory_space<vmem>>, vector<8x15x128xf32>
    tpu.vector_store %arg8[%c0_56, %c1_57, %c0_58], %52 {strides = array<i32>} : memref<8x16x128xf32, #tpu.memory_space<vmem>>, vector<8x15x128xf32>,
    %c0_59 = arith.constant 0 : index
    %c0_60 = arith.constant 0 : index
    %c0_61 = arith.constant 0 : index
    %54 = vector.load %arg7[%c0_59, %c0_60, %c0_61] : memref<10x16x128xbf16, #tpu.memory_space<vmem>>, vector<8x16x128xbf16>
    %55 = vector.shape_cast %54 : vector<8x16x128xbf16> to vector<128x128xbf16>
    %c0_62 = arith.constant 0 : index
    %c2_63 = arith.constant 2 : index
    %c0_64 = arith.constant 0 : index
    %c0_65 = arith.constant 0 : index
    %56 = vector.load %arg3[%c0_62, %c2_63, %c0_64, %c0_65] : memref<3x3x128x128xbf16, #tpu.memory_space<vmem>>, vector<1x1x128x128xbf16>
    %57 = vector.shape_cast %56 : vector<1x1x128x128xbf16> to vector<128x128xbf16>
    %cst_66 = arith.constant dense<0.000000e+00> : vector<128x128xf32>
    %58 = tpu.matmul %55, %57, %cst_66 {dimension_numbers = #tpu.dot_dimension_numbers<[1], [0], [0], [1], [0, 0, 1, 1], [], []>} : vector<128x128xbf16>, vector<128x128xbf16>, vector<128x128xf32> -> vector<128x128xf32>
    %c1_67 = arith.constant 1 : index
    %c0_68 = arith.constant 0 : index
    %c0_69 = arith.constant 0 : index
    %59 = vector.load %arg7[%c1_67, %c0_68, %c0_69] : memref<10x16x128xbf16, #tpu.memory_space<vmem>>, vector<8x16x128xbf16>
    %60 = vector.shape_cast %59 : vector<8x16x128xbf16> to vector<128x128xbf16>
    %c1_70 = arith.constant 1 : index
    %c2_71 = arith.constant 2 : index
    %c0_72 = arith.constant 0 : index
    %c0_73 = arith.constant 0 : index
    %61 = vector.load %arg3[%c1_70, %c2_71, %c0_72, %c0_73] : memref<3x3x128x128xbf16, #tpu.memory_space<vmem>>, vector<1x1x128x128xbf16>
    %62 = vector.shape_cast %61 : vector<1x1x128x128xbf16> to vector<128x128xbf16>
    %cst_74 = arith.constant dense<0.000000e+00> : vector<128x128xf32>
    %63 = tpu.matmul %60, %62, %cst_74 {dimension_numbers = #tpu.dot_dimension_numbers<[1], [0], [0], [1], [0, 0, 1, 1], [], []>} : vector<128x128xbf16>, vector<128x128xbf16>, vector<128x128xf32> -> vector<128x128xf32>
    %64 = arith.addf %58, %63 : vector<128x128xf32>
    %c2_75 = arith.constant 2 : index
    %c0_76 = arith.constant 0 : index
    %c0_77 = arith.constant 0 : index
    %65 = vector.load %arg7[%c2_75, %c0_76, %c0_77] : memref<10x16x128xbf16, #tpu.memory_space<vmem>>, vector<8x16x128xbf16>
    %66 = vector.shape_cast %65 : vector<8x16x128xbf16> to vector<128x128xbf16>
    %c2_78 = arith.constant 2 : index
    %c2_79 = arith.constant 2 : index
    %c0_80 = arith.constant 0 : index
    %c0_81 = arith.constant 0 : index
    %67 = vector.load %arg3[%c2_78, %c2_79, %c0_80, %c0_81] : memref<3x3x128x128xbf16, #tpu.memory_space<vmem>>, vector<1x1x128x128xbf16>
    %68 = vector.shape_cast %67 : vector<1x1x128x128xbf16> to vector<128x128xbf16>
    %cst_82 = arith.constant dense<0.000000e+00> : vector<128x128xf32>
    %69 = tpu.matmul %66, %68, %cst_82 {dimension_numbers = #tpu.dot_dimension_numbers<[1], [0], [0], [1], [0, 0, 1, 1], [], []>} : vector<128x128xbf16>, vector<128x128xbf16>, vector<128x128xf32> -> vector<128x128xf32>
    %70 = arith.addf %64, %69 : vector<128x128xf32>
    %71 = vector.shape_cast %70 : vector<128x128xf32> to vector<8x16x128xf32>
    %c0_83 = arith.constant 0 : index
    %c0_84 = arith.constant 0 : index
    %c0_85 = arith.constant 0 : index
    %72 = vector.load %arg8[%c0_83, %c0_84, %c0_85] : memref<8x16x128xf32, #tpu.memory_space<vmem>>, vector<8x15x128xf32>
    %73 = vector.extract_strided_slice %71 {offsets = [0, 1, 0], sizes = [8, 15, 128], strides = [1, 1, 1]} : vector<8x16x128xf32> to vector<8x15x128xf32>
    %74 = arith.addf %72, %73 : vector<8x15x128xf32>
    %c0_86 = arith.constant 0 : index
    %c0_87 = arith.constant 0 : index
    %c0_88 = arith.constant 0 : index
    %75 = vector.load %arg8[%c0_86, %c0_87, %c0_88] : memref<8x16x128xf32, #tpu.memory_space<vmem>>, vector<8x15x128xf32>
    tpu.vector_store %arg8[%c0_86, %c0_87, %c0_88], %74 {strides = array<i32>} : memref<8x16x128xf32, #tpu.memory_space<vmem>>, vector<8x15x128xf32>,
    %c0_89 = arith.constant 0 : index
    %c0_90 = arith.constant 0 : index
    %c0_91 = arith.constant 0 : index
    %76 = vector.load %arg8[%c0_89, %c0_90, %c0_91] : memref<8x16x128xf32, #tpu.memory_space<vmem>>, vector<8x16x128xf32>
    %cst_92 = arith.constant 0.999994993 : f32
    %77 = vector.broadcast %cst_92 : f32 to vector<8x16x128xf32>
    %78 = arith.mulf %76, %77 : vector<8x16x128xf32>
    %cst_93 = arith.constant 0.000000e+00 : f32
    %79 = vector.broadcast %cst_93 : f32 to vector<8x16x128xf32>
    %80 = arith.maximumf %78, %79 : vector<8x16x128xf32>
    %81 = vector.shape_cast %80 : vector<8x16x128xf32> to vector<128x128xf32>
    %82 = arith.truncf %81 : vector<128x128xf32> to vector<128x128xbf16>
    %c0_94 = arith.constant 0 : index
    %c0_95 = arith.constant 0 : index
    %83 = vector.load %arg4[%c0_94, %c0_95] : memref<128x128xbf16, #tpu.memory_space<vmem>>, vector<128x128xbf16>
    %cst_96 = arith.constant dense<0.000000e+00> : vector<128x128xf32>
    %84 = tpu.matmul %82, %83, %cst_96 {dimension_numbers = #tpu.dot_dimension_numbers<[1], [0], [0], [1], [0, 0, 1, 1], [], []>} : vector<128x128xbf16>, vector<128x128xbf16>, vector<128x128xf32> -> vector<128x128xf32>
    %c0_97 = arith.constant 0 : index
    %c0_98 = arith.constant 0 : index
    %85 = vector.load %arg5[%c0_97, %c0_98] : memref<1x128xf32, #tpu.memory_space<vmem>>, vector<1x128xf32>
    %86 = vector.shape_cast %85 : vector<1x128xf32> to vector<128xf32>
    %87 = vector.shape_cast %86 : vector<128xf32> to vector<1x128xf32>
    %88 = vector.broadcast %87 : vector<1x128xf32> to vector<128x128xf32>
    %89 = arith.addf %84, %88 : vector<128x128xf32>
    %90 = vector.shape_cast %89 : vector<128x128xf32> to vector<8x16x128xf32>
    %c0_99 = arith.constant 0 : index
    %c0_100 = arith.constant 0 : index
    %c0_101 = arith.constant 0 : index
    %c0_102 = arith.constant 0 : index
    %91 = vector.load %arg6[%c0_99, %c0_100, %c0_101, %c0_102] : memref<1x8x16x128xf32, #tpu.memory_space<vmem>>, vector<1x8x16x128xf32>
    %92 = vector.shape_cast %91 : vector<1x8x16x128xf32> to vector<8x16x128xf32>
    %93 = vector.shape_cast %90 : vector<8x16x128xf32> to vector<1x8x16x128xf32>
    tpu.vector_store %arg6[%c0_99, %c0_100, %c0_101, %c0_102], %93 {strides = array<i32>} : memref<1x8x16x128xf32, #tpu.memory_space<vmem>>, vector<1x8x16x128xf32>,
    return
  }
  func.func @transform_1(%arg0: i32, %arg1: i32) -> (i32, i32, i32, i32) {
    %c0_i32 = arith.constant 0 : i32
    %c0_i32_0 = arith.constant 0 : i32
    %c0_i32_1 = arith.constant 0 : i32
    %c0_i32_2 = arith.constant 0 : i32
    %c0_i32_3 = arith.constant 0 : i32
    return %c0_i32, %c0_i32_0, %c0_i32_1, %c0_i32_2 : i32, i32, i32, i32
  }
  func.func @transform_2(%arg0: i32, %arg1: i32) -> (i32, i32) {
    %c0_i32 = arith.constant 0 : i32
    %c0_i32_0 = arith.constant 0 : i32
    %c0_i32_1 = arith.constant 0 : i32
    return %c0_i32, %c0_i32_0 : i32, i32
  }
  func.func @transform_3(%arg0: i32, %arg1: i32) -> (i32, i32) {
    %c0_i32 = arith.constant 0 : i32
    %c0_i32_0 = arith.constant 0 : i32
    %c0_i32_1 = arith.constant 0 : i32
    return %c0_i32, %c0_i32_0 : i32, i32
  }
  func.func @transform_4(%arg0: i32, %arg1: i32) -> (i32, i32, i32, i32) {
    %c0_i32 = arith.constant 0 : i32
    %c0_i32_0 = arith.constant 0 : i32
    %c0_i32_1 = arith.constant 0 : i32
    return %arg0, %arg1, %c0_i32, %c0_i32_0 : i32, i32, i32, i32
  }
}

</mosaic_0001>

<bundles_post_ra>
// kernel: deeplabv3plus_decoder.3
= control target key start
LH: loop header
LB: loop body
LE: loop exit
PB: predicated region body
PF: predicated region fallthrough
CT: control target
= control target key end

     0   :  { %s2061_s15 = smov 0   ;;  %s2063_s16 = smov 0   ;;  %s2313_s0 = inlined_call_operand.vmem [shape: f32[16,8], index: 0, kind: input, shape index: {}]   ;;  %s2314_s1 = inlined_call_operand.vmem [shape: bf16[2,8,8,128], index: 1, kind: input, shape index: {}]   ;;  %s2315_s2 = inlined_call_operand.vmem [shape: bf16[2,16,16,128], index: 2, kind: input, shape index: {}]   ;;  %s2316_s3 = inlined_call_operand.vmem [shape: bf16[128,128], index: 3, kind: input, shape index: {}]   ;;  %s2317_s4 = inlined_call_operand.vmem [shape: bf16[2,16,16,256], index: 4, kind: output, shape index: {}]  }
   0x1   :  { %s2065_s17 = smov 0   ;;  %s2067_s18 = smov 0  }
   0x2   :  { %s2069_s19 = smov 0  }
   0x3 LB: > { %s23_s20 = sadd.s32 1, %s2024_s17  ;;  %s26_s21 = sadd.s32 1, %s2028_s18  ;;  %s2032_s19 = sphi %s2069_s19, %s14_s19   ;;  %s2028_s18 = sphi %s2067_s18, %s2321_s18   ;;  %s2024_s17 = sphi %s2065_s17, %s2320_s17   ;;  %s2020_s16 = sphi %s2063_s16, %s2319_s16   ;;  %s2016_s15 = sphi %s2061_s15, %s2318_s15  }
   0x4   : > { %p24_p0 = scmp.ge.s32.totalorder %s23_s20, 2  ;;  %p1659_p1 = scmp.ge.s32.totalorder %s2032_s19, 1 }
   0x5   : > { %p194_p2 = scmp.lt.s32.totalorder %s2032_s19, 5 }
   0x6   : > { %s2323_s20 = smov (%p24_p0, %s23_s20), 0  ;;  %s2325_s21 = smov (!%p24_p0, %s26_s21), %s2028_s18 }
   0x7   : > { %p195_p3 = pnand %p1659_p1, %p194_p2  ;;  %p28_p4 = scmp.ge.s32.totalorder %s2325_s21, 2 }
   0x8   : > { %p235_p5 = scmp.lt.s32.totalorder (!%p195_p3), %s2020_s16, 1  ;;  %s2097_s26 = sshll.u32 (!%p195_p3), %s2016_s15, 3 }
   0x9   : > { %s2327_s21 = smov (%p28_p4, %s2325_s21), 0  ;;  %198 = sbr.rel (%p195_p3) target bundleno = 303 (0x12f), region = 36 }
   0xa   : > { %p243_p6 = scmp.lt.s32.totalorder (!%p195_p3), %s2097_s26, 15  ;;  %s603_s27 = scvt.s32.f32 (!%p195_p3), %s2097_s26 }
   0xb   : > { %s834_s12 = sadd.s32 (!%p195_p3), 2, %s2097_s26  ;;  %s2034_s13 = smov (!%p195_p3), 0.0  }
   0xc   : > { %s604_s7 = sadd.f32 (!%p195_p3), 0.5, %s603_s27  ;;  %s835_s22 = scvt.s32.f32 (!%p195_p3), %s834_s12 }
   0xd   : > { %s2035_s23 = smov (!%p195_p3), 7.0  }
   0xe   : > { %v1978_v0 = vld [vmem:[%s2316_s3 + $0x38] sm:$0xff]   ;;  %v1979_v1 = vld [vmem:[%s2316_s3 + $0x30] sm:$0xff]   ;;  %s2329_s16 = smov (!%p235_p5, %s2020_s16), 1  ;;  %v1980_v2 = vld [vmem:[%s2316_s3 + $0x28] sm:$0xff]   ;;  %vm629_vm0 = vcmask 64512   ;;  %s605_s28 = smul.f32 0.5, %s604_s7 }
   0xf   : > { %1848 = vmatprep.subr.bf16.mxu0 %v1978_v0  ;;  %s1668_s30 = sshll.u32 %s2329_s16, 6  ;;  %s1775_s6 = sshll.u32 %s2329_s16, 5  ;;  %v1981_v3 = vld [vmem:[%s2316_s3 + $0x20] sm:$0xff]   ;;  %v1982_v5 = vld [vmem:[%s2316_s3 + $0x18] sm:$0xff]   ;;  %v1983_v7 = vld [vmem:[%s2316_s3 + $0x10] sm:$0xff]  }
  0x10   : > { %1849 = vmatpush3.bf16.msra.mxu0 %v1978_v0  ;;  %s244_s5 = scalar_select %p243_p6, %s2097_s26, 15  ;;  %v2111_v4 = vld [vmem:[%s2313_s0] sm:$0xff]  ;;  %v1984_v8 = vld [vmem:[%s2316_s3 + $0x8] sm:$0xff]  }
  0x11   : > { %1850 = vmatprep.subr.bf16.mxu0 %v1979_v1  ;;  %1882 = vmatprep.mubr.msk.f32.mxu1 %vm629_vm0, %v2111_v4  ;;  %s1703_s8 = sadd.f32 -0.5, %s605_s28  ;;  %v1985_v10 = vld [vmem:[%s2316_s3] sm:$0xff]   ;;  %v2165_v21 = vld [vmem:[%s2313_s0 + $0x8] sm:$0xff] }
  0x12   : > { %s1663_s10 = sshll.u32 %s244_s5, 1  ;;  %s1667_s11 = sshll.u32 %s244_s5, 2 }
  0x13   : > { %s247_s14 = sadd.s32 %s1775_s6, %s1663_s10  ;;  %s2113_s15 = sadd.s32 %s1668_s30, %s1667_s11 }
  0x14   : > { %1851 = vmatpush3.bf16.msra.mxu0 %v1979_v1  ;;  %s1665_s16 = sshll.u32 %s247_s14, 2  ;;  %s2129_s5 = scalar_lea.vmem %s2314_s1, %s1775_s6 }
  0x15   : > { %1852 = vmatprep.subr.bf16.mxu0 %v1980_v2  ;;  %s2123_s27 = scalar_lea.vmem %s2315_s2, %s1665_s16  ;;  %s721_s11 = sadd.s32 1, %s2097_s26 }
  0x16   : > { %v1986_v6 = vld [vmem:[%s2123_s27] sm:$0xff]   ;;  %s607_s14 = smax.f32 %s2034_s13, %s1703_s8  ;;  %s722_s16 = scvt.s32.f32 %s721_s11  ;;  %v1987_v17 = vld [vmem:[%s2123_s27 + $0x8] sm:$0xff]   ;;  %v1988_v19 = vld [vmem:[%s2123_s27 + $0x10] sm:$0xff]  }
  0x17   : > { %1864 = vmatprep.mubr.bf16.mxu0 %v1986_v6  ;;  %s608_s7 = sfloor.f32 %s607_s14  ;;  %s836_s9 = sadd.f32 0.5, %s835_s22  ;;  %v1989_v25 = vld [vmem:[%s2123_s27 + $0x18] sm:$0xff]   ;;  %v1990_v28 = vld [vmem:[%s2123_s27 + $0x20] sm:$0xff]   ;;  %v1991_v41 = vld [vmem:[%s2123_s27 + $0x28] sm:$0xff]  }
  0x18   : > { %1853 = vmatpush3.bf16.msra.mxu0 %v1980_v2  ;;  %s609_s6 = smin.f32 %s2035_s23, %s608_s7  ;;  %s723_s24 = sadd.f32 0.5, %s722_s16  ;;  %v1992_v42 = vld [vmem:[%s2123_s27 + $0x30] sm:$0xff]   ;;  %v1993_v45 = vld [vmem:[%s2123_s27 + $0x38] sm:$0xff]  }
  0x19   : > { %1854 = vmatprep.subr.bf16.mxu0 %v1981_v3  ;;  %s2138_s25 = ssub.f32 %s607_s14, %s609_s6  ;;  %s1921_s28 = scvt.f32.s32 %s609_s6 }
  0x1a   : > { %s724_s8 = smul.f32 0.5, %s723_s24  ;;  %s947_s24 = sadd.s32 3, %s2097_s26 }
  0x1b   : > { %s612_s10 = sadd.s32 1, %s1921_s28  ;;  %s1704_s11 = sshll.u32 %s1921_s28, 2  ;;  %v626_v14 = vstv %s2138_s25 }
  0x1c   : > { %1855 = vmatpush3.bf16.msra.mxu0 %v1981_v3  ;;  %p613_p7 = scmp.lt.s32.totalorder %s612_s10, 7  ;;  %s616_s12 = scalar_lea.vmem %s2129_s5, %s1704_s11 }
  0x1d   : > { %1856 = vmatprep.subr.bf16.mxu0 %v1982_v5  ;;  %v617_v9 = vld [vmem:[%s616_s12] sm:$0xf]  ;;  %s623_s16 = ssub.f32 1.0, %s2138_s25  ;;  %s837_s14 = smul.f32 0.5, %s836_s9 }
  0x1e   : > { %s2331_s10 = smov (!%p613_p7, %s612_s10), 7  ;;  %v618_v11 = vunpack.c.l.bf16 %v617_v9  ;;  %s1710_s29 = sadd.f32 -0.5, %s724_s8 }
  0x1f   : > { %s1705_s22 = sshll.u32 %s2331_s10, 2  ;;  %v624_v12 = vstv %s623_s16  ;;  %s1719_s28 = sadd.f32 -0.5, %s837_s14 }
  0x20   : > { %1857 = vmatpush3.bf16.msra.mxu0 %v1982_v5  ;;  %s620_s30 = scalar_lea.vmem %s2129_s5, %s1705_s22  ;;  %s726_s11 = smax.f32 %s2034_s13, %s1710_s29  ;;  %v625_v16 = vmul.f32 %v624_v12, %v618_v11 }
  0x21   : > { %1858 = vmatprep.subr.bf16.mxu0 %v1983_v7  ;;  %v621_v13 = vld [vmem:[%s620_s30] sm:$0xf]  ;;  %s727_s9 = sfloor.f32 %s726_s11  ;;  %s839_s12 = smax.f32 %s2034_s13, %s1719_s28 }
  0x22   : > { %v622_v15 = vunpack.c.l.bf16 %v621_v13  ;;  %s728_s8 = smin.f32 %s2035_s23, %s727_s9  ;;  %s840_s7 = sfloor.f32 %s839_s12 }
  0x23   : > { %s2155_s10 = ssub.f32 %s726_s11, %s728_s8  ;;  %s1923_s16 = scvt.f32.s32 %s728_s8 }
  0x24   : > { %1859 = vmatpush3.bf16.msra.mxu0 %v1983_v7  ;;  %v627_v18 = vmul.f32 %v626_v14, %v622_v15  ;;  %s841_s14 = smin.f32 %s2035_s23, %s840_s7  ;;  %s2159_s25 = scvt.s32.f32 %s947_s24 }
  0x25   : > { %1860 = vmatprep.subr.bf16.mxu0 %v1984_v8  ;;  %s731_s6 = sadd.s32 1, %s1923_s16  ;;  %s1711_s29 = sshll.u32 %s1923_s16, 2  ;;  %v745_v27 = vstv %s2155_s10 }
  0x26   : > { %v628_v20 = vadd.f32 %v627_v18, %v625_v16  ;;  %p732_p8 = scmp.lt.s32.totalorder %s731_s6, 7  ;;  %s735_s22 = scalar_lea.vmem %s2129_s5, %s1711_s29 }
  0x27   : > { %v736_v22 = vld [vmem:[%s735_s22] sm:$0xf]  ;;  %s742_s11 = ssub.f32 1.0, %s2155_s10  ;;  %s1925_s9 = scvt.f32.s32 %s841_s14 }
  0x28   : > { %1861 = vmatpush3.bf16.msra.mxu0 %v1984_v8  ;;  %1880 = vmatprep.subr.mxu1 %v628_v20  ;;  %s2333_s6 = smov (!%p732_p8, %s731_s6), 7  ;;  %v737_v23 = vunpack.c.l.bf16 %v736_v22  ;;  %s2168_s24 = ssub.f32 %s839_s12, %s841_s14 }
  0x29   : > { %1862 = vmatprep.subr.bf16.mxu0 %v1985_v10  ;;  %1881 = vmatpush3.msra.mxu1 %v628_v20  ;;  %s844_s8 = sadd.s32 1, %s1925_s9  ;;  %s1712_s7 = sshll.u32 %s2333_s6, 2  ;;  %v743_v24 = vstv %s742_s11 }
  0x2a   : > { %1883 = vmatmul.mubr.msk.f32.vlgmr.msra.gmra.mxu1 %vm629_vm0, %v2165_v21  ;;  %p845_p9 = scmp.lt.s32.totalorder %s844_s8, 7  ;;  %s739_s16 = scalar_lea.vmem %s2129_s5, %s1712_s7  ;;  %v744_v30 = vmul.f32 %v743_v24, %v737_v23  ;;  %v858_v36 = vstv %s2168_s24 }
  0x2b   : > { %1887 = vmatprep.mubr.msk.f32.mxu1 %vm629_vm0, %v2111_v4  ;;  %s1720_s29 = sshll.u32 %s1925_s9, 2  ;;  %v740_v26 = vld [vmem:[%s739_s16] sm:$0xf]  ;;  %s855_s14 = ssub.f32 1.0, %s2168_s24 }
  0x2c   : > { %1863 = vmatpush3.bf16.msra.mxu0 %v1985_v10  ;;  %s2335_s8 = smov (!%p845_p9, %s844_s8), 7  ;;  %v741_v29 = vunpack.c.l.bf16 %v740_v26  ;;  %s848_s12 = scalar_lea.vmem %s2129_s5, %s1720_s29 }
  0x2d   : > { %v849_v31 = vld [vmem:[%s848_s12] sm:$0xf]  ;;  %s1721_s6 = sshll.u32 %s2335_s8, 2  ;;  %s949_s22 = sadd.f32 0.5, %s2159_s25  ;;  %v856_v34 = vstv %s855_s14 }
  0x2e   : > { %v746_v32 = vmul.f32 %v745_v27, %v741_v29  ;;  %v850_v33 = vunpack.c.l.bf16 %v849_v31  ;;  %s852_s28 = scalar_lea.vmem %s2129_s5, %s1721_s6  ;;  %s1060_s30 = sadd.s32 4, %s2097_s26 }
  0x2f   : > { %1865 = vmatmul.mubr.bf16.vlgmr.msra.gmra.mxu0 %v1987_v17  ;;  %v853_v35 = vld [vmem:[%s852_s28] sm:$0xf]  ;;  %s950_s10 = smul.f32 0.5, %s949_s22  ;;  %s1061_s11 = scvt.s32.f32 %s1060_s30 }
  0x30   : > { %1868 = vmatprep.mubr.bf16.mxu0 %v1988_v19  ;;  %v747_v37 = vadd.f32 %v746_v32, %v744_v30  ;;  %v854_v38 = vunpack.c.l.bf16 %v853_v35  ;;  %v857_v39 = vmul.f32 %v856_v34, %v850_v33  ;;  %s1173_s9 = sadd.s32 5, %s2097_s26  ;;  %s1286_s8 = sadd.s32 6, %s2097_s26 }
  0x31   : > { %s1728_s25 = sadd.f32 -0.5, %s950_s10  ;;  %s1174_s7 = scvt.s32.f32 %s1173_s9 }
  0x32   : > { %1885 = vmatprep.subr.mxu1 %v747_v37  ;;  %v859_v40 = vmul.f32 %v858_v36, %v854_v38  ;;  %s1062_s16 = sadd.f32 0.5, %s1061_s11  ;;  %s2187_s29 = scvt.s32.f32 %s1286_s8 }
  0x33   : > { %1886 = vmatpush3.msra.mxu1 %v747_v37  ;;  %s952_s24 = smax.f32 %s2034_s13, %s1728_s25  ;;  %s1175_s12 = sadd.f32 0.5, %s1174_s7 }
  0x34   : > { %1888 = vmatmul.mubr.msk.f32.vlgmr.msra.gmra.mxu1 %vm629_vm0, %v2165_v21  ;;  %v860_v43 = vadd.f32 %v859_v40, %v857_v39  ;;  %s953_s14 = sfloor.f32 %s952_s24  ;;  %s1063_s6 = smul.f32 0.5, %s1062_s16 }
  0x35   : > { %1892 = vmatprep.mubr.msk.f32.mxu1 %vm629_vm0, %v2111_v4  ;;  %s954_s22 = smin.f32 %s2035_s23, %s953_s14  ;;  %s2196_s28 = smul.f32 0.5, %s1175_s12 }
  0x36   : > { %1890 = vmatprep.subr.mxu1 %v860_v43  ;;  %s2198_s30 = ssub.f32 %s952_s24, %s954_s22  ;;  %s1927_s10 = scvt.f32.s32 %s954_s22 }
  0x37   : > { %1869 = vmatmul.mubr.bf16.gmra.mxu0 %v1989_v25  ;;  %1891 = vmatpush3.msra.mxu1 %v860_v43  ;;  %s1737_s11 = sadd.f32 -0.5, %s1063_s6  ;;  %s1399_s9 = sadd.s32 7, %s2097_s26 }
  0x38   : > { %1872 = vmatprep.mubr.bf16.mxu0 %v1990_v28  ;;  %1893 = vmatmul.mubr.msk.f32.vlgmr.msra.gmra.mxu1 %vm629_vm0, %v2165_v21  ;;  %s957_s8 = sadd.s32 1, %s1927_s10  ;;  %s1729_s25 = sshll.u32 %s1927_s10, 2  ;;  %v971_v49 = vstv %s2198_s30 }
  0x39   : > { %p958_p10 = scmp.lt.s32.totalorder %s957_s8, 7  ;;  %s961_s7 = scalar_lea.vmem %s2129_s5, %s1729_s25  ;;  %1897 = vmatprep.mubr.msk.f32.mxu1 %vm629_vm0, %v2111_v4 }
  0x3a   : > { %v962_v44 = vld [vmem:[%s961_s7] sm:$0xf]  ;;  %s968_s16 = ssub.f32 1.0, %s2198_s30  ;;  %s1065_s24 = smax.f32 %s2034_s13, %s1737_s11 }
  0x3b   : > { %s2337_s8 = smov (!%p958_p10, %s957_s8), 7  ;;  %v963_v46 = vunpack.c.l.bf16 %v962_v44  ;;  %s1066_s12 = sfloor.f32 %s1065_s24 }
  0x3c   : > { %s1746_s14 = sadd.f32 -0.5, %s2196_s28  ;;  %s1730_s6 = sshll.u32 %s2337_s8, 2  ;;  %v969_v47 = vstv %s968_s16 }
  0x3d   : > { %s1067_s22 = smin.f32 %s2035_s23, %s1066_s12  ;;  %s965_s10 = scalar_lea.vmem %s2129_s5, %s1730_s6  ;;  %v970_v51 = vmul.f32 %v969_v47, %v963_v46 }
  0x3e   : > { %s2212_s25 = ssub.f32 %s1065_s24, %s1067_s22  ;;  %v966_v48 = vld [vmem:[%s965_s10] sm:$0xf]  ;;  %s1929_s7 = scvt.f32.s32 %s1067_s22 }
  0x3f   : > { %1873 = vmatmul.mubr.bf16.gmra.mxu0 %v1991_v41  ;;  %s1178_s27 = smax.f32 %s2034_s13, %s1746_s14  ;;  %v967_v50 = vunpack.c.l.bf16 %v966_v48  ;;  %s1288_s6 = sadd.f32 0.5, %s2187_s29 }
  0x40   : > { %1876 = vmatprep.mubr.bf16.mxu0 %v1992_v42  ;;  %s1081_s11 = ssub.f32 1.0, %s2212_s25  ;;  %s1179_s28 = sfloor.f32 %s1178_s27  ;;  %v1084_v58 = vstv %s2212_s25 }
  0x41   : > { %s1070_s8 = sadd.s32 1, %s1929_s7  ;;  %s1738_s16 = sshll.u32 %s1929_s7, 2  ;;  %v972_v52 = vmul.f32 %v971_v49, %v967_v50 }
  0x42   : > { %p1071_p11 = scmp.lt.s32.totalorder %s1070_s8, 7  ;;  %s1074_s12 = scalar_lea.vmem %s2129_s5, %s1738_s16  ;;  %v1082_v56 = vstv %s1081_s11 }
  0x43   : > { %v1075_v53 = vld [vmem:[%s1074_s12] sm:$0xf]  ;;  %s1180_s24 = smin.f32 %s2035_s23, %s1179_s28  ;;  %v973_v54 = vadd.f32 %v972_v52, %v970_v51  ;;  %s1289_s10 = smul.f32 0.5, %s1288_s6 }
  0x44   : > { %s2339_s8 = smov (!%p1071_p11, %s1070_s8), 7  ;;  %v1076_v55 = vunpack.c.l.bf16 %v1075_v53  ;;  %s2220_s30 = ssub.f32 %s1178_s27, %s1180_s24 }
  0x45   : > { %s1931_s14 = scvt.f32.s32 %s1180_s24  ;;  %1895 = vmatprep.subr.mxu1 %v973_v54  ;;  %s1739_s22 = sshll.u32 %s2339_s8, 2 }
  0x46   : > { %1896 = vmatpush3.msra.mxu1 %v973_v54  ;;  %s1078_s7 = scalar_lea.vmem %s2129_s5, %s1739_s22  ;;  %v1083_v60 = vmul.f32 %v1082_v56, %v1076_v55  ;;  %s1194_s11 = ssub.f32 1.0, %s2220_s30  ;;  %v1197_v3 = vstv %s2220_s30 }
  0x47   : > { %1877 = vmatmul.mubr.bf16.gmra.mxu0 %v1993_v45  ;;  %s1183_s16 = sadd.s32 1, %s1931_s14  ;;  %1898 = vmatmul.mubr.msk.f32.vlgmr.msra.gmra.mxu1 %vm629_vm0, %v2165_v21  ;;  %v1079_v57 = vld [vmem:[%s1078_s7] sm:$0xf]  ;;  %s1747_s29 = sshll.u32 %s1931_s14, 2 }
  0x48   : > { %p1184_p12 = scmp.lt.s32.totalorder %s1183_s16, 7  ;;  %v1080_v59 = vunpack.c.l.bf16 %v1079_v57  ;;  %1902 = vmatprep.mubr.msk.f32.mxu1 %vm629_vm0, %v2111_v4  ;;  %s1187_s27 = scalar_lea.vmem %s2129_s5, %s1747_s29  ;;  %v1195_v0 = vstv %s1194_s11 }
  0x49   : > { %v1188_v61 = vld [vmem:[%s1187_s27] sm:$0xf]  ;;  %s1755_s28 = sadd.f32 -0.5, %s1289_s10  ;;  %s1400_s8 = scvt.s32.f32 %s1399_s9 }
  0x4a   : > { %s2341_s16 = smov (!%p1184_p12, %s1183_s16), 7  ;;  %v1085_v62 = vmul.f32 %v1084_v58, %v1080_v59  ;;  %v1189_v63 = vunpack.c.l.bf16 %v1188_v61 }
  0x4b   : > { %s1748_s12 = sshll.u32 %s2341_s16, 2  ;;  %s1291_s24 = smax.f32 %s2034_s13, %s1755_s28 }
  0x4c   : > { %v1086_v1 = vadd.f32 %v1085_v62, %v1083_v60  ;;  %s1191_s25 = scalar_lea.vmem %s2129_s5, %s1748_s12  ;;  %s1292_s6 = sfloor.f32 %s1291_s24  ;;  %v1196_v6 = vmul.f32 %v1195_v0, %v1189_v63 }
  0x4d   : > { %v1192_v2 = vld [vmem:[%s1191_s25] sm:$0xf]  ;;  %s1401_s14 = sadd.f32 0.5, %s1400_s8  ;;  %s1293_s22 = smin.f32 %s2035_s23, %s1292_s6 }
  0x4e   : > { %1900 = vmatprep.subr.mxu1 %v1086_v1  ;;  %v1193_v5 = vunpack.c.l.bf16 %v1192_v2  ;;  %s2236_s10 = ssub.f32 %s1291_s24, %s1293_s22  ;;  %s1933_s26 = scvt.f32.s32 %s1293_s22 }
  0x4f   : > { %1901 = vmatpush3.msra.mxu1 %v1086_v1  ;;  %s1402_s9 = smul.f32 0.5, %s1401_s14 }
  0x50   : > { %1903 = vmatmul.mubr.msk.f32.vlgmr.msra.gmra.mxu1 %vm629_vm0, %v2165_v21  ;;  %v1198_v7 = vmul.f32 %v1197_v3, %v1193_v5  ;;  %s1296_s30 = sadd.s32 1, %s1933_s26  ;;  %s1756_s7 = sshll.u32 %s1933_s26, 2  ;;  %v1310_v13 = vstv %s2236_s10 }
  0x51   : > { %1907 = vmatprep.mubr.msk.f32.mxu1 %vm629_vm0, %v2111_v4  ;;  %p1297_p13 = scmp.lt.s32.totalorder %s1296_s30, 7  ;;  %s1300_s16 = scalar_lea.vmem %s2129_s5, %s1756_s7 }
  0x52   : > { %v1199_v8 = vadd.f32 %v1198_v7, %v1196_v6  ;;  %v1301_v9 = vld [vmem:[%s1300_s16] sm:$0xf]  ;;  %s1307_s29 = ssub.f32 1.0, %s2236_s10  ;;  %s1669_s10 = sshll.u32 %s2113_s15, 2 }
  0x53   : > { %s2343_s30 = smov (!%p1297_p13, %s1296_s30), 7  ;;  %v1302_v10 = vunpack.c.l.bf16 %v1301_v9  ;;  %s1764_s27 = sadd.f32 -0.5, %s1402_s9 }
  0x54   : > { %1905 = vmatprep.subr.mxu1 %v1199_v8  ;;  %s1757_s11 = sshll.u32 %s2343_s30, 2  ;;  %v1308_v11 = vstv %s1307_s29  ;;  %s2264_s7 = scalar_lea.vmem %s2317_s4, %s1669_s10 }
  0x55   : > { %1906 = vmatpush3.msra.mxu1 %v1199_v8  ;;  %s1304_s28 = scalar_lea.vmem %s2129_s5, %s1757_s11  ;;  %s1404_s8 = smax.f32 %s2034_s13, %s1764_s27  ;;  %v1309_v15 = vmul.f32 %v1308_v11, %v1302_v10 }
  0x56   : > { %1908 = vmatmul.mubr.msk.f32.vlgmr.msra.gmra.mxu1 %vm629_vm0, %v2165_v21  ;;  %v1305_v12 = vld [vmem:[%s1304_s28] sm:$0xf]  ;;  %s1405_s12 = sfloor.f32 %s1404_s8 }
  0x57   : > { %1912 = vmatprep.mubr.msk.f32.mxu1 %vm629_vm0, %v2111_v4  ;;  %v1306_v14 = vunpack.c.l.bf16 %v1305_v12  ;;  %s1406_s25 = smin.f32 %s2035_s23, %s1405_s12 }
  0x58   : > { %s1407_s24 = ssub.f32 %s1404_s8, %s1406_s25  ;;  %s1935_s6 = scvt.f32.s32 %s1406_s25 }
  0x59   : > { %v1311_v16 = vmul.f32 %v1310_v13, %v1306_v14 }
  0x5a   : > { %s1409_s14 = sadd.s32 1, %s1935_s6  ;;  %s1765_s22 = sshll.u32 %s1935_s6, 2  ;;  %v1423_v23 = vstv %s1407_s24 }
  0x5b   : > { %v1312_v17 = vadd.f32 %v1311_v16, %v1309_v15  ;;  %p1410_p0 = scmp.lt.s32.totalorder %s1409_s14, 7  ;;  %s1413_s26 = scalar_lea.vmem %s2129_s5, %s1765_s22 }
  0x5c   : > { %v1414_v18 = vld [vmem:[%s1413_s26] sm:$0xf]  ;;  %s1420_s9 = ssub.f32 1.0, %s1407_s24 }
  0x5d   : > { %1910 = vmatprep.subr.mxu1 %v1312_v17  ;;  %s2345_s14 = smov (!%p1410_p0, %s1409_s14), 7  ;;  %v1415_v19 = vunpack.c.l.bf16 %v1414_v18 }
  0x5e   : > { %1911 = vmatpush3.msra.mxu1 %v1312_v17  ;;  %s1766_s13 = sshll.u32 %s2345_s14, 2  ;;  %v1421_v20 = vstv %s1420_s9 }
  0x5f   : > { %1913 = vmatmul.mubr.msk.f32.vlgmr.msra.gmra.mxu1 %vm629_vm0, %v2165_v21  ;;  %s1417_s23 = scalar_lea.vmem %s2129_s5, %s1766_s13  ;;  %v1422_v25 = vmul.f32 %v1421_v20, %v1415_v19 }
  0x60   : > { %1917 = vmatprep.mubr.msk.f32.mxu1 %vm629_vm0, %v2111_v4  ;;  %v1418_v22 = vld [vmem:[%s1417_s23] sm:$0xf] }
  0x61   : > { %v1419_v24 = vunpack.c.l.bf16 %v1418_v22 }
  0x63   : > { %v1424_v26 = vmul.f32 %v1423_v23, %v1419_v24 }
  0x65   : > { %v1425_v27 = vadd.f32 %v1424_v26, %v1422_v25 }
  0x67   : > { %1915 = vmatprep.subr.mxu1 %v1425_v27 }
  0x68   : > { %1916 = vmatpush3.msra.mxu1 %v1425_v27 }
  0x69   : > { %1918 = vmatmul.mubr.msk.f32.vlgmr.msra.gmra.mxu1 %vm629_vm0, %v2165_v21 }
  0xea   : > { %v1884_v32 = vpop.f32.mrf.mxu1 }
  0xeb   : > { %v1793_v33 = vpack.c.bf16 %v1884_v32, %v1884_v32 }
  0xec   : > { %v702_v37 = vpop.f32.mrf.mxu1 }
  0xed   : > { %720 = vst [vmem:[%s2264_s7 + $0x8] sm:$0xf] %v1793_v33  ;;  %v1792_v38 = vpack.c.bf16 %v702_v37, %v702_v37 }
  0xef   : > { %v1866_v28 = vpop.f32.mrf.mxu0  ;;  %719 = vst [vmem:[%s2264_s7] sm:$0xf] %v1792_v38 }
  0xf0   : > { %v490_v29 = vmul.f32 0.999995, %v1866_v28 }
  0xf1   : > { %v425_v30 = vpop.f32.mrf.mxu0 }
  0xf2   : > { %v506_v4 = vmax.f32 %v490_v29, 0.0  ;;  %v488_v31 = vmul.f32 0.999995, %v425_v30 }
  0xf3   : > { %v1867_v34 = vpop.f32.mrf.mxu0 }
  0xf4   : > { %v1778_v35 = vpack.c.bf16 %v506_v4, %v506_v4  ;;  %v504_v21 = vmax.f32 %v488_v31, 0.0  ;;  %v491_v36 = vmul.f32 0.999995, %v1867_v34  ;;  %v1889_v55 = vpop.f32.mrf.mxu1 }
  0xf5   : > { %v428_v39 = vpop.f32.mrf.mxu0  ;;  %v1795_v57 = vpack.c.bf16 %v1889_v55, %v1889_v55 }
  0xf6   : > { %586 = vst [vmem:[%s2264_s7 + $0x14] sm:$0xf] %v1778_v35  ;;  %v1776_v40 = vpack.c.bf16 %v504_v21, %v504_v21  ;;  %v507_v41 = vmax.f32 %v491_v36, 0.0  ;;  %v489_v42 = vmul.f32 0.999995, %v428_v39  ;;  %v814_v61 = vpop.f32.mrf.mxu1 }
  0xf7   : > { %v1870_v43 = vpop.f32.mrf.mxu0  ;;  %1718 = vst [vmem:[%s2264_s7 + $0x18] sm:$0xf] %v1795_v57  ;;  %v1794_v63 = vpack.c.bf16 %v814_v61, %v814_v61 }
  0xf8   : > { %584 = vst [vmem:[%s2264_s7 + $0x4] sm:$0xf] %v1776_v40  ;;  %v1779_v44 = vpack.c.bf16 %v507_v41, %v507_v41  ;;  %v505_v45 = vmax.f32 %v489_v42, 0.0  ;;  %v494_v46 = vmul.f32 0.999995, %v1870_v43  ;;  %v1894_v3 = vpop.f32.mrf.mxu1 }
  0xf9   : > { %v441_v47 = vpop.f32.mrf.mxu0  ;;  %1717 = vst [vmem:[%s2264_s7 + $0x10] sm:$0xf] %v1794_v63  ;;  %v1797_v6 = vpack.c.bf16 %v1894_v3, %v1894_v3 }
  0xfa   : > { %587 = vst [vmem:[%s2264_s7 + $0x1c] sm:$0xf] %v1779_v44  ;;  %v1777_v48 = vpack.c.bf16 %v505_v45, %v505_v45  ;;  %v510_v49 = vmax.f32 %v494_v46, 0.0  ;;  %v492_v50 = vmul.f32 0.999995, %v441_v47  ;;  %v927_v10 = vpop.f32.mrf.mxu1 }
  0xfb   : > { %v1871_v51 = vpop.f32.mrf.mxu0  ;;  %1727 = vst [vmem:[%s2264_s7 + $0x28] sm:$0xf] %v1797_v6  ;;  %v1796_v12 = vpack.c.bf16 %v927_v10, %v927_v10 }
  0xfc   : > { %585 = vst [vmem:[%s2264_s7 + $0xc] sm:$0xf] %v1777_v48  ;;  %v1782_v52 = vpack.c.bf16 %v510_v49, %v510_v49  ;;  %v508_v53 = vmax.f32 %v492_v50, 0.0  ;;  %v495_v54 = vmul.f32 0.999995, %v1871_v51 }
  0xfd   : > { %v444_v56 = vpop.f32.mrf.mxu0  ;;  %1726 = vst [vmem:[%s2264_s7 + $0x20] sm:$0xf] %v1796_v12 }
  0xfe   : > { %590 = vst [vmem:[%s2264_s7 + $0x34] sm:$0xf] %v1782_v52  ;;  %v1780_v58 = vpack.c.bf16 %v508_v53, %v508_v53  ;;  %v511_v59 = vmax.f32 %v495_v54, 0.0  ;;  %v493_v60 = vmul.f32 0.999995, %v444_v56 }
  0xff   : > { %v1874_v62 = vpop.f32.mrf.mxu0 }
 0x100   : > { %588 = vst [vmem:[%s2264_s7 + $0x24] sm:$0xf] %v1780_v58  ;;  %v1783_v0 = vpack.c.bf16 %v511_v59, %v511_v59  ;;  %v509_v1 = vmax.f32 %v493_v60, 0.0  ;;  %v498_v2 = vmul.f32 0.999995, %v1874_v62 }
 0x101   : > { %v457_v5 = vpop.f32.mrf.mxu0 }
 0x102   : > { %591 = vst [vmem:[%s2264_s7 + $0x3c] sm:$0xf] %v1783_v0  ;;  %v1781_v7 = vpack.c.bf16 %v509_v1, %v509_v1  ;;  %v514_v8 = vmax.f32 %v498_v2, 0.0  ;;  %v496_v9 = vmul.f32 0.999995, %v457_v5 }
 0x103   : > { %v1875_v11 = vpop.f32.mrf.mxu0 }
 0x104   : > { %589 = vst [vmem:[%s2264_s7 + $0x2c] sm:$0xf] %v1781_v7  ;;  %v1786_v13 = vpack.c.bf16 %v514_v8, %v514_v8  ;;  %v512_v14 = vmax.f32 %v496_v9, 0.0  ;;  %v499_v15 = vmul.f32 0.999995, %v1875_v11 }
 0x105   : > { %v460_v16 = vpop.f32.mrf.mxu0 }
 0x106   : > { %594 = vst [vmem:[%s2264_s7 + $0x54] sm:$0xf] %v1786_v13  ;;  %v1784_v17 = vpack.c.bf16 %v512_v14, %v512_v14  ;;  %v515_v18 = vmax.f32 %v499_v15, 0.0  ;;  %v497_v19 = vmul.f32 0.999995, %v460_v16 }
 0x107   : > { %v1878_v20 = vpop.f32.mrf.mxu0  ;;  %v1899_v37 = vpop.f32.mrf.mxu1 }
 0x108   : > { %592 = vst [vmem:[%s2264_s7 + $0x44] sm:$0xf] %v1784_v17  ;;  %v1787_v22 = vpack.c.bf16 %v515_v18, %v515_v18  ;;  %v513_v23 = vmax.f32 %v497_v19, 0.0  ;;  %v502_v24 = vmul.f32 0.999995, %v1878_v20  ;;  %v1799_v38 = vpack.c.bf16 %v1899_v37, %v1899_v37 }
 0x109   : > { %v473_v25 = vpop.f32.mrf.mxu0  ;;  %v1040_v40 = vpop.f32.mrf.mxu1 }
 0x10a   : > { %595 = vst [vmem:[%s2264_s7 + $0x5c] sm:$0xf] %v1787_v22  ;;  %v1785_v26 = vpack.c.bf16 %v513_v23, %v513_v23  ;;  %v518_v27 = vmax.f32 %v502_v24, 0.0  ;;  %v500_v28 = vmul.f32 0.999995, %v473_v25  ;;  %v1798_v41 = vpack.c.bf16 %v1040_v40, %v1040_v40 }
 0x10b   : > { %v1879_v29 = vpop.f32.mrf.mxu0  ;;  %1736 = vst [vmem:[%s2264_s7 + $0x38] sm:$0xf] %v1799_v38 }
 0x10c   : > { %593 = vst [vmem:[%s2264_s7 + $0x4c] sm:$0xf] %v1785_v26  ;;  %v1790_v30 = vpack.c.bf16 %v518_v27, %v518_v27  ;;  %v516_v4 = vmax.f32 %v500_v28, 0.0  ;;  %v503_v31 = vmul.f32 0.999995, %v1879_v29 }
 0x10d   : > { %v476_v32 = vpop.f32.mrf.mxu0  ;;  %1735 = vst [vmem:[%s2264_s7 + $0x30] sm:$0xf] %v1798_v41 }
 0x10e   : > { %598 = vst [vmem:[%s2264_s7 + $0x74] sm:$0xf] %v1790_v30  ;;  %v1788_v33 = vpack.c.bf16 %v516_v4, %v516_v4  ;;  %v519_v34 = vmax.f32 %v503_v31, 0.0  ;;  %v501_v35 = vmul.f32 0.999995, %v476_v32 }
 0x110   : > { %596 = vst [vmem:[%s2264_s7 + $0x64] sm:$0xf] %v1788_v33  ;;  %v1791_v21 = vpack.c.bf16 %v519_v34, %v519_v34  ;;  %v517_v36 = vmax.f32 %v501_v35, 0.0  ;;  %v1904_v42 = vpop.f32.mrf.mxu1 }
 0x111   : > { %v1801_v43 = vpack.c.bf16 %v1904_v42, %v1904_v42 }
 0x112   : > { %599 = vst [vmem:[%s2264_s7 + $0x7c] sm:$0xf] %v1791_v21  ;;  %v1789_v39 = vpack.c.bf16 %v517_v36, %v517_v36  ;;  %v1153_v44 = vpop.f32.mrf.mxu1 }
 0x113   : > { %1745 = vst [vmem:[%s2264_s7 + $0x48] sm:$0xf] %v1801_v43  ;;  %v1800_v45 = vpack.c.bf16 %v1153_v44, %v1153_v44 }
 0x114   : > { %597 = vst [vmem:[%s2264_s7 + $0x6c] sm:$0xf] %v1789_v39 }
 0x115   : > { %1744 = vst [vmem:[%s2264_s7 + $0x40] sm:$0xf] %v1800_v45 }
 0x116   : > { %v1909_v46 = vpop.f32.mrf.mxu1 }
 0x117   : > { %v1803_v47 = vpack.c.bf16 %v1909_v46, %v1909_v46 }
 0x118   : > { %v1266_v48 = vpop.f32.mrf.mxu1 }
 0x119   : > { %1754 = vst [vmem:[%s2264_s7 + $0x58] sm:$0xf] %v1803_v47  ;;  %v1802_v49 = vpack.c.bf16 %v1266_v48, %v1266_v48 }
 0x11b   : > { %1753 = vst [vmem:[%s2264_s7 + $0x50] sm:$0xf] %v1802_v49 }
 0x11f   : > { %v1914_v50 = vpop.f32.mrf.mxu1 }
 0x120   : > { %v1805_v51 = vpack.c.bf16 %v1914_v50, %v1914_v50 }
 0x121   : > { %v1379_v52 = vpop.f32.mrf.mxu1 }
 0x122   : > { %1763 = vst [vmem:[%s2264_s7 + $0x68] sm:$0xf] %v1805_v51  ;;  %v1804_v53 = vpack.c.bf16 %v1379_v52, %v1379_v52 }
 0x124   : > { %1762 = vst [vmem:[%s2264_s7 + $0x60] sm:$0xf] %v1804_v53 }
 0x129   : > { %v1919_v54 = vpop.f32.mrf.mxu1 }
 0x12a   : > { %v1807_v55 = vpack.c.bf16 %v1919_v54, %v1919_v54 }
 0x12b   : > { %v1492_v56 = vpop.f32.mrf.mxu1 }
 0x12c   : > { %1772 = vst [vmem:[%s2264_s7 + $0x78] sm:$0xf] %v1807_v55  ;;  %v1806_v57 = vpack.c.bf16 %v1492_v56, %v1492_v56 }
 0x12e   : > { %1771 = vst [vmem:[%s2264_s7 + $0x70] sm:$0xf] %v1806_v57 }
 0x12f PF: > { %s14_s19 = sadd.s32 1, %s2032_s19   ;;  %s2318_s15 = smov %s2024_s17 }
 0x130   : > { %p11_p1 = scmp.ge.s32.totalorder %s14_s19, 6   ;;  %s2319_s16 = smov %s2028_s18 }
 0x131   : > { %s2320_s17 = smov %s2323_s20  ;;  %s2321_s18 = smov %s2327_s21 }
 0x132   :  { %13 = sbr.rel (!%p11_p1) target bundleno = 3 (0x3), region = 92 }

// kernel: deeplabv3plus_decoder.5
= control target key start
LH: loop header
LB: loop body
LE: loop exit
PB: predicated region body
PF: predicated region fallthrough
CT: control target
= control target key end

     0   :  { %s4073_s15 = smov 0   ;;  %s4075_s16 = smov 0   ;;  %s4521_s0 = inlined_call_operand.vmem [shape: bf16[2,16,16,128], index: 0, kind: input, shape index: {}]   ;;  %s4522_s1 = inlined_call_operand.vmem [shape: bf16[3,3,128,128], index: 1, kind: input, shape index: {}]   ;;  %s4523_s2 = inlined_call_operand.vmem [shape: bf16[128,128], index: 2, kind: input, shape index: {}]   ;;  %s4524_s3 = inlined_call_operand.vmem [shape: f32[1,128], index: 3, kind: input, shape index: {}]   ;;  %s4525_s4 = inlined_call_operand.vmem [shape: f32[2,16,16,128], index: 4, kind: output, shape index: {}]  }
   0x1   :  { %s4077_s17 = smov 0   ;;  %s4079_s18 = smov 0  }
   0x2   :  { %s4081_s19 = smov 0  }
   0x3 LB: > { %s23_s20 = sadd.s32 1, %s4036_s17  ;;  %s26_s21 = sadd.s32 1, %s4040_s18  ;;  %s4044_s19 = sphi %s4081_s19, %s14_s19   ;;  %s4040_s18 = sphi %s4079_s18, %s4529_s18   ;;  %s4036_s17 = sphi %s4077_s17, %s4528_s17   ;;  %s4032_s16 = sphi %s4075_s16, %s4527_s16   ;;  %s4028_s15 = sphi %s4073_s15, %s4526_s15  }
   0x4   : > { %p24_p0 = scmp.ge.s32.totalorder %s23_s20, 2  ;;  %p3023_p1 = scmp.ge.s32.totalorder %s4044_s19, 1 }
   0x5   : > { %p142_p2 = scmp.lt.s32.totalorder %s4044_s19, 5 }
   0x6   : > { %s4531_s20 = smov (%p24_p0, %s23_s20), 0  ;;  %s4533_s21 = smov (!%p24_p0, %s26_s21), %s4040_s18 }
   0x7   : > { %p143_p3 = pnand %p3023_p1, %p142_p2  ;;  %p28_p4 = scmp.ge.s32.totalorder %s4533_s21, 2 }
   0x8   : > { %s4108_s22 = sshll.u32 (!%p143_p3), %s4028_s15, 3  ;;  %p167_p5 = scmp.lt.s32.totalorder (!%p143_p3), %s4032_s16, 1 }
   0x9   : > { %s4535_s21 = smov (%p28_p4, %s4533_s21), 0  ;;  %146 = sbr.rel (%p143_p3) target bundleno = 674 (0x2a2), region = 32 }
   0xa   : > { %p169_p6 = scmp.lt.s32.totalorder (!%p143_p3), %s4108_s22, 15  ;;  %p3029_p7 = scmp.ne.s32.totalorder (!%p143_p3), %s4028_s15, 0 }
   0xe   : > { %s168_s23 = scalar_select %p167_p5, %s4032_s16, 1 }
   0xf   : > { %s170_s24 = scalar_select %p169_p6, %s4108_s22, 15 }
  0x10   : > { %s3026_s25 = sshll.u32 %s168_s23, 5  ;;  %182 = sbr.rel (%p3029_p7) target bundleno = 31 (0x1f), region = 36 }
  0x11   : > { %s3025_s26 = sshll.u32 %s170_s24, 1  ;;  %s3325_s6 = sshll.u32 (!%p3029_p7), %s4032_s16, 7 }
  0x12   : > { %s173_s27 = sadd.s32 %s3026_s25, %s3025_s26  ;;  %s187_s9 = scalar_lea.vmem (!%p3029_p7), %s4521_s0, %s3325_s6 }
  0x13   : > { %s3027_s28 = sshll.u32 %s173_s27, 3 }
  0x14   : > { %s4117_s5 = scalar_lea.vmem %s4525_s4, %s3027_s28 }
  0x15   : > { %v4046_v0 = vmov 0   ;;  %v222_v1 = vld [vmem:[%s187_s9] sm:$0xff]  ;;  %v224_v2 = vld [vmem:[%s187_s9 + $0x8] sm:$0xff]  ;;  %v226_v3 = vld [vmem:[%s187_s9 + $0x10] sm:$0xff] }
  0x16   : > { %183 = vst [vmem:[#allocation2] sm:$0xf] %v4046_v0  ;;  %184 = vst [vmem:[#allocation2 + $0x4] sm:$0xf] %v4046_v0  ;;  %v228_v4 = vld [vmem:[%s187_s9 + $0x18] sm:$0xff]  ;;  %v230_v5 = vld [vmem:[%s187_s9 + $0x20] sm:$0xff] }
  0x17   : > { %223 = vst [vmem:[#allocation2 + $0x8] sm:$0xff] %v222_v1  ;;  %225 = vst [vmem:[#allocation2 + $0x10] sm:$0xff] %v224_v2  ;;  %v232_v6 = vld [vmem:[%s187_s9 + $0x28] sm:$0xff]  ;;  %v234_v7 = vld [vmem:[%s187_s9 + $0x30] sm:$0xff] }
  0x18   : > { %227 = vst [vmem:[#allocation2 + $0x18] sm:$0xff] %v226_v3  ;;  %229 = vst [vmem:[#allocation2 + $0x20] sm:$0xff] %v228_v4  ;;  %v236_v8 = vld [vmem:[%s187_s9 + $0x38] sm:$0xff]  ;;  %v238_v9 = vld [vmem:[%s187_s9 + $0x40] sm:$0xff] }
  0x19   : > { %231 = vst [vmem:[#allocation2 + $0x28] sm:$0xff] %v230_v5  ;;  %233 = vst [vmem:[#allocation2 + $0x30] sm:$0xff] %v232_v6 }
  0x1a   : > { %235 = vst [vmem:[#allocation2 + $0x38] sm:$0xff] %v234_v7  ;;  %237 = vst [vmem:[#allocation2 + $0x40] sm:$0xff] %v236_v8 }
  0x1b   : > { %239 = vst [vmem:[#allocation2 + $0x48] sm:$0xff] %v238_v9 }
  0x1c   : > { %247 = vsyncadd [#allocation4], 1152 }
  0x1d   : > { %4020 = dma.done.wait [#allocation4], 1152 }
  0x1e   : > { %4021 = vsyncadd [#allocation4], 4294966144 }
  0x1f PF: > { %p3032_p8 = scmp.ne.s32.totalorder %s4028_s15, 1 }
  0x20   : > { %s3033_s10 = sadd.s32 (!%p3032_p8), 4294967295, %s4108_s22  ;;  %s3035_s11 = sshll.u32 (!%p3032_p8), %s4032_s16, 5 }
  0x21   : > { %256 = sbr.rel (%p3032_p8) target bundleno = 48 (0x30), region = 74  ;;  %s3034_s12 = sshll.u32 (!%p3032_p8), %s3033_s10, 1 }
  0x22   : > { %s263_s13 = sadd.s32 (!%p3032_p8), %s3035_s11, %s3034_s12 }
  0x23   : > { %s3036_s14 = sshll.u32 (!%p3032_p8), %s263_s13, 2 }
  0x24   : > { %s265_s25 = scalar_lea.vmem (!%p3032_p8), %s4521_s0, %s3036_s14 }
  0x26   : > { %v4047_v10 = vmov 0   ;;  %v299_v11 = vld [vmem:[%s265_s25] sm:$0xff]  ;;  %v301_v12 = vld [vmem:[%s265_s25 + $0x8] sm:$0xff]  ;;  %v303_v13 = vld [vmem:[%s265_s25 + $0x10] sm:$0xff] }
  0x27   : > { %258 = vst [vmem:[#allocation2 + $0x48] sm:$0xf] %v4047_v10  ;;  %259 = vst [vmem:[#allocation2 + $0x4c] sm:$0xf] %v4047_v10  ;;  %v305_v14 = vld [vmem:[%s265_s25 + $0x18] sm:$0xff]  ;;  %v307_v15 = vld [vmem:[%s265_s25 + $0x20] sm:$0xff] }
  0x28   : > { %300 = vst [vmem:[#allocation2] sm:$0xff] %v299_v11  ;;  %302 = vst [vmem:[#allocation2 + $0x8] sm:$0xff] %v301_v12  ;;  %v309_v16 = vld [vmem:[%s265_s25 + $0x28] sm:$0xff]  ;;  %v311_v17 = vld [vmem:[%s265_s25 + $0x30] sm:$0xff] }
  0x29   : > { %304 = vst [vmem:[#allocation2 + $0x10] sm:$0xff] %v303_v13  ;;  %306 = vst [vmem:[#allocation2 + $0x18] sm:$0xff] %v305_v14  ;;  %v313_v18 = vld [vmem:[%s265_s25 + $0x38] sm:$0xff]  ;;  %v315_v19 = vld [vmem:[%s265_s25 + $0x40] sm:$0xff] }
  0x2a   : > { %308 = vst [vmem:[#allocation2 + $0x20] sm:$0xff] %v307_v15  ;;  %310 = vst [vmem:[#allocation2 + $0x28] sm:$0xff] %v309_v16 }
  0x2b   : > { %312 = vst [vmem:[#allocation2 + $0x30] sm:$0xff] %v311_v17  ;;  %314 = vst [vmem:[#allocation2 + $0x38] sm:$0xff] %v313_v18 }
  0x2c   : > { %316 = vst [vmem:[#allocation2 + $0x40] sm:$0xff] %v315_v19 }
  0x2d   : > { %324 = vsyncadd [#allocation4], 1152 }
  0x2e   : > { %4022 = dma.done.wait [#allocation4], 1152 }
  0x2f   : > { %4023 = vsyncadd [#allocation4], 4294966144 }
  0x30 PF: > { %p330_p9 = scmp.gt.s32.totalorder %s4028_s15, 0  ;;  %p331_p10 = scmp.lt.s32.totalorder %s4028_s15, 1 }
  0x32   : > { %p332_p11 = pnand %p331_p10, %p330_p9 }
  0x33   : > { %s3037_s26 = sadd.s32 (!%p332_p11), 4294967295, %s4108_s22  ;;  %s3039_s27 = sshll.u32 (!%p332_p11), %s4032_s16, 5 }
  0x34   : > { %335 = sbr.rel (%p332_p11) target bundleno = 66 (0x42), region = 112  ;;  %s3038_s28 = sshll.u32 (!%p332_p11), %s3037_s26, 1 }
  0x35   : > { %s339_s29 = sadd.s32 (!%p332_p11), %s3039_s27, %s3038_s28 }
  0x36   : > { %s3040_s30 = sshll.u32 (!%p332_p11), %s339_s29, 2 }
  0x37   : > { %s341_s8 = scalar_lea.vmem (!%p332_p11), %s4521_s0, %s3040_s30 }
  0x39   : > { %v375_v20 = vld [vmem:[%s341_s8] sm:$0xff]  ;;  %v377_v21 = vld [vmem:[%s341_s8 + $0x8] sm:$0xff]  ;;  %v379_v22 = vld [vmem:[%s341_s8 + $0x10] sm:$0xff] }
  0x3a   : > { %376 = vst [vmem:[#allocation2] sm:$0xff] %v375_v20  ;;  %378 = vst [vmem:[#allocation2 + $0x8] sm:$0xff] %v377_v21  ;;  %v381_v23 = vld [vmem:[%s341_s8 + $0x18] sm:$0xff]  ;;  %v383_v24 = vld [vmem:[%s341_s8 + $0x20] sm:$0xff] }
  0x3b   : > { %380 = vst [vmem:[#allocation2 + $0x10] sm:$0xff] %v379_v22  ;;  %v385_v25 = vld [vmem:[%s341_s8 + $0x28] sm:$0xff]  ;;  %382 = vst [vmem:[#allocation2 + $0x18] sm:$0xff] %v381_v23  ;;  %v387_v26 = vld [vmem:[%s341_s8 + $0x30] sm:$0xff] }
  0x3c   : > { %384 = vst [vmem:[#allocation2 + $0x20] sm:$0xff] %v383_v24  ;;  %386 = vst [vmem:[#allocation2 + $0x28] sm:$0xff] %v385_v25  ;;  %v389_v27 = vld [vmem:[%s341_s8 + $0x38] sm:$0xff]  ;;  %v391_v28 = vld [vmem:[%s341_s8 + $0x40] sm:$0xff] }
  0x3d   : > { %388 = vst [vmem:[#allocation2 + $0x30] sm:$0xff] %v387_v26  ;;  %390 = vst [vmem:[#allocation2 + $0x38] sm:$0xff] %v389_v27  ;;  %v393_v29 = vld [vmem:[%s341_s8 + $0x48] sm:$0xff] }
  0x3e   : > { %392 = vst [vmem:[#allocation2 + $0x40] sm:$0xff] %v391_v28  ;;  %394 = vst [vmem:[#allocation2 + $0x48] sm:$0xff] %v393_v29 }
  0x3f   : > { %402 = vsyncadd [#allocation4], 1280 }
  0x40   : > { %4024 = dma.done.wait [#allocation4], 1280 }
  0x41   : > { %4025 = vsyncadd [#allocation4], 4294966016 }
  0x42 PF: > { %v3848_v30 = vld [vmem:[%s4522_s1 + $0x138] sm:$0xff]   ;;  %v3850_v32 = vld [vmem:[%s4522_s1 + $0x130] sm:$0xff]   ;;  %v3852_v34 = vld [vmem:[%s4522_s1 + $0x128] sm:$0xff]   ;;  %vm2587_vm0 = vcmask 1046528  }
  0x43   : > { %v3849_v31 = vld [vmem:[%s4522_s1 + $0x78] sm:$0xff]   ;;  %3486 = vmatprep.subr.bf16.mxu0 %v3848_v30  ;;  %v3851_v33 = vld [vmem:[%s4522_s1 + $0x70] sm:$0xff]   ;;  %v3853_v35 = vld [vmem:[%s4522_s1 + $0x68] sm:$0xff]  }
  0x44   : > { %3518 = vmatprep.subr.bf16.mxu1 %v3849_v31  ;;  %3487 = vmatpush3.bf16.msra.mxu0 %v3848_v30  ;;  %v3854_v36 = vld [vmem:[%s4522_s1 + $0x120] sm:$0xff]   ;;  %v3856_v38 = vld [vmem:[%s4522_s1 + $0x118] sm:$0xff]   ;;  %v3858_v40 = vld [vmem:[%s4522_s1 + $0x110] sm:$0xff]  }
  0x45   : > { %3519 = vmatpush3.bf16.msra.mxu1 %v3849_v31  ;;  %3488 = vmatprep.subr.bf16.mxu0 %v3850_v32  ;;  %v3855_v37 = vld [vmem:[%s4522_s1 + $0x60] sm:$0xff]   ;;  %v3857_v39 = vld [vmem:[%s4522_s1 + $0x58] sm:$0xff]   ;;  %v3859_v41 = vld [vmem:[%s4522_s1 + $0x50] sm:$0xff]  }
  0x46   : > { %3520 = vmatprep.subr.bf16.mxu1 %v3851_v33  ;;  %v3864_v42 = vld [vmem:[#allocation2 + $0x8] sm:$0xff]   ;;  %v3865_v43 = vld [vmem:[#allocation2] sm:$0xff]   ;;  %v3866_v48 = vld [vmem:[#allocation2 + $0x10] sm:$0xff]  }
  0x47   : > { %3502 = vmatprep.mubr.bf16.mxu0 %v3864_v42  ;;  %3534 = vmatprep.mubr.bf16.mxu1 %v3865_v43  ;;  %v3860_v44 = vld [vmem:[%s4522_s1 + $0x108] sm:$0xff]   ;;  %v3862_v46 = vld [vmem:[%s4522_s1 + $0x100] sm:$0xff]   ;;  %v3868_v49 = vld [vmem:[%s4522_s1 + $0x1f8] sm:$0xff]  }
  0x48   : > { %3489 = vmatpush3.bf16.msra.mxu0 %v3850_v32  ;;  %v3861_v45 = vld [vmem:[%s4522_s1 + $0x48] sm:$0xff]   ;;  %v3863_v47 = vld [vmem:[%s4522_s1 + $0x40] sm:$0xff]   ;;  %v3869_v50 = vld [vmem:[%s4522_s1 + $0xf8] sm:$0xff]  }
  0x49   : > { %3521 = vmatpush3.bf16.msra.mxu1 %v3851_v33  ;;  %3490 = vmatprep.subr.bf16.mxu0 %v3852_v34  ;;  %v3867_v51 = vld [vmem:[#allocation2 + $0x8] sm:$0xff]   ;;  %v3870_v52 = vld [vmem:[%s4522_s1 + $0x1f0] sm:$0xff]   ;;  %v3872_v54 = vld [vmem:[#allocation2 + $0x18] sm:$0xff]  }
  0x4a   : > { %3522 = vmatprep.subr.bf16.mxu1 %v3853_v35  ;;  %v3871_v53 = vld [vmem:[%s4522_s1 + $0xf0] sm:$0xff]   ;;  %v3874_v56 = vld [vmem:[#allocation2 + $0x20] sm:$0xff]   ;;  %v3876_v57 = vld [vmem:[%s4522_s1 + $0x1e8] sm:$0xff]  }
  0x4b   : > { %v3873_v55 = vld [vmem:[#allocation2 + $0x10] sm:$0xff]   ;;  %v3877_v58 = vld [vmem:[%s4522_s1 + $0xe8] sm:$0xff]   ;;  %v3875_v59 = vld [vmem:[#allocation2 + $0x18] sm:$0xff]  }
  0x4c   : > { %3491 = vmatpush3.bf16.msra.mxu0 %v3852_v34  ;;  %v3878_v60 = vld [vmem:[%s4522_s1 + $0x1e0] sm:$0xff]   ;;  %v3880_v62 = vld [vmem:[#allocation2 + $0x28] sm:$0xff]   ;;  %v3882_v0 = vld [vmem:[#allocation2 + $0x30] sm:$0xff]  }
  0x4d   : > { %3523 = vmatpush3.bf16.msra.mxu1 %v3853_v35  ;;  %3492 = vmatprep.subr.bf16.mxu0 %v3854_v36  ;;  %v3879_v61 = vld [vmem:[%s4522_s1 + $0xe0] sm:$0xff]   ;;  %v3884_v1 = vld [vmem:[%s4522_s1 + $0x1d8] sm:$0xff]   ;;  %v3883_v3 = vld [vmem:[#allocation2 + $0x28] sm:$0xff]  }
  0x4e   : > { %3524 = vmatprep.subr.bf16.mxu1 %v3855_v37  ;;  %v3881_v63 = vld [vmem:[#allocation2 + $0x20] sm:$0xff]   ;;  %v3885_v2 = vld [vmem:[%s4522_s1 + $0xd8] sm:$0xff]   ;;  %v3886_v4 = vld [vmem:[%s4522_s1 + $0x1d0] sm:$0xff]  }
  0x4f   : > { %v3887_v5 = vld [vmem:[%s4522_s1 + $0xd0] sm:$0xff]   ;;  %v3888_v6 = vld [vmem:[#allocation2 + $0x38] sm:$0xff]   ;;  %v3890_v8 = vld [vmem:[#allocation2 + $0x40] sm:$0xff]  }
  0x50   : > { %3493 = vmatpush3.bf16.msra.mxu0 %v3854_v36  ;;  %v3889_v7 = vld [vmem:[#allocation2 + $0x30] sm:$0xff]   ;;  %v3892_v9 = vld [vmem:[%s4522_s1 + $0x1c8] sm:$0xff]   ;;  %v3891_v11 = vld [vmem:[#allocation2 + $0x38] sm:$0xff]  }
  0x51   : > { %3525 = vmatpush3.bf16.msra.mxu1 %v3855_v37  ;;  %3494 = vmatprep.subr.bf16.mxu0 %v3856_v38  ;;  %v3893_v10 = vld [vmem:[%s4522_s1 + $0xc8] sm:$0xff]   ;;  %v3894_v12 = vld [vmem:[%s4522_s1 + $0x1c0] sm:$0xff]   ;;  %v3896_v14 = vld [vmem:[#allocation2 + $0x10] sm:$0xff]  }
  0x52   : > { %3526 = vmatprep.subr.bf16.mxu1 %v3857_v39  ;;  %v3895_v13 = vld [vmem:[%s4522_s1 + $0xc0] sm:$0xff]   ;;  %v3897_v15 = vld [vmem:[#allocation2 + $0x8] sm:$0xff]   ;;  %v3898_v16 = vld [vmem:[#allocation2 + $0x18] sm:$0xff]  }
  0x53   : > { %v3900_v17 = vld [vmem:[%s4522_s1 + $0x38] sm:$0xff]   ;;  %v3899_v19 = vld [vmem:[#allocation2 + $0x10] sm:$0xff]   ;;  %v3904_v22 = vld [vmem:[#allocation2 + $0x20] sm:$0xff]  }
  0x54   : > { %3495 = vmatpush3.bf16.msra.mxu0 %v3856_v38  ;;  %v3901_v18 = vld [vmem:[%s4522_s1 + $0x1b8] sm:$0xff]   ;;  %v3902_v20 = vld [vmem:[%s4522_s1 + $0x30] sm:$0xff]   ;;  %v3906_v24 = vld [vmem:[#allocation2 + $0x28] sm:$0xff]  }
  0x55   : > { %3527 = vmatpush3.bf16.msra.mxu1 %v3857_v39  ;;  %3496 = vmatprep.subr.bf16.mxu0 %v3858_v40  ;;  %v3903_v21 = vld [vmem:[%s4522_s1 + $0x1b0] sm:$0xff]   ;;  %v3905_v23 = vld [vmem:[#allocation2 + $0x18] sm:$0xff]   ;;  %v3908_v25 = vld [vmem:[%s4522_s1 + $0x28] sm:$0xff]  }
  0x56   : > { %3528 = vmatprep.subr.bf16.mxu1 %v3859_v41  ;;  %v3909_v26 = vld [vmem:[%s4522_s1 + $0x1a8] sm:$0xff]   ;;  %v3907_v27 = vld [vmem:[#allocation2 + $0x20] sm:$0xff]   ;;  %v3912_v30 = vld [vmem:[#allocation2 + $0x30] sm:$0xff]  }
  0x57   : > { %v3910_v28 = vld [vmem:[%s4522_s1 + $0x20] sm:$0xff]   ;;  %v3913_v31 = vld [vmem:[#allocation2 + $0x28] sm:$0xff]   ;;  %v3914_v32 = vld [vmem:[#allocation2 + $0x38] sm:$0xff]  }
  0x58   : > { %3497 = vmatpush3.bf16.msra.mxu0 %v3858_v40  ;;  %v3911_v29 = vld [vmem:[%s4522_s1 + $0x1a0] sm:$0xff]   ;;  %v3916_v33 = vld [vmem:[%s4522_s1 + $0x18] sm:$0xff]   ;;  %v3915_v35 = vld [vmem:[#allocation2 + $0x30] sm:$0xff]  }
  0x59   : > { %3529 = vmatpush3.bf16.msra.mxu1 %v3859_v41  ;;  %3498 = vmatprep.subr.bf16.mxu0 %v3860_v44  ;;  %v3917_v34 = vld [vmem:[%s4522_s1 + $0x198] sm:$0xff]   ;;  %v3918_v36 = vld [vmem:[%s4522_s1 + $0x10] sm:$0xff]   ;;  %v3920_v38 = vld [vmem:[#allocation2 + $0x40] sm:$0xff]  }
  0x5a   : > { %3530 = vmatprep.subr.bf16.mxu1 %v3861_v45  ;;  %v3919_v37 = vld [vmem:[%s4522_s1 + $0x190] sm:$0xff]   ;;  %v3921_v39 = vld [vmem:[#allocation2 + $0x38] sm:$0xff]   ;;  %v3922_v40 = vld [vmem:[#allocation2 + $0x48] sm:$0xff]  }
  0x5b   : > { %v3924_v41 = vld [vmem:[%s4522_s1 + $0x8] sm:$0xff]   ;;  %v3923_v43 = vld [vmem:[#allocation2 + $0x40] sm:$0xff]  }
  0x5c   : > { %3499 = vmatpush3.bf16.msra.mxu0 %v3860_v44  ;;  %v3925_v42 = vld [vmem:[%s4522_s1 + $0x188] sm:$0xff]   ;;  %v3926_v44 = vld [vmem:[%s4522_s1] sm:$0xff]  }
  0x5d   : > { %3531 = vmatpush3.bf16.msra.mxu1 %v3861_v45  ;;  %3500 = vmatprep.subr.bf16.mxu0 %v3862_v46  ;;  %v3927_v45 = vld [vmem:[%s4522_s1 + $0x180] sm:$0xff]  }
  0x5e   : > { %3532 = vmatprep.subr.bf16.mxu1 %v3863_v47 }
  0x60   : > { %3501 = vmatpush3.bf16.msra.mxu0 %v3862_v46  ;;  %v3928_v46 = vld [vmem:[#allocation2] sm:$0xff]  }
  0x61   : > { %3533 = vmatpush3.bf16.msra.mxu1 %v3863_v47  ;;  %3550 = vmatprep.subr.bf16.mxu0 %v3868_v49  ;;  %v3929_v47 = vld [vmem:[#allocation2 + $0x10] sm:$0xff]  }
  0x62   : > { %3582 = vmatprep.subr.bf16.mxu1 %v3869_v50 }
  0x63   : > { %3503 = vmatmul.mubr.bf16.vlgmr.msra.gmra.mxu0 %v3866_v48  ;;  %v3930_v48 = vld [vmem:[#allocation2 + $0x8] sm:$0xff]  }
  0x64   : > { %3535 = vmatmul.mubr.bf16.vlgmr.msra.gmra.mxu1 %v3867_v51  ;;  %3551 = vmatpush3.bf16.msra.mxu0 %v3868_v49  ;;  %v3932_v49 = vld [vmem:[%s4522_s1 + $0x178] sm:$0xff]  }
  0x65   : > { %3583 = vmatpush3.bf16.msra.mxu1 %v3869_v50  ;;  %3552 = vmatprep.subr.bf16.mxu0 %v3870_v52  ;;  %v3933_v50 = vld [vmem:[%s4522_s1 + $0xb8] sm:$0xff]  }
  0x66   : > { %3584 = vmatprep.subr.bf16.mxu1 %v3871_v53  ;;  %3506 = vmatprep.mubr.bf16.mxu0 %v3872_v54  ;;  %v3931_v51 = vld [vmem:[#allocation2 + $0x18] sm:$0xff]   ;;  %v3936_v54 = vld [vmem:[#allocation2 + $0x10] sm:$0xff]  }
  0x67   : > { %3538 = vmatprep.mubr.bf16.mxu1 %v3873_v55  ;;  %v3937_v55 = vld [vmem:[#allocation2 + $0x20] sm:$0xff]  }
  0x68   : > { %3553 = vmatpush3.bf16.msra.mxu0 %v3870_v52  ;;  %v3934_v52 = vld [vmem:[%s4522_s1 + $0x170] sm:$0xff]  }
  0x69   : > { %3585 = vmatpush3.bf16.msra.mxu1 %v3871_v53  ;;  %3554 = vmatprep.subr.bf16.mxu0 %v3876_v57  ;;  %v3935_v53 = vld [vmem:[%s4522_s1 + $0xb0] sm:$0xff]  }
  0x6a   : > { %3586 = vmatprep.subr.bf16.mxu1 %v3877_v58 }
  0x6b   : > { %3507 = vmatmul.mubr.bf16.gmra.mxu0 %v3874_v56  ;;  %v3938_v56 = vld [vmem:[#allocation2 + $0x18] sm:$0xff]  }
  0x6c   : > { %3539 = vmatmul.mubr.bf16.gmra.mxu1 %v3875_v59  ;;  %3555 = vmatpush3.bf16.msra.mxu0 %v3876_v57  ;;  %v3940_v57 = vld [vmem:[%s4522_s1 + $0x168] sm:$0xff]  }
  0x6d   : > { %3587 = vmatpush3.bf16.msra.mxu1 %v3877_v58  ;;  %3556 = vmatprep.subr.bf16.mxu0 %v3878_v60  ;;  %v3941_v58 = vld [vmem:[%s4522_s1 + $0xa8] sm:$0xff]  }
  0x6e   : > { %3588 = vmatprep.subr.bf16.mxu1 %v3879_v61  ;;  %3510 = vmatprep.mubr.bf16.mxu0 %v3880_v62  ;;  %v3939_v59 = vld [vmem:[#allocation2 + $0x28] sm:$0xff]   ;;  %v3944_v62 = vld [vmem:[#allocation2 + $0x20] sm:$0xff]  }
  0x6f   : > { %3542 = vmatprep.mubr.bf16.mxu1 %v3881_v63  ;;  %v3945_v63 = vld [vmem:[#allocation2 + $0x30] sm:$0xff]  }
  0x70   : > { %3557 = vmatpush3.bf16.msra.mxu0 %v3878_v60  ;;  %v3942_v60 = vld [vmem:[%s4522_s1 + $0x160] sm:$0xff]  }
  0x71   : > { %3589 = vmatpush3.bf16.msra.mxu1 %v3879_v61  ;;  %3558 = vmatprep.subr.bf16.mxu0 %v3884_v1  ;;  %v3943_v61 = vld [vmem:[%s4522_s1 + $0xa0] sm:$0xff]  }
  0x72   : > { %3590 = vmatprep.subr.bf16.mxu1 %v3885_v2 }
  0x73   : > { %3511 = vmatmul.mubr.bf16.gmra.mxu0 %v3882_v0  ;;  %v3946_v0 = vld [vmem:[#allocation2 + $0x28] sm:$0xff]  }
  0x74   : > { %3543 = vmatmul.mubr.bf16.gmra.mxu1 %v3883_v3  ;;  %3559 = vmatpush3.bf16.msra.mxu0 %v3884_v1  ;;  %v3948_v1 = vld [vmem:[%s4522_s1 + $0x158] sm:$0xff]  }
  0x75   : > { %3591 = vmatpush3.bf16.msra.mxu1 %v3885_v2  ;;  %3560 = vmatprep.subr.bf16.mxu0 %v3886_v4  ;;  %v3949_v2 = vld [vmem:[%s4522_s1 + $0x98] sm:$0xff]  }
  0x76   : > { %3592 = vmatprep.subr.bf16.mxu1 %v3887_v5  ;;  %3514 = vmatprep.mubr.bf16.mxu0 %v3888_v6  ;;  %v3947_v3 = vld [vmem:[#allocation2 + $0x38] sm:$0xff]   ;;  %v3952_v6 = vld [vmem:[#allocation2 + $0x30] sm:$0xff]  }
  0x77   : > { %3546 = vmatprep.mubr.bf16.mxu1 %v3889_v7  ;;  %v3953_v7 = vld [vmem:[#allocation2 + $0x40] sm:$0xff]  }
  0x78   : > { %3561 = vmatpush3.bf16.msra.mxu0 %v3886_v4  ;;  %v3950_v4 = vld [vmem:[%s4522_s1 + $0x150] sm:$0xff]  }
  0x79   : > { %3593 = vmatpush3.bf16.msra.mxu1 %v3887_v5  ;;  %3562 = vmatprep.subr.bf16.mxu0 %v3892_v9  ;;  %v3951_v5 = vld [vmem:[%s4522_s1 + $0x90] sm:$0xff]  }
  0x7a   : > { %3594 = vmatprep.subr.bf16.mxu1 %v3893_v10 }
  0x7b   : > { %3515 = vmatmul.mubr.bf16.gmra.mxu0 %v3890_v8  ;;  %v3954_v8 = vld [vmem:[#allocation2 + $0x38] sm:$0xff]  }
  0x7c   : > { %3547 = vmatmul.mubr.bf16.gmra.mxu1 %v3891_v11  ;;  %3563 = vmatpush3.bf16.msra.mxu0 %v3892_v9  ;;  %v3956_v9 = vld [vmem:[%s4522_s1 + $0x148] sm:$0xff]  }
  0x7d   : > { %3595 = vmatpush3.bf16.msra.mxu1 %v3893_v10  ;;  %3564 = vmatprep.subr.bf16.mxu0 %v3894_v12  ;;  %v3957_v10 = vld [vmem:[%s4522_s1 + $0x88] sm:$0xff]  }
  0x7e   : > { %3596 = vmatprep.subr.bf16.mxu1 %v3895_v13  ;;  %3566 = vmatprep.mubr.bf16.mxu0 %v3896_v14  ;;  %v3955_v11 = vld [vmem:[#allocation2 + $0x48] sm:$0xff]  }
  0x7f   : > { %3598 = vmatprep.mubr.bf16.mxu1 %v3897_v15  ;;  %v3960_v14 = vld [vmem:[#allocation2 + $0x8] sm:$0xff]   ;;  %v3961_v15 = vld [vmem:[#allocation2] sm:$0xff]  }
  0x80   : > { %3565 = vmatpush3.bf16.msra.mxu0 %v3894_v12  ;;  %v3958_v12 = vld [vmem:[%s4522_s1 + $0x140] sm:$0xff]  }
  0x81   : > { %3597 = vmatpush3.bf16.msra.mxu1 %v3895_v13  ;;  %3614 = vmatprep.subr.bf16.mxu0 %v3900_v17  ;;  %v3959_v13 = vld [vmem:[%s4522_s1 + $0x80] sm:$0xff]  }
  0x82   : > { %3646 = vmatprep.subr.bf16.mxu1 %v3901_v18 }
  0x83   : > { %3567 = vmatmul.mubr.bf16.vlgmr.msra.gmra.mxu0 %v3898_v16  ;;  %v3964_v16 = vld [vmem:[%s4522_s1 + $0x238] sm:$0xff]  }
  0x84   : > { %3599 = vmatmul.mubr.bf16.vlgmr.msra.gmra.mxu1 %v3899_v19  ;;  %3615 = vmatpush3.bf16.msra.mxu0 %v3900_v17  ;;  %v3962_v17 = vld [vmem:[#allocation2 + $0x10] sm:$0xff]  }
  0x85   : > { %3647 = vmatpush3.bf16.msra.mxu1 %v3901_v18  ;;  %3616 = vmatprep.subr.bf16.mxu0 %v3902_v20  ;;  %v3963_v18 = vld [vmem:[#allocation2 + $0x8] sm:$0xff]   ;;  %v3965_v19 = vld [vmem:[%s4522_s1 + $0x230] sm:$0xff]  }
  0x86   : > { %3648 = vmatprep.subr.bf16.mxu1 %v3903_v21  ;;  %3570 = vmatprep.mubr.bf16.mxu0 %v3904_v22  ;;  %v3970_v22 = vld [vmem:[%s4522_s1 + $0x228] sm:$0xff]  }
  0x87   : > { %3602 = vmatprep.mubr.bf16.mxu1 %v3905_v23  ;;  %v3968_v23 = vld [vmem:[#allocation2 + $0x20] sm:$0xff]  }
  0x88   : > { %3617 = vmatpush3.bf16.msra.mxu0 %v3902_v20  ;;  %v3966_v20 = vld [vmem:[#allocation2 + $0x18] sm:$0xff]  }
  0x89   : > { %3649 = vmatpush3.bf16.msra.mxu1 %v3903_v21  ;;  %3618 = vmatprep.subr.bf16.mxu0 %v3908_v25  ;;  %v3967_v21 = vld [vmem:[#allocation2 + $0x10] sm:$0xff]  }
  0x8a   : > { %3650 = vmatprep.subr.bf16.mxu1 %v3909_v26 }
  0x8b   : > { %3571 = vmatmul.mubr.bf16.gmra.mxu0 %v3906_v24  ;;  %v3969_v24 = vld [vmem:[#allocation2 + $0x18] sm:$0xff]  }
  0x8c   : > { %3603 = vmatmul.mubr.bf16.gmra.mxu1 %v3907_v27  ;;  %3619 = vmatpush3.bf16.msra.mxu0 %v3908_v25  ;;  %v3971_v25 = vld [vmem:[%s4522_s1 + $0x220] sm:$0xff]  }
  0x8d   : > { %3651 = vmatpush3.bf16.msra.mxu1 %v3909_v26  ;;  %3620 = vmatprep.subr.bf16.mxu0 %v3910_v28  ;;  %v3972_v26 = vld [vmem:[#allocation2 + $0x28] sm:$0xff]   ;;  %v3973_v27 = vld [vmem:[#allocation2 + $0x20] sm:$0xff]  }
  0x8e   : > { %3652 = vmatprep.subr.bf16.mxu1 %v3911_v29  ;;  %3574 = vmatprep.mubr.bf16.mxu0 %v3912_v30  ;;  %v3975_v30 = vld [vmem:[#allocation2 + $0x28] sm:$0xff]  }
  0x8f   : > { %3606 = vmatprep.mubr.bf16.mxu1 %v3913_v31  ;;  %v3977_v31 = vld [vmem:[%s4522_s1 + $0x210] sm:$0xff]  }
  0x90   : > { %3621 = vmatpush3.bf16.msra.mxu0 %v3910_v28  ;;  %v3974_v28 = vld [vmem:[#allocation2 + $0x30] sm:$0xff]  }
  0x91   : > { %3653 = vmatpush3.bf16.msra.mxu1 %v3911_v29  ;;  %3622 = vmatprep.subr.bf16.mxu0 %v3916_v33  ;;  %v3976_v29 = vld [vmem:[%s4522_s1 + $0x218] sm:$0xff]  }
  0x92   : > { %3654 = vmatprep.subr.bf16.mxu1 %v3917_v34 }
  0x93   : > { %3575 = vmatmul.mubr.bf16.gmra.mxu0 %v3914_v32  ;;  %v3978_v32 = vld [vmem:[#allocation2 + $0x38] sm:$0xff]  }
  0x94   : > { %3607 = vmatmul.mubr.bf16.gmra.mxu1 %v3915_v35  ;;  %3623 = vmatpush3.bf16.msra.mxu0 %v3916_v33  ;;  %v3979_v33 = vld [vmem:[#allocation2 + $0x30] sm:$0xff]   ;;  %v3980_v35 = vld [vmem:[#allocation2 + $0x40] sm:$0xff]  }
  0x95   : > { %3655 = vmatpush3.bf16.msra.mxu1 %v3917_v34  ;;  %3624 = vmatprep.subr.bf16.mxu0 %v3918_v36  ;;  %v3982_v34 = vld [vmem:[%s4522_s1 + $0x208] sm:$0xff]  }
  0x96   : > { %3656 = vmatprep.subr.bf16.mxu1 %v3919_v37  ;;  %3578 = vmatprep.mubr.bf16.mxu0 %v3920_v38  ;;  %v3984_v38 = vld [vmem:[#allocation2 + $0x10] sm:$0xff]  }
  0x97   : > { %3610 = vmatprep.mubr.bf16.mxu1 %v3921_v39  ;;  %v3985_v39 = vld [vmem:[#allocation2 + $0x18] sm:$0xff]  }
  0x98   : > { %3625 = vmatpush3.bf16.msra.mxu0 %v3918_v36  ;;  %v3981_v36 = vld [vmem:[#allocation2 + $0x38] sm:$0xff]  }
  0x99   : > { %3657 = vmatpush3.bf16.msra.mxu1 %v3919_v37  ;;  %3626 = vmatprep.subr.bf16.mxu0 %v3924_v41  ;;  %v3983_v37 = vld [vmem:[%s4522_s1 + $0x200] sm:$0xff]  }
  0x9a   : > { %3658 = vmatprep.subr.bf16.mxu1 %v3925_v42 }
  0x9b   : > { %3579 = vmatmul.mubr.bf16.gmra.mxu0 %v3922_v40  ;;  %v3986_v40 = vld [vmem:[#allocation2 + $0x20] sm:$0xff]  }
  0x9c   : > { %3611 = vmatmul.mubr.bf16.gmra.mxu1 %v3923_v43  ;;  %3627 = vmatpush3.bf16.msra.mxu0 %v3924_v41  ;;  %v3987_v41 = vld [vmem:[#allocation2 + $0x28] sm:$0xff]   ;;  %v3989_v43 = vld [vmem:[#allocation2 + $0x38] sm:$0xff]  }
  0x9d   : > { %3659 = vmatpush3.bf16.msra.mxu1 %v3925_v42  ;;  %3628 = vmatprep.subr.bf16.mxu0 %v3926_v44  ;;  %v3988_v42 = vld [vmem:[#allocation2 + $0x30] sm:$0xff]  }
  0x9e   : > { %3660 = vmatprep.subr.bf16.mxu1 %v3927_v45  ;;  %3630 = vmatprep.mubr.bf16.mxu0 %v3928_v46  ;;  %v3992_v46 = vld [vmem:[%s4523_s2 + $0x38] sm:$0xff]  }
  0x9f   : > { %3662 = vmatprep.mubr.bf16.mxu1 %v3929_v47  ;;  %v3993_v47 = vld [vmem:[%s4523_s2 + $0x30] sm:$0xff]  }
  0xa0   : > { %3629 = vmatpush3.bf16.msra.mxu0 %v3926_v44  ;;  %v3990_v44 = vld [vmem:[#allocation2 + $0x40] sm:$0xff]  }
  0xa1   : > { %3661 = vmatpush3.bf16.msra.mxu1 %v3927_v45  ;;  %3678 = vmatprep.subr.bf16.mxu0 %v3932_v49  ;;  %v3991_v45 = vld [vmem:[#allocation2 + $0x48] sm:$0xff]  }
  0xa2   : > { %3710 = vmatprep.subr.bf16.mxu1 %v3933_v50 }
  0xa3   : > { %3631 = vmatmul.mubr.bf16.vlgmr.msra.gmra.mxu0 %v3930_v48 }
  0xa4   : > { %3663 = vmatmul.mubr.bf16.vlgmr.msra.gmra.mxu1 %v3931_v51  ;;  %3679 = vmatpush3.bf16.msra.mxu0 %v3932_v49 }
  0xa5   : > { %3711 = vmatpush3.bf16.msra.mxu1 %v3933_v50  ;;  %3680 = vmatprep.subr.bf16.mxu0 %v3934_v52 }
  0xa6   : > { %3712 = vmatprep.subr.bf16.mxu1 %v3935_v53  ;;  %3634 = vmatprep.mubr.bf16.mxu0 %v3936_v54 }
  0xa7   : > { %3666 = vmatprep.mubr.bf16.mxu1 %v3937_v55 }
  0xa8   : > { %3681 = vmatpush3.bf16.msra.mxu0 %v3934_v52  ;;  %v3994_v52 = vld [vmem:[%s4523_s2 + $0x28] sm:$0xff]  }
  0xa9   : > { %3713 = vmatpush3.bf16.msra.mxu1 %v3935_v53  ;;  %3682 = vmatprep.subr.bf16.mxu0 %v3940_v57 }
  0xaa   : > { %3714 = vmatprep.subr.bf16.mxu1 %v3941_v58 }
  0xab   : > { %3635 = vmatmul.mubr.bf16.gmra.mxu0 %v3938_v56 }
  0xac   : > { %3667 = vmatmul.mubr.bf16.gmra.mxu1 %v3939_v59  ;;  %3683 = vmatpush3.bf16.msra.mxu0 %v3940_v57  ;;  %v3995_v57 = vld [vmem:[%s4523_s2 + $0x20] sm:$0xff]  }
  0xad   : > { %3715 = vmatpush3.bf16.msra.mxu1 %v3941_v58  ;;  %3684 = vmatprep.subr.bf16.mxu0 %v3942_v60 }
  0xae   : > { %3716 = vmatprep.subr.bf16.mxu1 %v3943_v61  ;;  %3638 = vmatprep.mubr.bf16.mxu0 %v3944_v62  ;;  %v3996_v62 = vld [vmem:[%s4523_s2 + $0x18] sm:$0xff]  }
  0xaf   : > { %3670 = vmatprep.mubr.bf16.mxu1 %v3945_v63 }
  0xb0   : > { %3685 = vmatpush3.bf16.msra.mxu0 %v3942_v60 }
  0xb1   : > { %3717 = vmatpush3.bf16.msra.mxu1 %v3943_v61  ;;  %3686 = vmatprep.subr.bf16.mxu0 %v3948_v1 }
  0xb2   : > { %3718 = vmatprep.subr.bf16.mxu1 %v3949_v2 }
  0xb3   : > { %3639 = vmatmul.mubr.bf16.gmra.mxu0 %v3946_v0 }
  0xb4   : > { %3671 = vmatmul.mubr.bf16.gmra.mxu1 %v3947_v3  ;;  %3687 = vmatpush3.bf16.msra.mxu0 %v3948_v1  ;;  %v3997_v3 = vld [vmem:[%s4523_s2 + $0x10] sm:$0xff]  }
  0xb5   : > { %3719 = vmatpush3.bf16.msra.mxu1 %v3949_v2  ;;  %3688 = vmatprep.subr.bf16.mxu0 %v3950_v4 }
  0xb6   : > { %3720 = vmatprep.subr.bf16.mxu1 %v3951_v5  ;;  %3642 = vmatprep.mubr.bf16.mxu0 %v3952_v6 }
  0xb7   : > { %3674 = vmatprep.mubr.bf16.mxu1 %v3953_v7 }
  0xb8   : > { %3689 = vmatpush3.bf16.msra.mxu0 %v3950_v4 }
  0xb9   : > { %3721 = vmatpush3.bf16.msra.mxu1 %v3951_v5  ;;  %3690 = vmatprep.subr.bf16.mxu0 %v3956_v9 }
  0xba   : > { %3722 = vmatprep.subr.bf16.mxu1 %v3957_v10 }
  0xbb   : > { %3643 = vmatmul.mubr.bf16.gmra.mxu0 %v3954_v8  ;;  %v3998_v8 = vld [vmem:[%s4523_s2 + $0x8] sm:$0xff]  }
  0xbc   : > { %3675 = vmatmul.mubr.bf16.gmra.mxu1 %v3955_v11  ;;  %3691 = vmatpush3.bf16.msra.mxu0 %v3956_v9 }
  0xbd   : > { %3723 = vmatpush3.bf16.msra.mxu1 %v3957_v10  ;;  %3692 = vmatprep.subr.bf16.mxu0 %v3958_v12 }
  0xbe   : > { %3724 = vmatprep.subr.bf16.mxu1 %v3959_v13  ;;  %3694 = vmatprep.mubr.bf16.mxu0 %v3960_v14 }
  0xbf   : > { %3726 = vmatprep.mubr.bf16.mxu1 %v3961_v15 }
  0xc0   : > { %3693 = vmatpush3.bf16.msra.mxu0 %v3958_v12 }
  0xc1   : > { %3725 = vmatpush3.bf16.msra.mxu1 %v3959_v13  ;;  %3742 = vmatprep.subr.bf16.mxu0 %v3964_v16  ;;  %v3999_v13 = vld [vmem:[%s4523_s2] sm:$0xff]  }
  0xc2   : > { %3774 = vmatprep.subr.bf16.mxu1 %v3992_v46 }
  0xc3   : > { %3695 = vmatmul.mubr.bf16.vlgmr.msra.gmra.mxu0 %v3962_v17 }
  0xc4   : > { %3727 = vmatmul.mubr.bf16.vlgmr.msra.gmra.mxu1 %v3963_v18  ;;  %3743 = vmatpush3.bf16.msra.mxu0 %v3964_v16 }
  0xc5   : > { %3744 = vmatprep.subr.bf16.mxu0 %v3965_v19  ;;  %3698 = vmatprep.mubr.bf16.mxu0 %v3966_v20 }
  0xc6   : > { %3730 = vmatprep.mubr.bf16.mxu1 %v3967_v21  ;;  %3775 = vmatpush3.bf16.msra.mxu1 %v3992_v46 }
  0xc7   : > { %3776 = vmatprep.subr.bf16.mxu1 %v3993_v47 }
  0xc8   : > { %3745 = vmatpush3.bf16.msra.mxu0 %v3965_v19 }
  0xc9   : > { %3746 = vmatprep.subr.bf16.mxu0 %v3970_v22 }
  0xca   : > { %3777 = vmatpush3.bf16.msra.mxu1 %v3993_v47 }
  0xcb   : > { %3699 = vmatmul.mubr.bf16.gmra.mxu0 %v3968_v23  ;;  %3778 = vmatprep.subr.bf16.mxu1 %v3994_v52 }
  0xcc   : > { %3731 = vmatmul.mubr.bf16.gmra.mxu1 %v3969_v24  ;;  %3747 = vmatpush3.bf16.msra.mxu0 %v3970_v22 }
  0xcd   : > { %3748 = vmatprep.subr.bf16.mxu0 %v3971_v25  ;;  %3702 = vmatprep.mubr.bf16.mxu0 %v3972_v26 }
  0xce   : > { %3734 = vmatprep.mubr.bf16.mxu1 %v3973_v27  ;;  %3779 = vmatpush3.bf16.msra.mxu1 %v3994_v52 }
  0xcf   : > { %3780 = vmatprep.subr.bf16.mxu1 %v3995_v57 }
  0xd0   : > { %3749 = vmatpush3.bf16.msra.mxu0 %v3971_v25 }
  0xd1   : > { %3750 = vmatprep.subr.bf16.mxu0 %v3976_v29 }
  0xd2   : > { %3781 = vmatpush3.bf16.msra.mxu1 %v3995_v57 }
  0xd3   : > { %3703 = vmatmul.mubr.bf16.gmra.mxu0 %v3974_v28  ;;  %3782 = vmatprep.subr.bf16.mxu1 %v3996_v62 }
  0xd4   : > { %3735 = vmatmul.mubr.bf16.gmra.mxu1 %v3975_v30  ;;  %3751 = vmatpush3.bf16.msra.mxu0 %v3976_v29 }
  0xd5   : > { %3752 = vmatprep.subr.bf16.mxu0 %v3977_v31  ;;  %3706 = vmatprep.mubr.bf16.mxu0 %v3978_v32 }
  0xd6   : > { %3738 = vmatprep.mubr.bf16.mxu1 %v3979_v33  ;;  %3783 = vmatpush3.bf16.msra.mxu1 %v3996_v62 }
  0xd7   : > { %3784 = vmatprep.subr.bf16.mxu1 %v3997_v3 }
  0xd8   : > { %3753 = vmatpush3.bf16.msra.mxu0 %v3977_v31 }
  0xd9   : > { %3754 = vmatprep.subr.bf16.mxu0 %v3982_v34 }
  0xda   : > { %3785 = vmatpush3.bf16.msra.mxu1 %v3997_v3 }
  0xdb   : > { %3707 = vmatmul.mubr.bf16.gmra.mxu0 %v3980_v35  ;;  %3786 = vmatprep.subr.bf16.mxu1 %v3998_v8 }
  0xdc   : > { %3739 = vmatmul.mubr.bf16.gmra.mxu1 %v3981_v36  ;;  %3755 = vmatpush3.bf16.msra.mxu0 %v3982_v34 }
  0xdd   : > { %3756 = vmatprep.subr.bf16.mxu0 %v3983_v37  ;;  %3758 = vmatprep.mubr.bf16.mxu0 %v3984_v38 }
  0xde   : > { %3787 = vmatpush3.bf16.msra.mxu1 %v3998_v8 }
  0xdf   : > { %3788 = vmatprep.subr.bf16.mxu1 %v3999_v13 }
  0xe0   : > { %3757 = vmatpush3.bf16.msra.mxu0 %v3983_v37 }
  0xe2   : > { %3789 = vmatpush3.bf16.msra.mxu1 %v3999_v13 }
  0xe3   : > { %3759 = vmatmul.mubr.bf16.vlgmr.msra.gmra.mxu0 %v3985_v39 }
  0xe4   : > { %3762 = vmatprep.mubr.bf16.mxu0 %v3986_v40 }
  0xeb   : > { %3763 = vmatmul.mubr.bf16.gmra.mxu0 %v3987_v41 }
  0xec   : > { %3766 = vmatprep.mubr.bf16.mxu0 %v3988_v42 }
  0xf3   : > { %3767 = vmatmul.mubr.bf16.gmra.mxu0 %v3989_v43 }
  0xf4   : > { %3770 = vmatprep.mubr.bf16.mxu0 %v3990_v44 }
  0xfb   : > { %3771 = vmatmul.mubr.bf16.gmra.mxu0 %v3991_v45 }
 0x123   : > { %v3504_v48 = vpop.f32.mrf.mxu0 }
 0x124   : > { %v3536_v49 = vpop.f32.mrf.mxu1 }
 0x125   : > { %v605_v50 = vpop.f32.mrf.mxu0  ;;  %v807_v21 = vadd.f32 %v3536_v49, %v3504_v48 }
 0x126   : > { %v798_v51 = vpop.f32.mrf.mxu1 }
 0x127   : > { %v3505_v53 = vpop.f32.mrf.mxu0  ;;  %v799_v24 = vadd.f32 %v798_v51, %v605_v50 }
 0x128   : > { %v3537_v54 = vpop.f32.mrf.mxu1 }
 0x129   : > { %v608_v55 = vpop.f32.mrf.mxu0  ;;  %v810_v28 = vadd.f32 %v3537_v54, %v3505_v53 }
 0x12a   : > { %v801_v56 = vpop.f32.mrf.mxu1 }
 0x12b   : > { %v3508_v58 = vpop.f32.mrf.mxu0  ;;  %v802_v32 = vadd.f32 %v801_v56, %v608_v55 }
 0x12c   : > { %v3540_v59 = vpop.f32.mrf.mxu1 }
 0x12d   : > { %v621_v60 = vpop.f32.mrf.mxu0  ;;  %v823_v36 = vadd.f32 %v3540_v59, %v3508_v58 }
 0x12e   : > { %v814_v61 = vpop.f32.mrf.mxu1 }
 0x12f   : > { %v3509_v63 = vpop.f32.mrf.mxu0  ;;  %v815_v40 = vadd.f32 %v814_v61, %v621_v60 }
 0x130   : > { %v3541_v0 = vpop.f32.mrf.mxu1 }
 0x131   : > { %v624_v1 = vpop.f32.mrf.mxu0  ;;  %v826_v44 = vadd.f32 %v3541_v0, %v3509_v63 }
 0x132   : > { %v817_v2 = vpop.f32.mrf.mxu1 }
 0x133   : > { %v3512_v4 = vpop.f32.mrf.mxu0  ;;  %v818_v48 = vadd.f32 %v817_v2, %v624_v1 }
 0x134   : > { %v3544_v5 = vpop.f32.mrf.mxu1 }
 0x135   : > { %v637_v6 = vpop.f32.mrf.mxu0  ;;  %v839_v52 = vadd.f32 %v3544_v5, %v3512_v4 }
 0x136   : > { %v830_v7 = vpop.f32.mrf.mxu1 }
 0x137   : > { %v4374_v9 = vpop.f32.mrf.mxu0  ;;  %v831_v56 = vadd.f32 %v830_v7, %v637_v6 }
 0x138   : > { %v3545_v10 = vpop.f32.mrf.mxu1 }
 0x139   : > { %v4376_v11 = vpop.f32.mrf.mxu0  ;;  %v842_v60 = vadd.f32 %v3545_v10, %v4374_v9 }
 0x13a   : > { %v4378_v12 = vpop.f32.mrf.mxu1 }
 0x13b   : > { %v4383_v14 = vpop.f32.mrf.mxu0  ;;  %v834_v0 = vadd.f32 %v4378_v12, %v4376_v11 }
 0x13c   : > { %v4385_v15 = vpop.f32.mrf.mxu1 }
 0x13d   : > { %v4387_v16 = vpop.f32.mrf.mxu0  ;;  %v855_v4 = vadd.f32 %v4385_v15, %v4383_v14 }
 0x13e   : > { %v4389_v17 = vpop.f32.mrf.mxu1 }
 0x13f   : > { %v4391_v18 = vpop.f32.mrf.mxu0  ;;  %v847_v8 = vadd.f32 %v4389_v17, %v4387_v16 }
 0x140   : > { %v4393_v19 = vpop.f32.mrf.mxu1 }
 0x141   : > { %v4395_v20 = vpop.f32.mrf.mxu0  ;;  %v858_v12 = vadd.f32 %v4393_v19, %v4391_v18 }
 0x142   : > { %v4397_v22 = vpop.f32.mrf.mxu1 }
 0x143   : > { %v3568_v23 = vpop.f32.mrf.mxu0  ;;  %v850_v15 = vadd.f32 %v4397_v22, %v4395_v20 }
 0x144   : > { %v1090_v25 = vadd.f32 %v3568_v23, %v807_v21  ;;  %v4399_v26 = vpop.f32.mrf.mxu1 }
 0x145   : > { %v1025_v27 = vpop.f32.mrf.mxu0 }
 0x146   : > { %1106 = vst [vmem:[#allocation3 + $0x10] sm:$0xff] %v1090_v25  ;;  %v1088_v29 = vadd.f32 %v1025_v27, %v799_v24  ;;  %v4401_v30 = vpop.f32.mrf.mxu1 }
 0x147   : > { %v3569_v31 = vpop.f32.mrf.mxu0 }
 0x148   : > { %1104 = vst [vmem:[#allocation3] sm:$0xff] %v1088_v29  ;;  %v1091_v33 = vadd.f32 %v3569_v31, %v810_v28  ;;  %v4403_v34 = vpop.f32.mrf.mxu1 }
 0x149   : > { %v1028_v35 = vpop.f32.mrf.mxu0 }
 0x14a   : > { %1107 = vst [vmem:[#allocation3 + $0x18] sm:$0xff] %v1091_v33  ;;  %v1089_v37 = vadd.f32 %v1028_v35, %v802_v32  ;;  %v4405_v38 = vpop.f32.mrf.mxu1 }
 0x14b   : > { %v3572_v39 = vpop.f32.mrf.mxu0 }
 0x14c   : > { %1105 = vst [vmem:[#allocation3 + $0x8] sm:$0xff] %v1089_v37  ;;  %v1094_v41 = vadd.f32 %v3572_v39, %v823_v36  ;;  %v4407_v42 = vpop.f32.mrf.mxu1 }
 0x14d   : > { %v1041_v43 = vpop.f32.mrf.mxu0 }
 0x14e   : > { %1110 = vst [vmem:[#allocation3 + $0x30] sm:$0xff] %v1094_v41  ;;  %v1092_v45 = vadd.f32 %v1041_v43, %v815_v40  ;;  %v4409_v46 = vpop.f32.mrf.mxu1 }
 0x14f   : > { %v3573_v47 = vpop.f32.mrf.mxu0 }
 0x150   : > { %1108 = vst [vmem:[#allocation3 + $0x20] sm:$0xff] %v1092_v45  ;;  %v1095_v49 = vadd.f32 %v3573_v47, %v826_v44  ;;  %v4411_v50 = vpop.f32.mrf.mxu1 }
 0x151   : > { %v1044_v51 = vpop.f32.mrf.mxu0  ;;  %v1815_v20 = vld [vmem:[#allocation3 + $0x11] sm:$0xff]  ;;  %v1816_v45 = vld [vmem:[#allocation3 + $0x19] sm:$0x7f] }
 0x152   : > { %1111 = vst [vmem:[#allocation3 + $0x38] sm:$0xff] %v1095_v49  ;;  %v1093_v53 = vadd.f32 %v1044_v51, %v818_v48  ;;  %v4413_v54 = vpop.f32.mrf.mxu1 }
 0x153   : > { %v3576_v55 = vpop.f32.mrf.mxu0  ;;  %v1813_v39 = vld [vmem:[#allocation3 + $0x1] sm:$0xff] }
 0x154   : > { %1109 = vst [vmem:[#allocation3 + $0x28] sm:$0xff] %v1093_v53  ;;  %v1098_v57 = vadd.f32 %v3576_v55, %v839_v52  ;;  %v4415_v58 = vpop.f32.mrf.mxu1  ;;  %v1814_v52 = vld [vmem:[#allocation3 + $0x9] sm:$0x7f] }
 0x155   : > { %v1057_v59 = vpop.f32.mrf.mxu0 }
 0x156   : > { %1114 = vst [vmem:[#allocation3 + $0x50] sm:$0xff] %v1098_v57  ;;  %v1096_v61 = vadd.f32 %v1057_v59, %v831_v56  ;;  %v4418_v62 = vpop.f32.mrf.mxu1 }
 0x157   : > { %v3577_v63 = vpop.f32.mrf.mxu0 }
 0x158   : > { %1112 = vst [vmem:[#allocation3 + $0x40] sm:$0xff] %v1096_v61  ;;  %v1099_v1 = vadd.f32 %v3577_v63, %v842_v60  ;;  %v4422_v2 = vpop.f32.mrf.mxu1 }
 0x159   : > { %v1060_v3 = vpop.f32.mrf.mxu0  ;;  %v1819_v59 = vld [vmem:[#allocation3 + $0x31] sm:$0xff] }
 0x15a   : > { %1115 = vst [vmem:[#allocation3 + $0x58] sm:$0xff] %v1099_v1  ;;  %v1097_v5 = vadd.f32 %v1060_v3, %v834_v0  ;;  %v4426_v6 = vpop.f32.mrf.mxu1 }
 0x15b   : > { %v3580_v7 = vpop.f32.mrf.mxu0  ;;  %v1817_v1 = vld [vmem:[#allocation3 + $0x21] sm:$0xff] }
 0x15c   : > { %1113 = vst [vmem:[#allocation3 + $0x48] sm:$0xff] %v1097_v5  ;;  %v1102_v9 = vadd.f32 %v3580_v7, %v855_v4  ;;  %v4430_v10 = vpop.f32.mrf.mxu1 }
 0x15d   : > { %v1073_v11 = vpop.f32.mrf.mxu0 }
 0x15e   : > { %1118 = vst [vmem:[#allocation3 + $0x70] sm:$0xff] %v1102_v9  ;;  %v1100_v13 = vadd.f32 %v1073_v11, %v847_v8  ;;  %v4434_v21 = vpop.f32.mrf.mxu1  ;;  %v1820_v8 = vld [vmem:[#allocation3 + $0x39] sm:$0x7f] }
 0x15f   : > { %v3581_v14 = vpop.f32.mrf.mxu0 }
 0x160   : > { %1116 = vst [vmem:[#allocation3 + $0x60] sm:$0xff] %v1100_v13  ;;  %v1103_v23 = vadd.f32 %v3581_v14, %v858_v12  ;;  %v4438_v24 = vpop.f32.mrf.mxu1  ;;  %v1818_v14 = vld [vmem:[#allocation3 + $0x29] sm:$0x7f] }
 0x161   : > { %v1076_v16 = vpop.f32.mrf.mxu0 }
 0x162   : > { %1119 = vst [vmem:[#allocation3 + $0x78] sm:$0xff] %v1103_v23  ;;  %v1101_v17 = vadd.f32 %v1076_v16, %v850_v15  ;;  %v4440_v25 = vpop.f32.mrf.mxu1 }
 0x163   : > { %v3632_v27 = vpop.f32.mrf.mxu0 }
 0x164   : > { %1117 = vst [vmem:[#allocation3 + $0x68] sm:$0xff] %v1101_v17  ;;  %v1517_v18 = vadd.f32 %v3632_v27, %v4399_v26  ;;  %v3664_v19 = vpop.f32.mrf.mxu1  ;;  %v1823_v27 = vld [vmem:[#allocation3 + $0x51] sm:$0xff] }
 0x165   : > { %v1508_v28 = vpop.f32.mrf.mxu0 }
 0x166   : > { %v1799_v29 = vadd.f32 %v3664_v19, %v1517_v18  ;;  %v1509_v31 = vadd.f32 %v1508_v28, %v4401_v30  ;;  %v1734_v32 = vpop.f32.mrf.mxu1 }
 0x167   : > { %v3633_v22 = vpop.f32.mrf.mxu0 }
 0x168   : > { %v1831_v33 = vadd.f32 %v1815_v20, %v1799_v29  ;;  %v1797_v35 = vadd.f32 %v1734_v32, %v1509_v31  ;;  %v1520_v36 = vadd.f32 %v3633_v22, %v4403_v34  ;;  %v3665_v37 = vpop.f32.mrf.mxu1  ;;  %v1821_v31 = vld [vmem:[#allocation3 + $0x41] sm:$0xff] }
 0x169   : > { %v1511_v40 = vpop.f32.mrf.mxu0 }
 0x16a   : > { %1847 = vst [vmem:[#allocation3 + $0x11] sm:$0xff] %v1831_v33  ;;  %v1829_v41 = vadd.f32 %v1813_v39, %v1797_v35  ;;  %v1800_v43 = vadd.f32 %v3665_v37, %v1520_v36  ;;  %v1512_v26 = vadd.f32 %v1511_v40, %v4405_v38  ;;  %v1737_v44 = vpop.f32.mrf.mxu1  ;;  %v1824_v35 = vld [vmem:[#allocation3 + $0x59] sm:$0x7f] }
 0x16b   : > { %v3636_v47 = vpop.f32.mrf.mxu0 }
 0x16c   : > { %1845 = vst [vmem:[#allocation3 + $0x1] sm:$0xff] %v1829_v41  ;;  %v1832_v30 = vadd.f32 %v1816_v45, %v1800_v43  ;;  %v1798_v48 = vadd.f32 %v1737_v44, %v1512_v26  ;;  %v1533_v49 = vadd.f32 %v3636_v47, %v4407_v42  ;;  %v3668_v51 = vpop.f32.mrf.mxu1  ;;  %v1822_v41 = vld [vmem:[#allocation3 + $0x49] sm:$0x7f]  ;;  %v1827_v47 = vld [vmem:[#allocation3 + $0x71] sm:$0xff] }
 0x16d   : > { %v1524_v53 = vpop.f32.mrf.mxu0 }
 0x16e   : > { %1848 = vst [vmem:[#allocation3 + $0x19] sm:$0x7f] %v1832_v30  ;;  %v1830_v34 = vadd.f32 %v1814_v52, %v1798_v48  ;;  %v1803_v55 = vadd.f32 %v3668_v51, %v1533_v49  ;;  %v1525_v56 = vadd.f32 %v1524_v53, %v4409_v46  ;;  %v1750_v57 = vpop.f32.mrf.mxu1  ;;  %v1825_v52 = vld [vmem:[#allocation3 + $0x61] sm:$0xff] }
 0x16f   : > { %v3637_v60 = vpop.f32.mrf.mxu0 }
 0x170   : > { %1846 = vst [vmem:[#allocation3 + $0x9] sm:$0x7f] %v1830_v34  ;;  %v1835_v38 = vadd.f32 %v1819_v59, %v1803_v55  ;;  %v1801_v61 = vadd.f32 %v1750_v57, %v1525_v56  ;;  %v1536_v63 = vadd.f32 %v3637_v60, %v4411_v50  ;;  %v3669_v0 = vpop.f32.mrf.mxu1  ;;  %v1828_v57 = vld [vmem:[#allocation3 + $0x79] sm:$0x7f] }
 0x171   : > { %v1527_v3 = vpop.f32.mrf.mxu0 }
 0x172   : > { %1851 = vst [vmem:[#allocation3 + $0x31] sm:$0xff] %v1835_v38  ;;  %v1833_v42 = vadd.f32 %v1817_v1, %v1801_v61  ;;  %v1804_v4 = vadd.f32 %v3669_v0, %v1536_v63  ;;  %v1528_v5 = vadd.f32 %v1527_v3, %v4413_v54  ;;  %v1753_v7 = vpop.f32.mrf.mxu1  ;;  %v1826_v61 = vld [vmem:[#allocation3 + $0x69] sm:$0x7f] }
 0x173   : > { %v3640_v9 = vpop.f32.mrf.mxu0 }
 0x174   : > { %1849 = vst [vmem:[#allocation3 + $0x21] sm:$0xff] %v1833_v42  ;;  %v1836_v46 = vadd.f32 %v1820_v8, %v1804_v4  ;;  %v1802_v11 = vadd.f32 %v1753_v7, %v1528_v5  ;;  %v1549_v12 = vadd.f32 %v3640_v9, %v4415_v58  ;;  %v3672_v13 = vpop.f32.mrf.mxu1 }
 0x175   : > { %v1540_v15 = vpop.f32.mrf.mxu0 }
 0x176   : > { %1852 = vst [vmem:[#allocation3 + $0x39] sm:$0x7f] %v1836_v46  ;;  %v1834_v50 = vadd.f32 %v1818_v14, %v1802_v11  ;;  %v1807_v23 = vadd.f32 %v3672_v13, %v1549_v12  ;;  %v1541_v16 = vadd.f32 %v1540_v15, %v4418_v62  ;;  %v1766_v17 = vpop.f32.mrf.mxu1 }
 0x177   : > { %v3641_v18 = vpop.f32.mrf.mxu0 }
 0x178   : > { %1850 = vst [vmem:[#allocation3 + $0x29] sm:$0x7f] %v1834_v50  ;;  %v1839_v54 = vadd.f32 %v1823_v27, %v1807_v23  ;;  %v1805_v19 = vadd.f32 %v1766_v17, %v1541_v16  ;;  %v1552_v28 = vadd.f32 %v3641_v18, %v4422_v2  ;;  %v3673_v29 = vpop.f32.mrf.mxu1 }
 0x179   : > { %v1543_v32 = vpop.f32.mrf.mxu0 }
 0x17a   : > { %1855 = vst [vmem:[#allocation3 + $0x51] sm:$0xff] %v1839_v54  ;;  %v1837_v58 = vadd.f32 %v1821_v31, %v1805_v19  ;;  %v1808_v20 = vadd.f32 %v3673_v29, %v1552_v28  ;;  %v1544_v22 = vadd.f32 %v1543_v32, %v4426_v6  ;;  %v1769_v33 = vpop.f32.mrf.mxu1 }
 0x17b   : > { %v3644_v36 = vpop.f32.mrf.mxu0 }
 0x17c   : > { %1853 = vst [vmem:[#allocation3 + $0x41] sm:$0xff] %v1837_v58  ;;  %v1840_v62 = vadd.f32 %v1824_v35, %v1808_v20  ;;  %v1806_v37 = vadd.f32 %v1769_v33, %v1544_v22  ;;  %v1565_v39 = vadd.f32 %v3644_v36, %v4430_v10  ;;  %v3676_v40 = vpop.f32.mrf.mxu1 }
 0x17d   : > { %v1556_v43 = vpop.f32.mrf.mxu0 }
 0x17e   : > { %1856 = vst [vmem:[#allocation3 + $0x59] sm:$0x7f] %v1840_v62  ;;  %v1838_v2 = vadd.f32 %v1822_v41, %v1806_v37  ;;  %v1811_v26 = vadd.f32 %v3676_v40, %v1565_v39  ;;  %v1557_v44 = vadd.f32 %v1556_v43, %v4434_v21  ;;  %v1782_v45 = vpop.f32.mrf.mxu1  ;;  %v2558_v43 = vld [vmem:[#allocation3 + $0x18] sm:$0x7f] }
 0x17f   : > { %v3645_v30 = vpop.f32.mrf.mxu0 }
 0x180   : > { %1854 = vst [vmem:[#allocation3 + $0x49] sm:$0x7f] %v1838_v2  ;;  %v1843_v6 = vadd.f32 %v1827_v47, %v1811_v26  ;;  %v1809_v48 = vadd.f32 %v1782_v45, %v1557_v44  ;;  %v1568_v49 = vadd.f32 %v3645_v30, %v4438_v24  ;;  %v3677_v51 = vpop.f32.mrf.mxu1  ;;  %v2557_v44 = vld [vmem:[#allocation3 + $0x10] sm:$0xff] }
 0x181   : > { %v1559_v53 = vpop.f32.mrf.mxu0 }
 0x182   : > { %1859 = vst [vmem:[#allocation3 + $0x71] sm:$0xff] %v1843_v6  ;;  %v1841_v10 = vadd.f32 %v1825_v52, %v1809_v48  ;;  %v1812_v34 = vadd.f32 %v3677_v51, %v1568_v49  ;;  %v1560_v55 = vadd.f32 %v1559_v53, %v4440_v25  ;;  %v1785_v56 = vpop.f32.mrf.mxu1  ;;  %v2556_v51 = vld [vmem:[#allocation3 + $0x8] sm:$0x7f] }
 0x183   : > { %v3696_v59 = vpop.f32.mrf.mxu0 }
 0x184   : > { %1857 = vst [vmem:[#allocation3 + $0x61] sm:$0xff] %v1841_v10  ;;  %v1844_v21 = vadd.f32 %v1828_v57, %v1812_v34  ;;  %v1810_v60 = vadd.f32 %v1785_v56, %v1560_v55  ;;  %v3728_v38 = vpop.f32.mrf.mxu1  ;;  %v2555_v10 = vld [vmem:[#allocation3] sm:$0xff] }
 0x185   : > { %v2057_v63 = vpop.f32.mrf.mxu0  ;;  %v2259_v19 = vadd.f32 %v3728_v38, %v3696_v59 }
 0x186   : > { %1860 = vst [vmem:[#allocation3 + $0x79] sm:$0x7f] %v1844_v21  ;;  %v1842_v0 = vadd.f32 %v1826_v61, %v1810_v60  ;;  %v2250_v24 = vpop.f32.mrf.mxu1 }
 0x187   : > { %v3697_v1 = vpop.f32.mrf.mxu0  ;;  %v2251_v31 = vadd.f32 %v2250_v24, %v2057_v63 }
 0x188   : > { %1858 = vst [vmem:[#allocation3 + $0x69] sm:$0x7f] %v1842_v0  ;;  %v3729_v3 = vpop.f32.mrf.mxu1 }
 0x189   : > { %v2060_v42 = vpop.f32.mrf.mxu0  ;;  %v2262_v32 = vadd.f32 %v3729_v3, %v3697_v1 }
 0x18a   : > { %v2253_v5 = vpop.f32.mrf.mxu1 }
 0x18b   : > { %v3700_v4 = vpop.f32.mrf.mxu0  ;;  %v2254_v22 = vadd.f32 %v2253_v5, %v2060_v42  ;;  %v2562_v42 = vld [vmem:[#allocation3 + $0x38] sm:$0x7f] }
 0x18c   : > { %v3732_v8 = vpop.f32.mrf.mxu1 }
 0x18d   : > { %v2073_v7 = vpop.f32.mrf.mxu0  ;;  %v2275_v41 = vadd.f32 %v3732_v8, %v3700_v4 }
 0x18e   : > { %v2266_v11 = vpop.f32.mrf.mxu1 }
 0x18f   : > { %v3701_v25 = vpop.f32.mrf.mxu0  ;;  %v2267_v6 = vadd.f32 %v2266_v11, %v2073_v7  ;;  %v2561_v7 = vld [vmem:[#allocation3 + $0x30] sm:$0xff] }
 0x190   : > { %v3733_v14 = vpop.f32.mrf.mxu1 }
 0x191   : > { %v2076_v9 = vpop.f32.mrf.mxu0  ;;  %v2278_v53 = vadd.f32 %v3733_v14, %v3701_v25 }
 0x192   : > { %v2269_v23 = vpop.f32.mrf.mxu1 }
 0x193   : > { %v3704_v46 = vpop.f32.mrf.mxu0  ;;  %v2270_v21 = vadd.f32 %v2269_v23, %v2076_v9 }
 0x194   : > { %v3736_v27 = vpop.f32.mrf.mxu1 }
 0x195   : > { %v4458_v12 = vpop.f32.mrf.mxu0  ;;  %v2291_v3 = vadd.f32 %v3736_v27, %v3704_v46  ;;  %v2559_v46 = vld [vmem:[#allocation3 + $0x20] sm:$0xff] }
 0x196   : > { %v2282_v28 = vpop.f32.mrf.mxu1 }
 0x197   : > { %v4460_v13 = vpop.f32.mrf.mxu0  ;;  %v2283_v9 = vadd.f32 %v2282_v28, %v4458_v12 }
 0x198   : > { %v3737_v36 = vpop.f32.mrf.mxu1 }
 0x199   : > { %v4462_v15 = vpop.f32.mrf.mxu0 }
 0x19a   : > { %v2285_v48 = vpop.f32.mrf.mxu1 }
 0x19b   : > { %v4464_v50 = vpop.f32.mrf.mxu0  ;;  %v2286_v28 = vadd.f32 %v2285_v48, %v4462_v15 }
 0x19c   : > { %v3740_v61 = vpop.f32.mrf.mxu1 }
 0x19d   : > { %v4466_v16 = vpop.f32.mrf.mxu0 }
 0x19e   : > { %v2298_v14 = vpop.f32.mrf.mxu1 }
 0x19f   : > { %v4468_v17 = vpop.f32.mrf.mxu0 }
 0x1a1   : > { %v4470_v18 = vpop.f32.mrf.mxu0 }
 0x1a3   : > { %v3760_v54 = vpop.f32.mrf.mxu0 }
 0x1a4   : > { %v2541_v58 = vadd.f32 %v3760_v54, %v2259_v19  ;;  %v2560_v54 = vld [vmem:[#allocation3 + $0x28] sm:$0x7f] }
 0x1a5   : > { %v2476_v29 = vpop.f32.mrf.mxu0 }
 0x1a6   : > { %v2539_v33 = vadd.f32 %v2476_v29, %v2251_v31  ;;  %v2591_v37 = vrot.slane %v2541_v58, 1 }
 0x1a7   : > { %v3761_v20 = vpop.f32.mrf.mxu0 }
 0x1a8   : > { %v2542_v35 = vadd.f32 %v3761_v20, %v2262_v32  ;;  %v2588_v26 = vrot.slane %v2539_v33, 1  ;;  %v2294_v32 = vadd.f32 %v3737_v36, %v4460_v13 }
 0x1a9   : > { %v2479_v62 = vpop.f32.mrf.mxu0 }
 0x1aa   : > { %v2592_v39 = vrot.slane %v2542_v35, 1  ;;  %v2540_v40 = vadd.f32 %v2479_v62, %v2254_v22 }
 0x1ab   : > { %v3764_v2 = vpop.f32.mrf.mxu0 }
 0x1ac   : > { %v2593_v45 = vsel %vm2587_vm0, %v2591_v37, %v2592_v39  ;;  %v2631_v47 = vadd.f32 %v2592_v39, %v2558_v43  ;;  %v2589_v30 = vrot.slane %v2540_v40, 1  ;;  %v2545_v56 = vadd.f32 %v3764_v2, %v2275_v41  ;;  %v3741_v41 = vpop.f32.mrf.mxu1 }
 0x1ad   : > { %v2630_v49 = vadd.f32 %v2593_v45, %v2557_v44  ;;  %v2492_v52 = vpop.f32.mrf.mxu0  ;;  %v2307_v45 = vadd.f32 %v3740_v61, %v4464_v50 }
 0x1ae   : > { %2647 = vst [vmem:[#allocation3 + $0x18] sm:$0x7f] %v2631_v47  ;;  %v2590_v34 = vsel %vm2587_vm0, %v2588_v26, %v2589_v30  ;;  %v2629_v55 = vadd.f32 %v2589_v30, %v2556_v51  ;;  %v2543_v60 = vadd.f32 %v2492_v52, %v2267_v6  ;;  %v2597_v0 = vrot.slane %v2545_v56, 1  ;;  %v2566_v30 = vld [vmem:[#allocation3 + $0x58] sm:$0x7f]  ;;  %v2565_v51 = vld [vmem:[#allocation3 + $0x50] sm:$0xff] }
 0x1af   : > { %2646 = vst [vmem:[#allocation3 + $0x10] sm:$0xff] %v2630_v49  ;;  %v2628_v57 = vadd.f32 %v2590_v34, %v2555_v10  ;;  %v3765_v59 = vpop.f32.mrf.mxu0  ;;  %v2678_v20 = vmul.f32 0.999995, %v2630_v49  ;;  %v2299_v47 = vadd.f32 %v2298_v14, %v4466_v16  ;;  %v2301_v34 = vpop.f32.mrf.mxu1  ;;  %v2564_v56 = vld [vmem:[#allocation3 + $0x48] sm:$0x7f]  ;;  %v2310_v16 = vadd.f32 %v3741_v41, %v4468_v17 }
 0x1b0   : > { %2645 = vst [vmem:[#allocation3 + $0x8] sm:$0x7f] %v2629_v55  ;;  %v2546_v38 = vadd.f32 %v3765_v59, %v2278_v53  ;;  %v2594_v5 = vrot.slane %v2543_v60, 1 }
 0x1b1   : > { %2644 = vst [vmem:[#allocation3] sm:$0xff] %v2628_v57  ;;  %v2495_v63 = vpop.f32.mrf.mxu0  ;;  %v2676_v62 = vmul.f32 0.999995, %v2628_v57  ;;  %v2694_v15 = vmax.f32 %v2678_v20, 0.0 }
 0x1b2   : > { %v2598_v24 = vrot.slane %v2546_v38, 1  ;;  %v2544_v1 = vadd.f32 %v2495_v63, %v2270_v21  ;;  %v2563_v38 = vld [vmem:[#allocation3 + $0x40] sm:$0xff] }
 0x1b3   : > { %v3768_v4 = vpop.f32.mrf.mxu0  ;;  %v2692_v49 = vmax.f32 %v2676_v62, 0.0 }
 0x1b4   : > { %v2599_v25 = vsel %vm2587_vm0, %v2597_v0, %v2598_v24  ;;  %v2635_v8 = vadd.f32 %v2598_v24, %v2562_v42  ;;  %v2595_v11 = vrot.slane %v2544_v1, 1  ;;  %v2549_v19 = vadd.f32 %v3768_v4, %v2291_v3 }
 0x1b5   : > { %v2634_v23 = vadd.f32 %v2599_v25, %v2561_v7  ;;  %v2508_v29 = vpop.f32.mrf.mxu0  ;;  %v2663_v31 = vld [vmem:[#allocation3 + $0x18] sm:$0xff]  ;;  %v2302_v7 = vadd.f32 %v2301_v34, %v4470_v18 }
 0x1b6   : > { %2651 = vst [vmem:[#allocation3 + $0x38] sm:$0x7f] %v2635_v8  ;;  %v2596_v27 = vsel %vm2587_vm0, %v2594_v5, %v2595_v11  ;;  %v2633_v58 = vadd.f32 %v2595_v11, %v2560_v54  ;;  %v2679_v12 = vmul.f32 0.999995, %v2663_v31  ;;  %v2547_v37 = vadd.f32 %v2508_v29, %v2283_v9 }
 0x1b7   : > { %2650 = vst [vmem:[#allocation3 + $0x30] sm:$0xff] %v2634_v23  ;;  %v2632_v22 = vadd.f32 %v2596_v27, %v2559_v46  ;;  %v3769_v33 = vpop.f32.mrf.mxu0  ;;  %v2661_v35 = vld [vmem:[#allocation3 + $0x8] sm:$0xff]  ;;  %v2603_v13 = vrot.slane %v2549_v19, 1  ;;  %v2682_v4 = vmul.f32 0.999995, %v2634_v23  ;;  %v2569_v27 = vld [vmem:[#allocation3 + $0x70] sm:$0xff] }
 0x1b8   : > { %2649 = vst [vmem:[#allocation3 + $0x28] sm:$0x7f] %v2633_v58  ;;  %v2550_v39 = vadd.f32 %v3769_v33, %v2294_v32  ;;  %v2677_v40 = vmul.f32 0.999995, %v2661_v35  ;;  %v2695_v44 = vmax.f32 %v2679_v12, 0.0  ;;  %v2600_v48 = vrot.slane %v2547_v37, 1 }
 0x1b9   : > { %2648 = vst [vmem:[#allocation3 + $0x20] sm:$0xff] %v2632_v22  ;;  %v2511_v36 = vpop.f32.mrf.mxu0  ;;  %v2680_v60 = vmul.f32 0.999995, %v2632_v22  ;;  %v2570_v32 = vld [vmem:[#allocation3 + $0x78] sm:$0x7f]  ;;  %v2698_v46 = vmax.f32 %v2682_v4, 0.0 }
 0x1ba   : > { %v2604_v43 = vrot.slane %v2550_v39, 1  ;;  %v2548_v2 = vadd.f32 %v2511_v36, %v2286_v28  ;;  %v2693_v26 = vmax.f32 %v2677_v40, 0.0  ;;  %v2709_v0 = vpack.c.bf16 %v2695_v44, %v2694_v15  ;;  %v2568_v33 = vld [vmem:[#allocation3 + $0x68] sm:$0x7f]  ;;  %v2567_v12 = vld [vmem:[#allocation3 + $0x60] sm:$0xff] }
 0x1bb   : > { %v3772_v6 = vpop.f32.mrf.mxu0  ;;  %v2696_v9 = vmax.f32 %v2680_v60, 0.0 }
 0x1bc   : > { %v2605_v52 = vsel %vm2587_vm0, %v2603_v13, %v2604_v43  ;;  %v2639_v53 = vadd.f32 %v2604_v43, %v2566_v30  ;;  %v2601_v10 = vrot.slane %v2548_v2, 1  ;;  %v2553_v57 = vadd.f32 %v3772_v6, %v2307_v45 }
 0x1bd   : > { %v2638_v55 = vadd.f32 %v2605_v52, %v2565_v51  ;;  %v2524_v59 = vpop.f32.mrf.mxu0  ;;  %v2708_v21 = vpack.c.bf16 %v2693_v26, %v2692_v49  ;;  %v2667_v50 = vld [vmem:[#allocation3 + $0x38] sm:$0xff] }
 0x1be   : > { %2655 = vst [vmem:[#allocation3 + $0x58] sm:$0x7f] %v2639_v53  ;;  %v2602_v61 = vsel %vm2587_vm0, %v2600_v48, %v2601_v10  ;;  %v2637_v63 = vadd.f32 %v2601_v10, %v2564_v56  ;;  %v2551_v1 = vadd.f32 %v2524_v59, %v2299_v47  ;;  %v2683_v5 = vmul.f32 0.999995, %v2667_v50  ;;  %v3313_v59 = vld [vmem:[%s4524_s3] ss:$0 sm:$0xff] }
 0x1bf   : > { %2654 = vst [vmem:[#allocation3 + $0x50] sm:$0xff] %v2638_v55  ;;  %v2636_v24 = vadd.f32 %v2602_v61, %v2563_v38  ;;  %v3773_v3 = vpop.f32.mrf.mxu0  ;;  %3790 = vmatprep.mubr.bf16.mxu1 %v2708_v21  ;;  %v2665_v42 = vld [vmem:[#allocation3 + $0x28] sm:$0xff]  ;;  %v2609_v8 = vrot.slane %v2553_v57, 1  ;;  %v2686_v43 = vmul.f32 0.999995, %v2638_v55 }
 0x1c0   : > { %2653 = vst [vmem:[#allocation3 + $0x48] sm:$0x7f] %v2637_v63  ;;  %v2554_v25 = vadd.f32 %v3773_v3, %v2310_v16  ;;  %3791 = vmatmul.mubr.bf16.vlgmr.msra.gmra.mxu1 %v2709_v0  ;;  %v2681_v17 = vmul.f32 0.999995, %v2665_v42  ;;  %v2699_v29 = vmax.f32 %v2683_v5, 0.0  ;;  %v2606_v31 = vrot.slane %v2551_v1, 1 }
 0x1c1   : > { %2652 = vst [vmem:[#allocation3 + $0x40] sm:$0xff] %v2636_v24  ;;  %v2527_v11 = vpop.f32.mrf.mxu0  ;;  %v2684_v35 = vmul.f32 0.999995, %v2636_v24  ;;  %v2702_v47 = vmax.f32 %v2686_v43, 0.0 }
 0x1c2   : > { %v2610_v14 = vrot.slane %v2554_v25, 1  ;;  %v2552_v54 = vadd.f32 %v2527_v11, %v2302_v7  ;;  %v2697_v19 = vmax.f32 %v2681_v17, 0.0  ;;  %v2711_v39 = vpack.c.bf16 %v2699_v29, %v2698_v46 }
 0x1c3   : > { %v2700_v2 = vmax.f32 %v2684_v35, 0.0 }
 0x1c4   : > { %v2611_v23 = vsel %vm2587_vm0, %v2609_v8, %v2610_v14  ;;  %v2643_v58 = vadd.f32 %v2610_v14, %v2570_v32  ;;  %v2607_v18 = vrot.slane %v2552_v54, 1  ;;  %v2710_v20 = vpack.c.bf16 %v2697_v19, %v2696_v9 }
 0x1c5   : > { %v2642_v22 = vadd.f32 %v2611_v23, %v2569_v27  ;;  %v2671_v62 = vld [vmem:[#allocation3 + $0x58] sm:$0xff] }
 0x1c6   : > { %2659 = vst [vmem:[#allocation3 + $0x78] sm:$0x7f] %v2643_v58  ;;  %v2608_v28 = vsel %vm2587_vm0, %v2606_v31, %v2607_v18  ;;  %v2641_v37 = vadd.f32 %v2607_v18, %v2568_v33  ;;  %3794 = vmatprep.mubr.bf16.mxu1 %v2710_v20  ;;  %v2687_v40 = vmul.f32 0.999995, %v2671_v62 }
 0x1c7   : > { %2658 = vst [vmem:[#allocation3 + $0x70] sm:$0xff] %v2642_v22  ;;  %v2640_v41 = vadd.f32 %v2608_v28, %v2567_v12  ;;  %v2669_v13 = vld [vmem:[#allocation3 + $0x48] sm:$0xff]  ;;  %v2690_v52 = vmul.f32 0.999995, %v2642_v22 }
 0x1c8   : > { %2657 = vst [vmem:[#allocation3 + $0x68] sm:$0x7f] %v2641_v37  ;;  %3795 = vmatmul.mubr.bf16.gmra.mxu1 %v2711_v39  ;;  %v2685_v36 = vmul.f32 0.999995, %v2669_v13  ;;  %v2703_v44 = vmax.f32 %v2687_v40, 0.0 }
 0x1c9   : > { %2656 = vst [vmem:[#allocation3 + $0x60] sm:$0xff] %v2640_v41  ;;  %v2688_v49 = vmul.f32 0.999995, %v2640_v41  ;;  %v2706_v56 = vmax.f32 %v2690_v52, 0.0 }
 0x1ca   : > { %v2701_v26 = vmax.f32 %v2685_v36, 0.0  ;;  %v2713_v6 = vpack.c.bf16 %v2703_v44, %v2702_v47 }
 0x1cb   : > { %v2704_v53 = vmax.f32 %v2688_v49, 0.0 }
 0x1cc   : > { %v2712_v45 = vpack.c.bf16 %v2701_v26, %v2700_v2 }
 0x1cd   : > { %v2675_v30 = vld [vmem:[#allocation3 + $0x78] sm:$0xff] }
 0x1ce   : > { %3798 = vmatprep.mubr.bf16.mxu1 %v2712_v45  ;;  %v2691_v15 = vmul.f32 0.999995, %v2675_v30 }
 0x1cf   : > { %v2673_v48 = vld [vmem:[#allocation3 + $0x68] sm:$0xff] }
 0x1d0   : > { %3799 = vmatmul.mubr.bf16.gmra.mxu1 %v2713_v6  ;;  %v2689_v51 = vmul.f32 0.999995, %v2673_v48  ;;  %v2707_v34 = vmax.f32 %v2691_v15, 0.0 }
 0x1d2   : > { %v2705_v10 = vmax.f32 %v2689_v51, 0.0  ;;  %v2715_v57 = vpack.c.bf16 %v2707_v34, %v2706_v56 }
 0x1d4   : > { %v2714_v55 = vpack.c.bf16 %v2705_v10, %v2704_v53 }
 0x1d6   : > { %3802 = vmatprep.mubr.bf16.mxu1 %v2714_v55 }
 0x1d8   : > { %3803 = vmatmul.mubr.bf16.gmra.mxu1 %v2715_v57 }
 0x280   : > { %v3792_v21 = vpop.f32.mrf.mxu1 }
 0x281   : > { %v2830_v60 = vadd.f32 %v3792_v21, %v3313_v59 }
 0x282   : > { %v2821_v50 = vpop.f32.mrf.mxu1 }
 0x283   : > { %2886 = vst [vmem:[%s4117_s5 + $0x10] sm:$0xff] %v2830_v60  ;;  %v2822_v16 = vadd.f32 %v3313_v59, %v2821_v50 }
 0x284   : > { %v3793_v38 = vpop.f32.mrf.mxu1 }
 0x285   : > { %2884 = vst [vmem:[%s4117_s5] sm:$0xff] %v2822_v16  ;;  %v2833_v61 = vadd.f32 %v3793_v38, %v3313_v59 }
 0x286   : > { %v2824_v63 = vpop.f32.mrf.mxu1 }
 0x287   : > { %2887 = vst [vmem:[%s4117_s5 + $0x18] sm:$0xff] %v2833_v61  ;;  %v2825_v0 = vadd.f32 %v3313_v59, %v2824_v63 }
 0x288   : > { %v3796_v24 = vpop.f32.mrf.mxu1 }
 0x289   : > { %2885 = vst [vmem:[%s4117_s5 + $0x8] sm:$0xff] %v2825_v0  ;;  %v2846_v1 = vadd.f32 %v3796_v24, %v3313_v59 }
 0x28a   : > { %v2837_v3 = vpop.f32.mrf.mxu1 }
 0x28b   : > { %2890 = vst [vmem:[%s4117_s5 + $0x30] sm:$0xff] %v2846_v1  ;;  %v2838_v42 = vadd.f32 %v3313_v59, %v2837_v3 }
 0x28c   : > { %v3797_v4 = vpop.f32.mrf.mxu1 }
 0x28d   : > { %2888 = vst [vmem:[%s4117_s5 + $0x20] sm:$0xff] %v2838_v42  ;;  %v2849_v5 = vadd.f32 %v3797_v4, %v3313_v59 }
 0x28e   : > { %v2840_v7 = vpop.f32.mrf.mxu1 }
 0x28f   : > { %2891 = vst [vmem:[%s4117_s5 + $0x38] sm:$0xff] %v2849_v5  ;;  %v2841_v25 = vadd.f32 %v3313_v59, %v2840_v7 }
 0x290   : > { %v3800_v17 = vpop.f32.mrf.mxu1 }
 0x291   : > { %2889 = vst [vmem:[%s4117_s5 + $0x28] sm:$0xff] %v2841_v25  ;;  %v2862_v8 = vadd.f32 %v3800_v17, %v3313_v59 }
 0x292   : > { %v2853_v11 = vpop.f32.mrf.mxu1 }
 0x293   : > { %2894 = vst [vmem:[%s4117_s5 + $0x50] sm:$0xff] %v2862_v8  ;;  %v2854_v9 = vadd.f32 %v3313_v59, %v2853_v11 }
 0x294   : > { %v3801_v14 = vpop.f32.mrf.mxu1 }
 0x295   : > { %2892 = vst [vmem:[%s4117_s5 + $0x40] sm:$0xff] %v2854_v9  ;;  %v2865_v54 = vadd.f32 %v3801_v14, %v3313_v59 }
 0x296   : > { %v2856_v19 = vpop.f32.mrf.mxu1 }
 0x297   : > { %2895 = vst [vmem:[%s4117_s5 + $0x58] sm:$0xff] %v2865_v54  ;;  %v2857_v29 = vadd.f32 %v3313_v59, %v2856_v19 }
 0x298   : > { %v3804_v31 = vpop.f32.mrf.mxu1 }
 0x299   : > { %2893 = vst [vmem:[%s4117_s5 + $0x48] sm:$0xff] %v2857_v29  ;;  %v2878_v32 = vadd.f32 %v3804_v31, %v3313_v59 }
 0x29a   : > { %v2869_v46 = vpop.f32.mrf.mxu1 }
 0x29b   : > { %2898 = vst [vmem:[%s4117_s5 + $0x70] sm:$0xff] %v2878_v32  ;;  %v2870_v27 = vadd.f32 %v3313_v59, %v2869_v46 }
 0x29c   : > { %v3805_v23 = vpop.f32.mrf.mxu1 }
 0x29d   : > { %2896 = vst [vmem:[%s4117_s5 + $0x60] sm:$0xff] %v2870_v27  ;;  %v2881_v58 = vadd.f32 %v3805_v23, %v3313_v59 }
 0x29e   : > { %v2872_v18 = vpop.f32.mrf.mxu1 }
 0x29f   : > { %2899 = vst [vmem:[%s4117_s5 + $0x78] sm:$0xff] %v2881_v58  ;;  %v2873_v20 = vadd.f32 %v3313_v59, %v2872_v18 }
 0x2a1   : > { %2897 = vst [vmem:[%s4117_s5 + $0x68] sm:$0xff] %v2873_v20 }
 0x2a2 PF: > { %s14_s19 = sadd.s32 1, %s4044_s19   ;;  %s4526_s15 = smov %s4036_s17 }
 0x2a3   : > { %p11_p12 = scmp.ge.s32.totalorder %s14_s19, 6   ;;  %s4527_s16 = smov %s4040_s18 }
 0x2a4   : > { %s4528_s17 = smov %s4531_s20  ;;  %s4529_s18 = smov %s4535_s21 }
 0x2a5   :  { %13 = sbr.rel (!%p11_p12) target bundleno = 3 (0x3), region = 212 }
 0x2aa   :  { %2932 = vsyncmov [#allocation4] }
 0x2ad   :  { %s2933_s5 = vpop.sfrf %2932 }
 0x2ae   :  { %p3324_p13 = scmp.ne.s32.totalorder %s2933_s5, 0 }
 0x2b0   :  { %2937 = shalt.err (%p3324_p13)  }

// kernel: deeplabv3plus_decoder.4
= control target key start
LH: loop header
LB: loop body
LE: loop exit
PB: predicated region body
PF: predicated region fallthrough
CT: control target
= control target key end

     0   :  { %s5313_s9 = smov 0   ;;  %s5315_s10 = smov 0   ;;  %s6442_s0 = inlined_call_operand.vmem [shape: bf16[2,16,16,256], index: 0, kind: input, shape index: {}]   ;;  %s6443_s1 = inlined_call_operand.vmem [shape: bf16[3,3,256,128], index: 1, kind: input, shape index: {}]   ;;  %s6444_s2 = inlined_call_operand.vmem [shape: bf16[2,16,16,128], index: 2, kind: output, shape index: {}]  }
   0x1   :  { %s5317_s11 = smov 0   ;;  %s5319_s12 = smov 0  }
   0x2   :  { %s5321_s13 = smov 0  }
   0x3 LB: > { %s21_s14 = sadd.s32 1, %s5286_s11  ;;  %s24_s15 = sadd.s32 1, %s5290_s12  ;;  %s5294_s13 = sphi %s5321_s13, %s12_s13   ;;  %s5290_s12 = sphi %s5319_s12, %s6476_s12   ;;  %s5286_s11 = sphi %s5317_s11, %s6475_s11   ;;  %s5282_s10 = sphi %s5315_s10, %s6474_s10   ;;  %s5278_s9 = sphi %s5313_s9, %s6473_s9  }
   0x4   : > { %p22_p0 = scmp.ge.s32.totalorder %s21_s14, 2  ;;  %p3777_p1 = scmp.ge.s32.totalorder %s5294_s13, 1 }
   0x5   : > { %p92_p2 = scmp.lt.s32.totalorder %s5294_s13, 5 }
   0x6   : > { %s6478_s14 = smov (%p22_p0, %s21_s14), 0  ;;  %s6480_s15 = smov (!%p22_p0, %s24_s15), %s5290_s12 }
   0x7   : > { %p93_p3 = pnand %p3777_p1, %p92_p2  ;;  %p26_p4 = scmp.ge.s32.totalorder %s6480_s15, 2 }
   0x9   : > { %s6482_s15 = smov (%p26_p4, %s6480_s15), 0  ;;  %96 = sbr.rel (%p93_p3) target bundleno = 618 (0x26a), region = 24 }
   0xe   : > { %s5348_s16 = sshll.u32 %s5278_s9, 3  ;;  %p113_p5 = scmp.lt.s32.totalorder %s5282_s10, 1 }
   0xf   : > { %p115_p6 = scmp.lt.s32.totalorder %s5348_s16, 15  ;;  %p3783_p7 = scmp.ne.s32.totalorder %s5278_s9, 0 }
  0x10   : > { %s114_s17 = scalar_select %p113_p5, %s5282_s10, 1 }
  0x11   : > { %s116_s18 = scalar_select %p115_p6, %s5348_s16, 15 }
  0x12   : > { %s3780_s19 = sshll.u32 %s114_s17, 5  ;;  %128 = sbr.rel (%p3783_p7) target bundleno = 37 (0x25), region = 28 }
  0x13   : > { %s3779_s20 = sshll.u32 %s116_s18, 1  ;;  %s4358_s26 = sshll.u32 (!%p3783_p7), %s5282_s10, 8 }
  0x14   : > { %s119_s21 = sadd.s32 %s3780_s19, %s3779_s20  ;;  %s5364_s29 = scalar_lea.vmem (!%p3783_p7), %s6442_s0, %s4358_s26 }
  0x15   : > { %s3781_s22 = sshll.u32 %s119_s21, 2 }
  0x16   : > { %s5357_s25 = scalar_lea.vmem %s6444_s2, %s3781_s22 }
  0x17   : > { %v5296_v0 = vmov 0   ;;  %v168_v1 = vld [vmem:[%s5364_s29] sm:$0xff]  ;;  %v170_v2 = vld [vmem:[%s5364_s29 + $0x8] sm:$0xff]  ;;  %v172_v3 = vld [vmem:[%s5364_s29 + $0x10] sm:$0xff] }
  0x18   : > { %129 = vst [vmem:[#allocation2] sm:$0xff] %v5296_v0  ;;  %130 = vst [vmem:[#allocation2 + $0x38] sm:$0xff] %v5296_v0  ;;  %v174_v4 = vld [vmem:[%s5364_s29 + $0x18] sm:$0xff]  ;;  %v176_v5 = vld [vmem:[%s5364_s29 + $0x20] sm:$0xff] }
  0x19   : > { %169 = vst [vmem:[#allocation2 + $0x50] sm:$0xff] %v168_v1  ;;  %171 = vst [vmem:[#allocation2 + $0x18] sm:$0xff] %v170_v2  ;;  %v178_v6 = vld [vmem:[%s5364_s29 + $0x28] sm:$0xff]  ;;  %v180_v7 = vld [vmem:[%s5364_s29 + $0x30] sm:$0xff] }
  0x1a   : > { %173 = vst [vmem:[#allocation2 + $0x30] sm:$0xff] %v172_v3  ;;  %175 = vst [vmem:[#allocation2 + $0x68] sm:$0xff] %v174_v4  ;;  %v182_v8 = vld [vmem:[%s5364_s29 + $0x38] sm:$0xff]  ;;  %v184_v9 = vld [vmem:[%s5364_s29 + $0x40] sm:$0xff] }
  0x1b   : > { %177 = vst [vmem:[#allocation2 + $0x78] sm:$0xff] %v176_v5  ;;  %179 = vst [vmem:[#allocation2 + $0x80] sm:$0xff] %v178_v6  ;;  %v186_v10 = vld [vmem:[%s5364_s29 + $0x48] sm:$0xff]  ;;  %v188_v11 = vld [vmem:[%s5364_s29 + $0x50] sm:$0xff] }
  0x1c   : > { %181 = vst [vmem:[#allocation2 + $0x8] sm:$0xff] %v180_v7  ;;  %183 = vst [vmem:[#allocation2 + $0x88] sm:$0xff] %v182_v8  ;;  %v190_v12 = vld [vmem:[%s5364_s29 + $0x58] sm:$0xff]  ;;  %v192_v13 = vld [vmem:[%s5364_s29 + $0x60] sm:$0xff] }
  0x1d   : > { %185 = vst [vmem:[#allocation2 + $0x28] sm:$0xff] %v184_v9  ;;  %187 = vst [vmem:[#allocation2 + $0x40] sm:$0xff] %v186_v10  ;;  %v194_v14 = vld [vmem:[%s5364_s29 + $0x68] sm:$0xff]  ;;  %v196_v15 = vld [vmem:[%s5364_s29 + $0x70] sm:$0xff] }
  0x1e   : > { %189 = vst [vmem:[#allocation2 + $0x58] sm:$0xff] %v188_v11  ;;  %191 = vst [vmem:[#allocation2 + $0x10] sm:$0xff] %v190_v12  ;;  %v198_v16 = vld [vmem:[%s5364_s29 + $0x78] sm:$0xff]  ;;  %v200_v17 = vld [vmem:[%s5364_s29 + $0x80] sm:$0xff] }
  0x1f   : > { %193 = vst [vmem:[#allocation2 + $0x98] sm:$0xff] %v192_v13  ;;  %195 = vst [vmem:[#allocation2 + $0x60] sm:$0xff] %v194_v14  ;;  %v202_v18 = vld [vmem:[%s5364_s29 + $0x88] sm:$0xff] }
  0x20   : > { %197 = vst [vmem:[#allocation2 + $0x20] sm:$0xff] %v196_v15  ;;  %199 = vst [vmem:[#allocation2 + $0x48] sm:$0xff] %v198_v16 }
  0x21   : > { %201 = vst [vmem:[#allocation2 + $0x70] sm:$0xff] %v200_v17  ;;  %203 = vst [vmem:[#allocation2 + $0x90] sm:$0xff] %v202_v18 }
  0x22   : > { %211 = vsyncadd [#allocation4], 2304 }
  0x23   : > { %5270 = dma.done.wait [#allocation4], 2304 }
  0x24   : > { %5271 = vsyncadd [#allocation4], 4294964992 }
  0x25 PF: > { %p3786_p8 = scmp.ne.s32.totalorder %s5278_s9, 1 }
  0x26   : > { %s3787_s30 = sadd.s32 (!%p3786_p8), 4294967295, %s5348_s16  ;;  %s3789_s3 = sshll.u32 (!%p3786_p8), %s5282_s10, 6 }
  0x27   : > { %220 = sbr.rel (%p3786_p8) target bundleno = 58 (0x3a), region = 66  ;;  %s3788_s4 = sshll.u32 (!%p3786_p8), %s3787_s30, 2 }
  0x28   : > { %s227_s5 = sadd.s32 (!%p3786_p8), %s3789_s3, %s3788_s4 }
  0x29   : > { %s3790_s6 = sshll.u32 (!%p3786_p8), %s227_s5, 2 }
  0x2a   : > { %s5390_s17 = scalar_lea.vmem (!%p3786_p8), %s6442_s0, %s3790_s6 }
  0x2c   : > { %v5297_v19 = vmov 0   ;;  %v263_v20 = vld [vmem:[%s5390_s17] sm:$0xff]  ;;  %v265_v21 = vld [vmem:[%s5390_s17 + $0x8] sm:$0xff]  ;;  %v267_v22 = vld [vmem:[%s5390_s17 + $0x10] sm:$0xff] }
  0x2d   : > { %222 = vst [vmem:[#allocation2 + $0x70] sm:$0xff] %v5297_v19  ;;  %223 = vst [vmem:[#allocation2 + $0x90] sm:$0xff] %v5297_v19  ;;  %v269_v23 = vld [vmem:[%s5390_s17 + $0x18] sm:$0xff]  ;;  %v271_v24 = vld [vmem:[%s5390_s17 + $0x20] sm:$0xff] }
  0x2e   : > { %264 = vst [vmem:[#allocation2] sm:$0xff] %v263_v20  ;;  %266 = vst [vmem:[#allocation2 + $0x38] sm:$0xff] %v265_v21  ;;  %v273_v25 = vld [vmem:[%s5390_s17 + $0x28] sm:$0xff]  ;;  %v275_v26 = vld [vmem:[%s5390_s17 + $0x30] sm:$0xff] }
  0x2f   : > { %268 = vst [vmem:[#allocation2 + $0x50] sm:$0xff] %v267_v22  ;;  %270 = vst [vmem:[#allocation2 + $0x18] sm:$0xff] %v269_v23  ;;  %v277_v27 = vld [vmem:[%s5390_s17 + $0x38] sm:$0xff]  ;;  %v279_v28 = vld [vmem:[%s5390_s17 + $0x40] sm:$0xff] }
  0x30   : > { %272 = vst [vmem:[#allocation2 + $0x30] sm:$0xff] %v271_v24  ;;  %274 = vst [vmem:[#allocation2 + $0x68] sm:$0xff] %v273_v25  ;;  %v281_v29 = vld [vmem:[%s5390_s17 + $0x48] sm:$0xff]  ;;  %v283_v30 = vld [vmem:[%s5390_s17 + $0x50] sm:$0xff] }
  0x31   : > { %276 = vst [vmem:[#allocation2 + $0x78] sm:$0xff] %v275_v26  ;;  %278 = vst [vmem:[#allocation2 + $0x80] sm:$0xff] %v277_v27  ;;  %v285_v31 = vld [vmem:[%s5390_s17 + $0x58] sm:$0xff]  ;;  %v287_v32 = vld [vmem:[%s5390_s17 + $0x60] sm:$0xff] }
  0x32   : > { %280 = vst [vmem:[#allocation2 + $0x8] sm:$0xff] %v279_v28  ;;  %282 = vst [vmem:[#allocation2 + $0x88] sm:$0xff] %v281_v29  ;;  %v289_v33 = vld [vmem:[%s5390_s17 + $0x68] sm:$0xff]  ;;  %v291_v34 = vld [vmem:[%s5390_s17 + $0x70] sm:$0xff] }
  0x33   : > { %284 = vst [vmem:[#allocation2 + $0x28] sm:$0xff] %v283_v30  ;;  %286 = vst [vmem:[#allocation2 + $0x40] sm:$0xff] %v285_v31  ;;  %v293_v35 = vld [vmem:[%s5390_s17 + $0x78] sm:$0xff]  ;;  %v295_v36 = vld [vmem:[%s5390_s17 + $0x80] sm:$0xff] }
  0x34   : > { %288 = vst [vmem:[#allocation2 + $0x58] sm:$0xff] %v287_v32  ;;  %290 = vst [vmem:[#allocation2 + $0x10] sm:$0xff] %v289_v33  ;;  %v297_v37 = vld [vmem:[%s5390_s17 + $0x88] sm:$0xff] }
  0x35   : > { %292 = vst [vmem:[#allocation2 + $0x98] sm:$0xff] %v291_v34  ;;  %294 = vst [vmem:[#allocation2 + $0x60] sm:$0xff] %v293_v35 }
  0x36   : > { %296 = vst [vmem:[#allocation2 + $0x20] sm:$0xff] %v295_v36  ;;  %298 = vst [vmem:[#allocation2 + $0x48] sm:$0xff] %v297_v37 }
  0x37   : > { %306 = vsyncadd [#allocation4], 2304 }
  0x38   : > { %5272 = dma.done.wait [#allocation4], 2304 }
  0x39   : > { %5273 = vsyncadd [#allocation4], 4294964992 }
  0x3a PF: > { %p312_p9 = scmp.gt.s32.totalorder %s5278_s9, 0  ;;  %p313_p10 = scmp.lt.s32.totalorder %s5278_s9, 1 }
  0x3c   : > { %p314_p11 = pnand %p313_p10, %p312_p9 }
  0x3d   : > { %s3791_s18 = sadd.s32 (!%p314_p11), 4294967295, %s5348_s16  ;;  %s3793_s19 = sshll.u32 (!%p314_p11), %s5282_s10, 6 }
  0x3e   : > { %317 = sbr.rel (%p314_p11) target bundleno = 81 (0x51), region = 104  ;;  %s3792_s20 = sshll.u32 (!%p314_p11), %s3791_s18, 2 }
  0x3f   : > { %s321_s21 = sadd.s32 (!%p314_p11), %s3793_s19, %s3792_s20 }
  0x40   : > { %s3794_s22 = sshll.u32 (!%p314_p11), %s321_s21, 2 }
  0x41   : > { %s5417_s26 = scalar_lea.vmem (!%p314_p11), %s6442_s0, %s3794_s22 }
  0x43   : > { %v357_v38 = vld [vmem:[%s5417_s26] sm:$0xff]  ;;  %v359_v39 = vld [vmem:[%s5417_s26 + $0x8] sm:$0xff]  ;;  %v361_v40 = vld [vmem:[%s5417_s26 + $0x10] sm:$0xff] }
  0x44   : > { %358 = vst [vmem:[#allocation2] sm:$0xff] %v357_v38  ;;  %360 = vst [vmem:[#allocation2 + $0x38] sm:$0xff] %v359_v39  ;;  %v363_v41 = vld [vmem:[%s5417_s26 + $0x18] sm:$0xff]  ;;  %v365_v42 = vld [vmem:[%s5417_s26 + $0x20] sm:$0xff] }
  0x45   : > { %362 = vst [vmem:[#allocation2 + $0x50] sm:$0xff] %v361_v40  ;;  %v367_v43 = vld [vmem:[%s5417_s26 + $0x28] sm:$0xff]  ;;  %364 = vst [vmem:[#allocation2 + $0x18] sm:$0xff] %v363_v41  ;;  %v369_v44 = vld [vmem:[%s5417_s26 + $0x30] sm:$0xff] }
  0x46   : > { %366 = vst [vmem:[#allocation2 + $0x30] sm:$0xff] %v365_v42  ;;  %368 = vst [vmem:[#allocation2 + $0x68] sm:$0xff] %v367_v43  ;;  %v371_v45 = vld [vmem:[%s5417_s26 + $0x38] sm:$0xff]  ;;  %v373_v46 = vld [vmem:[%s5417_s26 + $0x40] sm:$0xff] }
  0x47   : > { %370 = vst [vmem:[#allocation2 + $0x78] sm:$0xff] %v369_v44  ;;  %372 = vst [vmem:[#allocation2 + $0x80] sm:$0xff] %v371_v45  ;;  %v375_v47 = vld [vmem:[%s5417_s26 + $0x48] sm:$0xff]  ;;  %v377_v48 = vld [vmem:[%s5417_s26 + $0x50] sm:$0xff] }
  0x48   : > { %374 = vst [vmem:[#allocation2 + $0x8] sm:$0xff] %v373_v46  ;;  %v379_v49 = vld [vmem:[%s5417_s26 + $0x58] sm:$0xff]  ;;  %376 = vst [vmem:[#allocation2 + $0x88] sm:$0xff] %v375_v47  ;;  %v381_v50 = vld [vmem:[%s5417_s26 + $0x60] sm:$0xff] }
  0x49   : > { %378 = vst [vmem:[#allocation2 + $0x28] sm:$0xff] %v377_v48  ;;  %380 = vst [vmem:[#allocation2 + $0x40] sm:$0xff] %v379_v49  ;;  %v383_v51 = vld [vmem:[%s5417_s26 + $0x68] sm:$0xff]  ;;  %v385_v52 = vld [vmem:[%s5417_s26 + $0x70] sm:$0xff] }
  0x4a   : > { %382 = vst [vmem:[#allocation2 + $0x58] sm:$0xff] %v381_v50  ;;  %384 = vst [vmem:[#allocation2 + $0x10] sm:$0xff] %v383_v51  ;;  %v387_v53 = vld [vmem:[%s5417_s26 + $0x78] sm:$0xff]  ;;  %v389_v54 = vld [vmem:[%s5417_s26 + $0x80] sm:$0xff] }
  0x4b   : > { %386 = vst [vmem:[#allocation2 + $0x98] sm:$0xff] %v385_v52  ;;  %v391_v55 = vld [vmem:[%s5417_s26 + $0x88] sm:$0xff]  ;;  %388 = vst [vmem:[#allocation2 + $0x60] sm:$0xff] %v387_v53  ;;  %v393_v56 = vld [vmem:[%s5417_s26 + $0x90] sm:$0xff] }
  0x4c   : > { %390 = vst [vmem:[#allocation2 + $0x20] sm:$0xff] %v389_v54  ;;  %392 = vst [vmem:[#allocation2 + $0x48] sm:$0xff] %v391_v55  ;;  %v395_v57 = vld [vmem:[%s5417_s26 + $0x98] sm:$0xff] }
  0x4d   : > { %394 = vst [vmem:[#allocation2 + $0x70] sm:$0xff] %v393_v56  ;;  %396 = vst [vmem:[#allocation2 + $0x90] sm:$0xff] %v395_v57 }
  0x4e   : > { %404 = vsyncadd [#allocation4], 2560 }
  0x4f   : > { %5274 = dma.done.wait [#allocation4], 2560 }
  0x50   : > { %5275 = vsyncadd [#allocation4], 4294964736 }
  0x51 PF: > { %v5056_v58 = vld [vmem:[%s6443_s1 + $0x278] sm:$0xff]   ;;  %v5058_v60 = vld [vmem:[%s6443_s1 + $0x270] sm:$0xff]   ;;  %v5060_v62 = vld [vmem:[%s6443_s1 + $0x268] sm:$0xff]   ;;  %vm3453_vm0 = vcmask 1046528  }
  0x52   : > { %v5057_v59 = vld [vmem:[%s6443_s1 + $0x238] sm:$0xff]   ;;  %4422 = vmatprep.subr.bf16.mxu0 %v5056_v58  ;;  %4998 = vmatprep.subr.bf16.mxu1 %v5056_v58  ;;  %v5059_v61 = vld [vmem:[%s6443_s1 + $0x230] sm:$0xff]   ;;  %v5061_v63 = vld [vmem:[%s6443_s1 + $0x228] sm:$0xff]  }
  0x53   : > { %4423 = vmatpush3.bf16.msra.mxu0 %v5057_v59  ;;  %5006 = vmatpush3.bf16.msra.mxu1 %v5057_v59  ;;  %v5062_v0 = vld [vmem:[%s6443_s1 + $0x260] sm:$0xff]   ;;  %v5064_v2 = vld [vmem:[%s6443_s1 + $0x258] sm:$0xff]   ;;  %v5066_v4 = vld [vmem:[%s6443_s1 + $0x250] sm:$0xff]  }
  0x54   : > { %4424 = vmatprep.subr.bf16.mxu0 %v5058_v60  ;;  %4999 = vmatprep.subr.bf16.mxu1 %v5058_v60  ;;  %v5063_v1 = vld [vmem:[%s6443_s1 + $0x220] sm:$0xff]   ;;  %v5065_v3 = vld [vmem:[%s6443_s1 + $0x218] sm:$0xff]   ;;  %v468_v6 = vld [vmem:[#allocation2 + $0x28] sm:$0xff] }
  0x55   : > { %v5472_v5 = vld [vmem:[#allocation2 + $0x54] ss:$-56 sps:$4 sm:$0xff]   ;;  %v469_v7 = vld [vmem:[#allocation2 + $0x40] sm:$0xff]  ;;  %v5068_v10 = vld [vmem:[%s6443_s1 + $0x248] sm:$0xff]  }
  0x56   : > { %v5474_v8 = vcombine.high %v468_v6, %v469_v7  ;;  %v5067_v9 = vld [vmem:[%s6443_s1 + $0x210] sm:$0xff]   ;;  %717 = vmatprep.mubr.bf16.mxu0 %v5472_v5  ;;  %v5069_v11 = vld [vmem:[%s6443_s1 + $0x208] sm:$0xff]   ;;  %v5070_v12 = vld [vmem:[%s6443_s1 + $0x240] sm:$0xff]   ;;  %v5493_v14 = vcombine.low %v468_v6, %v469_v7 }
  0x57   : > { %4425 = vmatpush3.bf16.msra.mxu0 %v5059_v61  ;;  %5007 = vmatpush3.bf16.msra.mxu1 %v5059_v61  ;;  %v5071_v13 = vld [vmem:[%s6443_s1 + $0x200] sm:$0xff]   ;;  %v5495_v15 = vld [vmem:[#allocation2 + $0x50] ss:$-56 sps:$4 sm:$0xff]   ;;  %v5515_v22 = vld [vmem:[#allocation2 + $0x34] ss:$56 sps:$4 sm:$0xff]  }
  0x58   : > { %4426 = vmatprep.subr.bf16.mxu0 %v5060_v62  ;;  %5000 = vmatprep.subr.bf16.mxu1 %v5060_v62  ;;  %v5077_v16 = vld [vmem:[%s6443_s1 + $0xf8] sm:$0xff]   ;;  %v5081_v20 = vld [vmem:[%s6443_s1 + $0xf0] sm:$0xff]   ;;  %v5091_v26 = vld [vmem:[%s6443_s1 + $0xe8] sm:$0xff]  }
  0x59   : > { %749 = vmatprep.mubr.bf16.mxu1 %v5474_v8  ;;  %v5078_v17 = vld [vmem:[%s6443_s1 + $0x3f8] sm:$0xff]   ;;  %v5082_v21 = vld [vmem:[%s6443_s1 + $0x3f0] sm:$0xff]   ;;  %v5092_v29 = vld [vmem:[%s6443_s1 + $0x3e8] sm:$0xff]  }
  0x5a   : > { %v5079_v18 = vld [vmem:[%s6443_s1 + $0xb8] sm:$0xff]   ;;  %v5083_v23 = vld [vmem:[%s6443_s1 + $0xb0] sm:$0xff]   ;;  %v5093_v30 = vld [vmem:[%s6443_s1 + $0xa8] sm:$0xff]  }
  0x5b   : > { %4427 = vmatpush3.bf16.msra.mxu0 %v5061_v63  ;;  %5008 = vmatpush3.bf16.msra.mxu1 %v5061_v63  ;;  %v5080_v19 = vld [vmem:[%s6443_s1 + $0x3b8] sm:$0xff]   ;;  %v5084_v25 = vld [vmem:[%s6443_s1 + $0x3b0] sm:$0xff]   ;;  %v5094_v31 = vld [vmem:[%s6443_s1 + $0x3a8] sm:$0xff]  }
  0x5c   : > { %4428 = vmatprep.subr.bf16.mxu0 %v5062_v0  ;;  %5001 = vmatprep.subr.bf16.mxu1 %v5062_v0  ;;  %v5520_v24 = vld [vmem:[#allocation2 + $0x5c] ss:$-72 sps:$4 sm:$0xff]   ;;  %v5530_v27 = vld [vmem:[#allocation2 + $0x30] ss:$56 sps:$4 sm:$0xff]   ;;  %v5095_v32 = vld [vmem:[%s6443_s1 + $0xe0] sm:$0xff]  }
  0x5d   : > { %v5532_v28 = vld [vmem:[#allocation2 + $0x58] ss:$-72 sps:$4 sm:$0xff]   ;;  %v5096_v33 = vld [vmem:[%s6443_s1 + $0x3e0] sm:$0xff]   ;;  %v466_v45 = vld [vmem:[#allocation2 + $0x8] sm:$0xff] }
  0x5e   : > { %v5551_v34 = vld [vmem:[#allocation2 + $0x7c] ss:$8 sps:$4 sm:$0xff]   ;;  %v5566_v39 = vld [vmem:[#allocation2 + $0x78] ss:$8 sps:$4 sm:$0xff]   ;;  %v5109_v44 = vld [vmem:[%s6443_s1 + $0xd0] sm:$0xff]  }
  0x5f   : > { %4429 = vmatpush3.bf16.msra.mxu0 %v5063_v1  ;;  %5009 = vmatpush3.bf16.msra.mxu1 %v5063_v1  ;;  %v5097_v35 = vld [vmem:[%s6443_s1 + $0xa0] sm:$0xff]   ;;  %v5105_v38 = vld [vmem:[%s6443_s1 + $0xd8] sm:$0xff]   ;;  %v467_v46 = vld [vmem:[#allocation2 + $0x88] sm:$0xff] }
  0x60   : > { %4430 = vmatprep.subr.bf16.mxu0 %v5064_v2  ;;  %5002 = vmatprep.subr.bf16.mxu1 %v5064_v2  ;;  %v5556_v36 = vld [vmem:[#allocation2 + $0x9c] ss:$-56 sps:$4 sm:$0xff]   ;;  %v5568_v40 = vld [vmem:[#allocation2 + $0x98] ss:$-56 sps:$4 sm:$0xff]   ;;  %v5110_v47 = vld [vmem:[%s6443_s1 + $0x3d0] sm:$0xff]   ;;  %v5590_v49 = vcombine.high %v466_v45, %v467_v46  ;;  %v5612_v56 = vcombine.low %v466_v45, %v467_v46 }
  0x61   : > { %v5098_v37 = vld [vmem:[%s6443_s1 + $0x3a0] sm:$0xff]   ;;  %v5106_v41 = vld [vmem:[%s6443_s1 + $0x3d8] sm:$0xff]   ;;  %v5111_v48 = vld [vmem:[%s6443_s1 + $0x90] sm:$0xff]  }
  0x62   : > { %v5107_v42 = vld [vmem:[%s6443_s1 + $0x98] sm:$0xff]   ;;  %v5592_v50 = vld [vmem:[#allocation2 + $0x24] ss:$40 sps:$4 sm:$0xff]   ;;  %v5112_v51 = vld [vmem:[%s6443_s1 + $0x390] sm:$0xff]  }
  0x63   : > { %4431 = vmatpush3.bf16.msra.mxu0 %v5065_v3  ;;  %5010 = vmatpush3.bf16.msra.mxu1 %v5065_v3  ;;  %v5108_v43 = vld [vmem:[%s6443_s1 + $0x398] sm:$0xff]   ;;  %v5116_v52 = vld [vmem:[%s6443_s1 + $0xc8] sm:$0xff]   ;;  %v5120_v58 = vld [vmem:[%s6443_s1 + $0xc0] sm:$0xff]  }
  0x64   : > { %4432 = vmatprep.subr.bf16.mxu0 %v5066_v4  ;;  %5003 = vmatprep.subr.bf16.mxu1 %v5066_v4  ;;  %v5602_v53 = vld [vmem:[#allocation2 + $0x20] ss:$40 sps:$4 sm:$0xff]   ;;  %v5628_v61 = vld [vmem:[#allocation2 + $0x4] ss:$56 sps:$4 sm:$0xff]   ;;  %v5131_v4 = vld [vmem:[%s6443_s1 + $0x1f0] sm:$0xff]  }
  0x65   : > { %v5117_v54 = vld [vmem:[%s6443_s1 + $0x3c8] sm:$0xff]   ;;  %v5121_v59 = vld [vmem:[%s6443_s1 + $0x3c0] sm:$0xff]   ;;  %v5127_v0 = vld [vmem:[%s6443_s1 + $0x1f8] sm:$0xff]  }
  0x66   : > { %v5118_v55 = vld [vmem:[%s6443_s1 + $0x88] sm:$0xff]   ;;  %v5122_v60 = vld [vmem:[%s6443_s1 + $0x80] sm:$0xff]   ;;  %v5129_v1 = vld [vmem:[%s6443_s1 + $0x78] sm:$0xff]  }
  0x67   : > { %4433 = vmatpush3.bf16.msra.mxu0 %v5067_v9  ;;  %5011 = vmatpush3.bf16.msra.mxu1 %v5067_v9  ;;  %v5119_v57 = vld [vmem:[%s6443_s1 + $0x388] sm:$0xff]   ;;  %v5123_v62 = vld [vmem:[%s6443_s1 + $0x380] sm:$0xff]   ;;  %v5128_v2 = vld [vmem:[%s6443_s1 + $0x1b8] sm:$0xff]  }
  0x68   : > { %4434 = vmatprep.subr.bf16.mxu0 %v5068_v10  ;;  %5004 = vmatprep.subr.bf16.mxu1 %v5068_v10  ;;  %v5633_v63 = vld [vmem:[#allocation2] ss:$56 sps:$4 sm:$0xff]   ;;  %v5133_v6 = vld [vmem:[%s6443_s1 + $0x70] sm:$0xff]   ;;  %v5135_v10 = vld [vmem:[%s6443_s1 + $0x1e8] sm:$0xff]  }
  0x69   : > { %v5130_v3 = vld [vmem:[%s6443_s1 + $0x38] sm:$0xff]   ;;  %v5132_v7 = vld [vmem:[%s6443_s1 + $0x1b0] sm:$0xff]  }
  0x6a   : > { %v5134_v9 = vld [vmem:[%s6443_s1 + $0x30] sm:$0xff]   ;;  %v5161_v45 = vld [vmem:[%s6443_s1 + $0x2f8] sm:$0xff]  }
  0x6b   : > { %4435 = vmatpush3.bf16.msra.mxu0 %v5069_v11  ;;  %5012 = vmatpush3.bf16.msra.mxu1 %v5069_v11  ;;  %v5137_v11 = vld [vmem:[%s6443_s1 + $0x68] sm:$0xff]   ;;  %v1070_v46 = vld [vmem:[#allocation2 + $0x70] sm:$0xff] }
  0x6c   : > { %4436 = vmatprep.subr.bf16.mxu0 %v5070_v12  ;;  %5005 = vmatprep.subr.bf16.mxu1 %v5070_v12  ;;  %v5136_v12 = vld [vmem:[%s6443_s1 + $0x1a8] sm:$0xff]  }
  0x6f   : > { %4437 = vmatpush3.bf16.msra.mxu0 %v5071_v13  ;;  %5013 = vmatpush3.bf16.msra.mxu1 %v5071_v13  ;;  %v5138_v13 = vld [vmem:[%s6443_s1 + $0x28] sm:$0xff]  }
  0x70   : > { %4486 = vmatprep.subr.bf16.mxu1 %v5077_v16  ;;  %4550 = vmatprep.subr.bf16.mxu0 %v5078_v17  ;;  %v5139_v16 = vld [vmem:[%s6443_s1 + $0x1e0] sm:$0xff]  }
  0x71   : > { %v5141_v17 = vld [vmem:[%s6443_s1 + $0x60] sm:$0xff]  }
  0x72   : > { %718 = vmatmul.mubr.bf16.vlgmr.msra.gmra.mxu0 %v5495_v15  ;;  %750 = vmatmul.mubr.bf16.vlgmr.msra.gmra.mxu1 %v5493_v14 }
  0x73   : > { %4487 = vmatpush3.bf16.msra.mxu1 %v5079_v18  ;;  %4551 = vmatpush3.bf16.msra.mxu0 %v5080_v19  ;;  %v5140_v18 = vld [vmem:[%s6443_s1 + $0x1a0] sm:$0xff]  }
  0x74   : > { %4488 = vmatprep.subr.bf16.mxu1 %v5081_v20  ;;  %4552 = vmatprep.subr.bf16.mxu0 %v5082_v21  ;;  %v5142_v19 = vld [vmem:[%s6443_s1 + $0x20] sm:$0xff]   ;;  %v5143_v20 = vld [vmem:[%s6443_s1 + $0x1d8] sm:$0xff]  }
  0x75   : > { %725 = vmatprep.mubr.bf16.mxu0 %v5515_v22  ;;  %757 = vmatprep.mubr.bf16.mxu1 %v5520_v24  ;;  %v5145_v21 = vld [vmem:[%s6443_s1 + $0x58] sm:$0xff]  }
  0x77   : > { %4489 = vmatpush3.bf16.msra.mxu1 %v5083_v23  ;;  %4553 = vmatpush3.bf16.msra.mxu0 %v5084_v25  ;;  %v5144_v23 = vld [vmem:[%s6443_s1 + $0x198] sm:$0xff]  }
  0x78   : > { %4490 = vmatprep.subr.bf16.mxu1 %v5091_v26  ;;  %4554 = vmatprep.subr.bf16.mxu0 %v5092_v29  ;;  %v5146_v25 = vld [vmem:[%s6443_s1 + $0x18] sm:$0xff]   ;;  %v5147_v26 = vld [vmem:[%s6443_s1 + $0x1d0] sm:$0xff]  }
  0x79   : > { %v5149_v29 = vld [vmem:[%s6443_s1 + $0x50] sm:$0xff]  }
  0x7a   : > { %726 = vmatmul.mubr.bf16.gmra.mxu0 %v5530_v27  ;;  %758 = vmatmul.mubr.bf16.gmra.mxu1 %v5532_v28 }
  0x7b   : > { %4491 = vmatpush3.bf16.msra.mxu1 %v5093_v30  ;;  %4555 = vmatpush3.bf16.msra.mxu0 %v5094_v31  ;;  %v5148_v30 = vld [vmem:[%s6443_s1 + $0x190] sm:$0xff]  }
  0x7c   : > { %4492 = vmatprep.subr.bf16.mxu1 %v5095_v32  ;;  %4556 = vmatprep.subr.bf16.mxu0 %v5096_v33  ;;  %v5150_v31 = vld [vmem:[%s6443_s1 + $0x10] sm:$0xff]   ;;  %v5151_v32 = vld [vmem:[%s6443_s1 + $0x1c8] sm:$0xff]  }
  0x7d   : > { %733 = vmatprep.mubr.bf16.mxu0 %v5551_v34  ;;  %765 = vmatprep.mubr.bf16.mxu1 %v5556_v36  ;;  %v5153_v33 = vld [vmem:[%s6443_s1 + $0x48] sm:$0xff]  }
  0x7f   : > { %4493 = vmatpush3.bf16.msra.mxu1 %v5097_v35  ;;  %4557 = vmatpush3.bf16.msra.mxu0 %v5098_v37  ;;  %v5152_v35 = vld [vmem:[%s6443_s1 + $0x188] sm:$0xff]  }
  0x80   : > { %4494 = vmatprep.subr.bf16.mxu1 %v5105_v38  ;;  %4558 = vmatprep.subr.bf16.mxu0 %v5106_v41  ;;  %v5154_v37 = vld [vmem:[%s6443_s1 + $0x8] sm:$0xff]   ;;  %v5155_v38 = vld [vmem:[%s6443_s1 + $0x1c0] sm:$0xff]  }
  0x81   : > { %v5157_v41 = vld [vmem:[%s6443_s1 + $0x40] sm:$0xff]  }
  0x82   : > { %734 = vmatmul.mubr.bf16.gmra.mxu0 %v5566_v39  ;;  %766 = vmatmul.mubr.bf16.gmra.mxu1 %v5568_v40 }
  0x83   : > { %4495 = vmatpush3.bf16.msra.mxu1 %v5107_v42  ;;  %4559 = vmatpush3.bf16.msra.mxu0 %v5108_v43  ;;  %v5156_v42 = vld [vmem:[%s6443_s1 + $0x180] sm:$0xff]  }
  0x84   : > { %4496 = vmatprep.subr.bf16.mxu1 %v5109_v44  ;;  %4560 = vmatprep.subr.bf16.mxu0 %v5110_v47  ;;  %v5158_v43 = vld [vmem:[%s6443_s1] sm:$0xff]   ;;  %v5159_v44 = vld [vmem:[%s6443_s1 + $0x378] sm:$0xff]   ;;  %v1071_v47 = vld [vmem:[#allocation2 + $0x90] sm:$0xff] }
  0x85   : > { %741 = vmatprep.mubr.bf16.mxu0 %v5590_v49  ;;  %773 = vmatprep.mubr.bf16.mxu1 %v5592_v50 }
  0x87   : > { %4497 = vmatpush3.bf16.msra.mxu1 %v5111_v48  ;;  %4561 = vmatpush3.bf16.msra.mxu0 %v5112_v51  ;;  %v5763_v48 = vcombine.high %v1070_v46, %v1071_v47  ;;  %v5769_v51 = vcombine.low %v1070_v46, %v1071_v47  ;;  %v5222_v46 = vld [vmem:[%s6443_s1 + $0x420] sm:$0xff]   ;;  %v5223_v47 = vld [vmem:[%s6443_s1 + $0x158] sm:$0xff]  }
  0x88   : > { %4498 = vmatprep.subr.bf16.mxu1 %v5116_v52  ;;  %4562 = vmatprep.subr.bf16.mxu0 %v5117_v54  ;;  %v5163_v52 = vld [vmem:[%s6443_s1 + $0x370] sm:$0xff]  }
  0x89   : > { %v5164_v54 = vld [vmem:[%s6443_s1 + $0x330] sm:$0xff]  }
  0x8a   : > { %742 = vmatmul.mubr.bf16.gmra.mxu0 %v5612_v56  ;;  %774 = vmatmul.mubr.bf16.gmra.mxu1 %v5602_v53 }
  0x8b   : > { %4499 = vmatpush3.bf16.msra.mxu1 %v5118_v55  ;;  %4563 = vmatpush3.bf16.msra.mxu0 %v5119_v57  ;;  %v5165_v55 = vld [vmem:[%s6443_s1 + $0x2f0] sm:$0xff]  }
  0x8c   : > { %4500 = vmatprep.subr.bf16.mxu1 %v5120_v58  ;;  %4564 = vmatprep.subr.bf16.mxu0 %v5121_v59  ;;  %v5166_v57 = vld [vmem:[%s6443_s1 + $0x2b0] sm:$0xff]   ;;  %v5167_v58 = vld [vmem:[%s6443_s1 + $0x368] sm:$0xff]  }
  0x8d   : > { %990 = vmatprep.mubr.bf16.mxu1 %v5628_v61  ;;  %1313 = vmatprep.mubr.bf16.mxu0 %v5515_v22  ;;  %v5169_v59 = vld [vmem:[%s6443_s1 + $0x2e8] sm:$0xff]  }
  0x8f   : > { %4501 = vmatpush3.bf16.msra.mxu1 %v5122_v60  ;;  %4565 = vmatpush3.bf16.msra.mxu0 %v5123_v62  ;;  %v5168_v60 = vld [vmem:[%s6443_s1 + $0x328] sm:$0xff]   ;;  %v5173_v62 = vld [vmem:[%s6443_s1 + $0x2e0] sm:$0xff]  }
  0x90   : > { %4614 = vmatprep.subr.bf16.mxu1 %v5127_v0  ;;  %4678 = vmatprep.subr.bf16.mxu0 %v5129_v1  ;;  %v5174_v0 = vld [vmem:[%s6443_s1 + $0x2a0] sm:$0xff]   ;;  %v5176_v1 = vld [vmem:[%s6443_s1 + $0x358] sm:$0xff]  }
  0x92   : > { %991 = vmatmul.mubr.bf16.vlgmr.msra.gmra.mxu1 %v5633_v63  ;;  %1314 = vmatmul.mubr.bf16.vlgmr.msra.gmra.mxu0 %v5530_v27 }
  0x93   : > { %4615 = vmatpush3.bf16.msra.mxu1 %v5128_v2  ;;  %4679 = vmatpush3.bf16.msra.mxu0 %v5130_v3  ;;  %v5179_v2 = vld [vmem:[%s6443_s1 + $0x298] sm:$0xff]   ;;  %v5183_v3 = vld [vmem:[%s6443_s1 + $0x350] sm:$0xff]  }
  0x94   : > { %998 = vmatprep.mubr.bf16.mxu1 %v5472_v5  ;;  %1321 = vmatprep.mubr.bf16.mxu0 %v5551_v34 }
  0x95   : > { %4616 = vmatprep.subr.bf16.mxu1 %v5131_v4  ;;  %4680 = vmatprep.subr.bf16.mxu0 %v5133_v6  ;;  %v5185_v4 = vld [vmem:[%s6443_s1 + $0x2d0] sm:$0xff]  }
  0x96   : > { %v5184_v6 = vld [vmem:[%s6443_s1 + $0x310] sm:$0xff]  }
  0x97   : > { %4617 = vmatpush3.bf16.msra.mxu1 %v5132_v7  ;;  %4681 = vmatpush3.bf16.msra.mxu0 %v5134_v9  ;;  %v5186_v7 = vld [vmem:[%s6443_s1 + $0x290] sm:$0xff]   ;;  %v5190_v9 = vld [vmem:[%s6443_s1 + $0x348] sm:$0xff]  }
  0x98   : > { %4618 = vmatprep.subr.bf16.mxu1 %v5135_v10  ;;  %4682 = vmatprep.subr.bf16.mxu0 %v5137_v11  ;;  %v5193_v10 = vld [vmem:[%s6443_s1 + $0x288] sm:$0xff]   ;;  %v5194_v11 = vld [vmem:[%s6443_s1 + $0x340] sm:$0xff]  }
  0x9a   : > { %999 = vmatmul.mubr.bf16.gmra.mxu1 %v5495_v15  ;;  %1322 = vmatmul.mubr.bf16.gmra.mxu0 %v5566_v39 }
  0x9b   : > { %1006 = vmatprep.mubr.bf16.mxu1 %v5515_v22  ;;  %1329 = vmatprep.mubr.bf16.mxu0 %v5590_v49 }
  0x9c   : > { %4619 = vmatpush3.bf16.msra.mxu1 %v5136_v12  ;;  %4683 = vmatpush3.bf16.msra.mxu0 %v5138_v13  ;;  %v5196_v12 = vld [vmem:[%s6443_s1 + $0x2c0] sm:$0xff]  }
  0x9d   : > { %4620 = vmatprep.subr.bf16.mxu1 %v5139_v16  ;;  %4684 = vmatprep.subr.bf16.mxu0 %v5141_v17  ;;  %v5195_v13 = vld [vmem:[%s6443_s1 + $0x300] sm:$0xff]   ;;  %v5204_v17 = vld [vmem:[%s6443_s1 + $0x178] sm:$0xff]  }
  0x9e   : > { %v5197_v16 = vld [vmem:[%s6443_s1 + $0x280] sm:$0xff]  }
  0xa0   : > { %4621 = vmatpush3.bf16.msra.mxu1 %v5140_v18  ;;  %4685 = vmatpush3.bf16.msra.mxu0 %v5142_v19  ;;  %v5887_v18 = vld [vmem:[#allocation2 + $0x2c] ss:$24 sps:$4 sm:$0xff]   ;;  %v5894_v19 = vld [vmem:[#allocation2 + $0x5c] ss:$-72 sps:$4 sm:$0xff]  }
  0xa1   : > { %4622 = vmatprep.subr.bf16.mxu1 %v5143_v20  ;;  %4686 = vmatprep.subr.bf16.mxu0 %v5145_v21  ;;  %v5249_v20 = vld [vmem:[#allocation2 + $0x58] ss:$-72 sps:$4 sm:$0xff]  }
  0xa2   : > { %1007 = vmatmul.mubr.bf16.gmra.mxu1 %v5530_v27  ;;  %1330 = vmatmul.mubr.bf16.gmra.mxu0 %v5612_v56  ;;  %v5899_v21 = vld [vmem:[#allocation2 + $0x58] ss:$-72 sps:$4 sm:$0xff]  }
  0xa3   : > { %1014 = vmatprep.mubr.bf16.mxu1 %v5551_v34  ;;  %1337 = vmatprep.mubr.bf16.mxu0 %v5474_v8 }
  0xa4   : > { %4623 = vmatpush3.bf16.msra.mxu1 %v5144_v23  ;;  %4687 = vmatpush3.bf16.msra.mxu0 %v5146_v25  ;;  %v5913_v23 = vld [vmem:[#allocation2 + $0x30] ss:$56 sps:$4 sm:$0xff]  }
  0xa5   : > { %4624 = vmatprep.subr.bf16.mxu1 %v5147_v26  ;;  %4688 = vmatprep.subr.bf16.mxu0 %v5149_v29  ;;  %v5915_v25 = vld [vmem:[#allocation2 + $0x50] ss:$-56 sps:$4 sm:$0xff]   ;;  %v5923_v26 = vld [vmem:[#allocation2 + $0x7c] ss:$8 sps:$4 sm:$0xff]  }
  0xa6   : > { %v5212_v29 = vld [vmem:[%s6443_s1 + $0x130] sm:$0xff]  }
  0xa8   : > { %4625 = vmatpush3.bf16.msra.mxu1 %v5148_v30  ;;  %4689 = vmatpush3.bf16.msra.mxu0 %v5150_v31  ;;  %v5214_v30 = vld [vmem:[%s6443_s1 + $0x430] sm:$0xff]   ;;  %v2057_v31 = vld [vmem:[#allocation2 + $0x8] sm:$0xff] }
  0xa9   : > { %4626 = vmatprep.subr.bf16.mxu1 %v5151_v32  ;;  %4690 = vmatprep.subr.bf16.mxu0 %v5153_v33  ;;  %v2058_v32 = vld [vmem:[#allocation2 + $0x88] sm:$0xff] }
  0xaa   : > { %1015 = vmatmul.mubr.bf16.gmra.mxu1 %v5566_v39  ;;  %1338 = vmatmul.mubr.bf16.gmra.mxu0 %v5493_v14  ;;  %v5215_v33 = vld [vmem:[%s6443_s1 + $0x168] sm:$0xff]  }
  0xab   : > { %1022 = vmatprep.mubr.bf16.mxu1 %v5590_v49  ;;  %1345 = vmatprep.mubr.bf16.mxu0 %v5520_v24 }
  0xac   : > { %4627 = vmatpush3.bf16.msra.mxu1 %v5152_v35  ;;  %4691 = vmatpush3.bf16.msra.mxu0 %v5154_v37  ;;  %v5217_v35 = vld [vmem:[%s6443_s1 + $0x468] sm:$0xff]   ;;  %v5947_v37 = vld [vmem:[#allocation2 + $0x78] ss:$8 sps:$4 sm:$0xff]  }
  0xad   : > { %4628 = vmatprep.subr.bf16.mxu1 %v5155_v38  ;;  %4692 = vmatprep.subr.bf16.mxu0 %v5157_v41  ;;  %v5949_v38 = vcombine.high %v2057_v31, %v2058_v32  ;;  %v5216_v41 = vld [vmem:[%s6443_s1 + $0x128] sm:$0xff]  }
  0xb0   : > { %4629 = vmatpush3.bf16.msra.mxu1 %v5156_v42  ;;  %4693 = vmatpush3.bf16.msra.mxu0 %v5158_v43  ;;  %v5218_v42 = vld [vmem:[%s6443_s1 + $0x428] sm:$0xff]   ;;  %v5219_v43 = vld [vmem:[%s6443_s1 + $0x160] sm:$0xff]  }
  0xb1   : > { %4742 = vmatprep.subr.bf16.mxu1 %v5159_v44  ;;  %4806 = vmatprep.subr.bf16.mxu0 %v5161_v45  ;;  %v5221_v44 = vld [vmem:[%s6443_s1 + $0x460] sm:$0xff]  }
  0xb2   : > { %1023 = vmatmul.mubr.bf16.gmra.mxu1 %v5612_v56  ;;  %1346 = vmatmul.mubr.bf16.gmra.mxu0 %v5532_v28  ;;  %v5220_v45 = vld [vmem:[%s6443_s1 + $0x120] sm:$0xff]  }
  0xb3   : > { %1030 = vmatprep.mubr.bf16.mxu1 %v5474_v8  ;;  %1353 = vmatprep.mubr.bf16.mxu0 %v5556_v36 }
  0xba   : > { %1031 = vmatmul.mubr.bf16.gmra.mxu1 %v5493_v14  ;;  %1354 = vmatmul.mubr.bf16.gmra.mxu0 %v5568_v40 }
  0xbb   : > { %1038 = vmatprep.mubr.bf16.mxu1 %v5520_v24  ;;  %1361 = vmatprep.mubr.bf16.mxu0 %v5592_v50  ;;  %v5160_v24 = vld [vmem:[%s6443_s1 + $0x338] sm:$0xff]  }
  0xc2   : > { %1039 = vmatmul.mubr.bf16.gmra.mxu1 %v5532_v28  ;;  %1362 = vmatmul.mubr.bf16.gmra.mxu0 %v5602_v53  ;;  %v5162_v28 = vld [vmem:[%s6443_s1 + $0x2b8] sm:$0xff]  }
  0xc3   : > { %1046 = vmatprep.mubr.bf16.mxu1 %v5556_v36  ;;  %1369 = vmatprep.mubr.bf16.mxu0 %v5763_v48 }
  0xca   : > { %1047 = vmatmul.mubr.bf16.gmra.mxu1 %v5568_v40  ;;  %1370 = vmatmul.mubr.bf16.gmra.mxu0 %v5769_v51 }
  0xcb   : > { %1715 = vmatprep.mubr.bf16.mxu1 %v5472_v5  ;;  %1988 = vmatprep.mubr.bf16.mxu0 %v5628_v61  ;;  %v5170_v61 = vld [vmem:[%s6443_s1 + $0x2a8] sm:$0xff]  }
  0xd2   : > { %1716 = vmatmul.mubr.bf16.vlgmr.msra.gmra.mxu1 %v5495_v15  ;;  %1989 = vmatmul.mubr.bf16.vlgmr.msra.gmra.mxu0 %v5633_v63  ;;  %v5172_v63 = vld [vmem:[%s6443_s1 + $0x320] sm:$0xff]  }
  0xd3   : > { %4743 = vmatpush3.bf16.msra.mxu1 %v5160_v24  ;;  %4807 = vmatpush3.bf16.msra.mxu0 %v5162_v28  ;;  %v5225_v24 = vld [vmem:[%s6443_s1 + $0x458] sm:$0xff]   ;;  %v5979_v28 = vcombine.low %v2057_v31, %v2058_v32 }
  0xd4   : > { %1723 = vmatprep.mubr.bf16.mxu1 %v5515_v22  ;;  %1996 = vmatprep.mubr.bf16.mxu0 %v5472_v5  ;;  %v5171_v5 = vld [vmem:[%s6443_s1 + $0x360] sm:$0xff]  }
  0xd5   : > { %4744 = vmatprep.subr.bf16.mxu1 %v5163_v52  ;;  %4808 = vmatprep.subr.bf16.mxu0 %v5165_v55  ;;  %v5224_v52 = vld [vmem:[%s6443_s1 + $0x118] sm:$0xff]   ;;  %v5230_v55 = vld [vmem:[%s6443_s1 + $0x150] sm:$0xff]  }
  0xd7   : > { %4745 = vmatpush3.bf16.msra.mxu1 %v5164_v54  ;;  %4809 = vmatpush3.bf16.msra.mxu0 %v5166_v57  ;;  %v5226_v54 = vld [vmem:[%s6443_s1 + $0x418] sm:$0xff]   ;;  %v5232_v57 = vld [vmem:[%s6443_s1 + $0x450] sm:$0xff]  }
  0xd8   : > { %4746 = vmatprep.subr.bf16.mxu1 %v5167_v58  ;;  %4810 = vmatprep.subr.bf16.mxu0 %v5169_v59  ;;  %v5231_v58 = vld [vmem:[%s6443_s1 + $0x110] sm:$0xff]  }
  0xd9   : > { %v5233_v59 = vld [vmem:[%s6443_s1 + $0x410] sm:$0xff]  }
  0xda   : > { %1724 = vmatmul.mubr.bf16.gmra.mxu1 %v5530_v27  ;;  %1997 = vmatmul.mubr.bf16.gmra.mxu0 %v5495_v15  ;;  %v5178_v15 = vld [vmem:[%s6443_s1 + $0x2d8] sm:$0xff]  }
  0xdb   : > { %1731 = vmatprep.mubr.bf16.mxu1 %v5551_v34  ;;  %2004 = vmatprep.mubr.bf16.mxu0 %v5515_v22  ;;  %v5177_v22 = vld [vmem:[%s6443_s1 + $0x318] sm:$0xff]  }
  0xdc   : > { %4747 = vmatpush3.bf16.msra.mxu1 %v5168_v60  ;;  %4811 = vmatpush3.bf16.msra.mxu0 %v5170_v61  ;;  %v5237_v60 = vld [vmem:[%s6443_s1 + $0x148] sm:$0xff]  }
  0xdd   : > { %4748 = vmatprep.subr.bf16.mxu1 %v5171_v5  ;;  %4812 = vmatprep.subr.bf16.mxu0 %v5173_v62  ;;  %v5239_v61 = vld [vmem:[%s6443_s1 + $0x448] sm:$0xff]  }
  0xde   : > { %v5238_v5 = vld [vmem:[%s6443_s1 + $0x108] sm:$0xff]  }
  0xdf   : > { %v5240_v62 = vld [vmem:[%s6443_s1 + $0x408] sm:$0xff]  }
  0xe0   : > { %4749 = vmatpush3.bf16.msra.mxu1 %v5172_v63  ;;  %4813 = vmatpush3.bf16.msra.mxu0 %v5174_v0  ;;  %v5241_v63 = vld [vmem:[%s6443_s1 + $0x140] sm:$0xff]  }
  0xe1   : > { %4750 = vmatprep.subr.bf16.mxu1 %v5176_v1  ;;  %4814 = vmatprep.subr.bf16.mxu0 %v5178_v15  ;;  %v5243_v0 = vld [vmem:[%s6443_s1 + $0x440] sm:$0xff]  }
  0xe2   : > { %1732 = vmatmul.mubr.bf16.gmra.mxu1 %v5566_v39  ;;  %2005 = vmatmul.mubr.bf16.gmra.mxu0 %v5530_v27  ;;  %v5192_v27 = vld [vmem:[%s6443_s1 + $0x2c8] sm:$0xff]   ;;  %v5242_v1 = vld [vmem:[%s6443_s1 + $0x100] sm:$0xff]  }
  0xe3   : > { %1739 = vmatprep.mubr.bf16.mxu1 %v5590_v49  ;;  %2012 = vmatprep.mubr.bf16.mxu0 %v5551_v34  ;;  %v5191_v34 = vld [vmem:[%s6443_s1 + $0x308] sm:$0xff]   ;;  %v5244_v15 = vld [vmem:[%s6443_s1 + $0x400] sm:$0xff]  }
  0xe4   : > { %4751 = vmatpush3.bf16.msra.mxu1 %v5177_v22  ;;  %4815 = vmatpush3.bf16.msra.mxu0 %v5179_v2  ;;  %v6031_v22 = vld [vmem:[#allocation2 + $0x9c] ss:$-56 sps:$4 sm:$0xff]  }
  0xe5   : > { %4752 = vmatprep.subr.bf16.mxu1 %v5183_v3  ;;  %4816 = vmatprep.subr.bf16.mxu0 %v5185_v4 }
  0xe8   : > { %4753 = vmatpush3.bf16.msra.mxu1 %v5184_v6  ;;  %4817 = vmatpush3.bf16.msra.mxu0 %v5186_v7 }
  0xe9   : > { %4754 = vmatprep.subr.bf16.mxu1 %v5190_v9  ;;  %4818 = vmatprep.subr.bf16.mxu0 %v5192_v27 }
  0xea   : > { %1740 = vmatmul.mubr.bf16.gmra.mxu1 %v5612_v56  ;;  %2013 = vmatmul.mubr.bf16.gmra.mxu0 %v5566_v39  ;;  %v5206_v39 = vld [vmem:[%s6443_s1 + $0x478] sm:$0xff]  }
  0xeb   : > { %1747 = vmatprep.mubr.bf16.mxu1 %v5474_v8  ;;  %2020 = vmatprep.mubr.bf16.mxu0 %v5590_v49  ;;  %v5248_v8 = vld [vmem:[#allocation2 + $0x5c] ss:$-72 sps:$4 sm:$0xff]   ;;  %v5892_v49 = vld [vmem:[#allocation2 + $0x28] ss:$24 sps:$4 sm:$0xff]  }
  0xec   : > { %4755 = vmatpush3.bf16.msra.mxu1 %v5191_v34  ;;  %4819 = vmatpush3.bf16.msra.mxu0 %v5193_v10  ;;  %v6045_v34 = vld [vmem:[#allocation2 + $0x98] ss:$-56 sps:$4 sm:$0xff]   ;;  %v6047_v10 = vld [vmem:[#allocation2 + $0x24] ss:$40 sps:$4 sm:$0xff]  }
  0xed   : > { %4756 = vmatprep.subr.bf16.mxu1 %v5194_v11  ;;  %4820 = vmatprep.subr.bf16.mxu0 %v5196_v12 }
  0xf0   : > { %4757 = vmatpush3.bf16.msra.mxu1 %v5195_v13  ;;  %4821 = vmatpush3.bf16.msra.mxu0 %v5197_v16 }
  0xf1   : > { %4870 = vmatprep.subr.bf16.mxu1 %v5204_v17  ;;  %4934 = vmatprep.subr.bf16.mxu0 %v5206_v39 }
  0xf2   : > { %1748 = vmatmul.mubr.bf16.gmra.mxu1 %v5493_v14  ;;  %2021 = vmatmul.mubr.bf16.gmra.mxu0 %v5612_v56  ;;  %v5905_v14 = vld [vmem:[#allocation2 + $0x34] ss:$56 sps:$4 sm:$0xff]  }
  0xf3   : > { %1755 = vmatprep.mubr.bf16.mxu1 %v5248_v8  ;;  %2028 = vmatprep.mubr.bf16.mxu0 %v5887_v18  ;;  %v5907_v56 = vld [vmem:[#allocation2 + $0x54] ss:$-56 sps:$4 sm:$0xff]  }
  0xfa   : > { %1756 = vmatmul.mubr.bf16.gmra.mxu1 %v5249_v20  ;;  %2029 = vmatmul.mubr.bf16.gmra.mxu0 %v5892_v49 }
  0xfb   : > { %1763 = vmatprep.mubr.bf16.mxu1 %v5556_v36  ;;  %2036 = vmatprep.mubr.bf16.mxu0 %v5894_v19 }
 0x102   : > { %1764 = vmatmul.mubr.bf16.gmra.mxu1 %v5568_v40  ;;  %2037 = vmatmul.mubr.bf16.gmra.mxu0 %v5899_v21 }
 0x103   : > { %1771 = vmatprep.mubr.bf16.mxu1 %v5592_v50  ;;  %2044 = vmatprep.mubr.bf16.mxu0 %v5556_v36  ;;  %v5205_v36 = vld [vmem:[%s6443_s1 + $0x138] sm:$0xff]  }
 0x104   : > { %v5207_v50 = vld [vmem:[%s6443_s1 + $0x438] sm:$0xff]  }
 0x10a   : > { %1772 = vmatmul.mubr.bf16.gmra.mxu1 %v5602_v53  ;;  %2045 = vmatmul.mubr.bf16.gmra.mxu0 %v5568_v40  ;;  %v5211_v40 = vld [vmem:[%s6443_s1 + $0x170] sm:$0xff]  }
 0x10b   : > { %2310 = vmatprep.mubr.bf16.mxu1 %v5905_v14  ;;  %2745 = vmatprep.mubr.bf16.mxu0 %v5907_v56  ;;  %v5213_v53 = vld [vmem:[%s6443_s1 + $0x470] sm:$0xff]  }
 0x112   : > { %2311 = vmatmul.mubr.bf16.vlgmr.msra.gmra.mxu1 %v5913_v23  ;;  %2746 = vmatmul.mubr.bf16.vlgmr.msra.gmra.mxu0 %v5915_v25 }
 0x113   : > { %4871 = vmatpush3.bf16.msra.mxu1 %v5205_v36  ;;  %4935 = vmatpush3.bf16.msra.mxu0 %v5207_v50 }
 0x114   : > { %2318 = vmatprep.mubr.bf16.mxu1 %v5923_v26  ;;  %2753 = vmatprep.mubr.bf16.mxu0 %v5905_v14 }
 0x115   : > { %4872 = vmatprep.subr.bf16.mxu1 %v5211_v40  ;;  %4936 = vmatprep.subr.bf16.mxu0 %v5213_v53  ;;  %v6065_v40 = vld [vmem:[#allocation2 + $0x20] ss:$40 sps:$4 sm:$0xff]  }
 0x117   : > { %4873 = vmatpush3.bf16.msra.mxu1 %v5212_v29  ;;  %4937 = vmatpush3.bf16.msra.mxu0 %v5214_v30 }
 0x118   : > { %4874 = vmatprep.subr.bf16.mxu1 %v5215_v33  ;;  %4938 = vmatprep.subr.bf16.mxu0 %v5217_v35 }
 0x11a   : > { %2319 = vmatmul.mubr.bf16.gmra.mxu1 %v5947_v37  ;;  %2754 = vmatmul.mubr.bf16.gmra.mxu0 %v5913_v23 }
 0x11b   : > { %2326 = vmatprep.mubr.bf16.mxu1 %v5949_v38  ;;  %2761 = vmatprep.mubr.bf16.mxu0 %v5923_v26 }
 0x11c   : > { %4875 = vmatpush3.bf16.msra.mxu1 %v5216_v41  ;;  %4939 = vmatpush3.bf16.msra.mxu0 %v5218_v42 }
 0x11d   : > { %4876 = vmatprep.subr.bf16.mxu1 %v5219_v43  ;;  %4940 = vmatprep.subr.bf16.mxu0 %v5221_v44  ;;  %v5247_v44 = vld [vmem:[#allocation2 + $0x4] ss:$56 sps:$4 sm:$0xff]  }
 0x120   : > { %4877 = vmatpush3.bf16.msra.mxu1 %v5220_v45  ;;  %4941 = vmatpush3.bf16.msra.mxu0 %v5222_v46 }
 0x121   : > { %4878 = vmatprep.subr.bf16.mxu1 %v5223_v47  ;;  %4942 = vmatprep.subr.bf16.mxu0 %v5225_v24 }
 0x122   : > { %2327 = vmatmul.mubr.bf16.gmra.mxu1 %v5979_v28  ;;  %2762 = vmatmul.mubr.bf16.gmra.mxu0 %v5947_v37 }
 0x123   : > { %2334 = vmatprep.mubr.bf16.mxu1 %v5887_v18  ;;  %2769 = vmatprep.mubr.bf16.mxu0 %v5949_v38 }
 0x124   : > { %4879 = vmatpush3.bf16.msra.mxu1 %v5224_v52  ;;  %4943 = vmatpush3.bf16.msra.mxu0 %v5226_v54 }
 0x125   : > { %4880 = vmatprep.subr.bf16.mxu1 %v5230_v55  ;;  %4944 = vmatprep.subr.bf16.mxu0 %v5232_v57 }
 0x128   : > { %4881 = vmatpush3.bf16.msra.mxu1 %v5231_v58  ;;  %4945 = vmatpush3.bf16.msra.mxu0 %v5233_v59  ;;  %v5245_v59 = vld [vmem:[#allocation2] ss:$56 sps:$4 sm:$0xff]  }
 0x129   : > { %4882 = vmatprep.subr.bf16.mxu1 %v5237_v60  ;;  %4946 = vmatprep.subr.bf16.mxu0 %v5239_v61 }
 0x12a   : > { %2335 = vmatmul.mubr.bf16.gmra.mxu1 %v5892_v49  ;;  %2770 = vmatmul.mubr.bf16.gmra.mxu0 %v5979_v28 }
 0x12b   : > { %2342 = vmatprep.mubr.bf16.mxu1 %v5894_v19  ;;  %2777 = vmatprep.mubr.bf16.mxu0 %v5887_v18 }
 0x12c   : > { %4883 = vmatpush3.bf16.msra.mxu1 %v5238_v5  ;;  %4947 = vmatpush3.bf16.msra.mxu0 %v5240_v62 }
 0x12d   : > { %4884 = vmatprep.subr.bf16.mxu1 %v5241_v63  ;;  %4948 = vmatprep.subr.bf16.mxu0 %v5243_v0 }
 0x130   : > { %4885 = vmatpush3.bf16.msra.mxu1 %v5242_v1  ;;  %4949 = vmatpush3.bf16.msra.mxu0 %v5244_v15 }
 0x132   : > { %v6033_v2 = vpop.f32.mrf.mxu0  ;;  %v4462_v3 = vpop.f32.mrf.mxu1  ;;  %2343 = vmatmul.mubr.bf16.gmra.mxu1 %v5899_v21  ;;  %2778 = vmatmul.mubr.bf16.gmra.mxu0 %v5892_v49 }
 0x133   : > { %2350 = vmatprep.mubr.bf16.mxu1 %v6031_v22  ;;  %2785 = vmatprep.mubr.bf16.mxu0 %v5894_v19 }
 0x134   : > { %v6039_v4 = vpop.f32.mrf.mxu0  ;;  %v4463_v6 = vpop.f32.mrf.mxu1 }
 0x135   : > { %v6041_v7 = vadd.f32 %v4463_v6, %v4462_v3  ;;  %v4440_v1 = vadd.f32 %v6039_v4, %v6033_v2 }
 0x136   : > { %v6043_v9 = vpop.f32.mrf.mxu0  ;;  %v4465_v27 = vpop.f32.mrf.mxu1 }
 0x138   : > { %v6049_v11 = vpop.f32.mrf.mxu0  ;;  %v4466_v12 = vpop.f32.mrf.mxu1 }
 0x139   : > { %v6051_v13 = vadd.f32 %v4466_v12, %v4465_v27 }
 0x13a   : > { %v6053_v16 = vpop.f32.mrf.mxu0  ;;  %v4468_v17 = vpop.f32.mrf.mxu1  ;;  %2351 = vmatmul.mubr.bf16.gmra.mxu1 %v6045_v34  ;;  %2786 = vmatmul.mubr.bf16.gmra.mxu0 %v5899_v21 }
 0x13b   : > { %2358 = vmatprep.mubr.bf16.mxu1 %v6047_v10  ;;  %2793 = vmatprep.mubr.bf16.mxu0 %v6031_v22 }
 0x13c   : > { %v6059_v39 = vpop.f32.mrf.mxu0  ;;  %v4469_v8 = vpop.f32.mrf.mxu1 }
 0x13d   : > { %v6061_v20 = vadd.f32 %v4469_v8, %v4468_v17 }
 0x13e   : > { %v6063_v36 = vpop.f32.mrf.mxu0  ;;  %v4471_v50 = vpop.f32.mrf.mxu1 }
 0x140   : > { %v6067_v53 = vpop.f32.mrf.mxu0  ;;  %v4472_v29 = vpop.f32.mrf.mxu1 }
 0x141   : > { %v6069_v30 = vadd.f32 %v4472_v29, %v4471_v50  ;;  %v4443_v50 = vadd.f32 %v6049_v11, %v6043_v9  ;;  %v4446_v9 = vadd.f32 %v6059_v39, %v6053_v16 }
 0x142   : > { %v6071_v31 = vpop.f32.mrf.mxu0  ;;  %v4474_v32 = vpop.f32.mrf.mxu1  ;;  %2359 = vmatmul.mubr.bf16.gmra.mxu1 %v6065_v40  ;;  %2794 = vmatmul.mubr.bf16.gmra.mxu0 %v6045_v34 }
 0x143   : > { %2366 = vmatprep.mubr.bf16.mxu1 %v5763_v48  ;;  %2801 = vmatprep.mubr.bf16.mxu0 %v6047_v10 }
 0x144   : > { %v6077_v33 = vpop.f32.mrf.mxu0  ;;  %v4475_v35 = vpop.f32.mrf.mxu1 }
 0x145   : > { %v6079_v41 = vadd.f32 %v4475_v35, %v4474_v32 }
 0x146   : > { %v6081_v42 = vpop.f32.mrf.mxu0  ;;  %v4477_v43 = vpop.f32.mrf.mxu1 }
 0x148   : > { %v6083_v45 = vpop.f32.mrf.mxu0  ;;  %v4478_v46 = vpop.f32.mrf.mxu1 }
 0x149   : > { %v6085_v47 = vadd.f32 %v4478_v46, %v4477_v43 }
 0x14a   : > { %v6087_v24 = vpop.f32.mrf.mxu0  ;;  %v4480_v52 = vpop.f32.mrf.mxu1  ;;  %2367 = vmatmul.mubr.bf16.gmra.mxu1 %v5769_v51  ;;  %2802 = vmatmul.mubr.bf16.gmra.mxu0 %v6065_v40 }
 0x14b   : > { %3018 = vmatprep.mubr.bf16.mxu1 %v5247_v44  ;;  %3340 = vmatprep.mubr.bf16.mxu0 %v5905_v14 }
 0x14c   : > { %v6092_v48 = vpop.f32.mrf.mxu0  ;;  %v4481_v54 = vpop.f32.mrf.mxu1 }
 0x14d   : > { %v6094_v55 = vadd.f32 %v4481_v54, %v4480_v52 }
 0x14e   : > { %v6096_v57 = vpop.f32.mrf.mxu0  ;;  %v4483_v58 = vpop.f32.mrf.mxu1 }
 0x150   : > { %v6098_v60 = vpop.f32.mrf.mxu0  ;;  %v4484_v61 = vpop.f32.mrf.mxu1 }
 0x151   : > { %v6100_v5 = vadd.f32 %v4484_v61, %v4483_v58 }
 0x152   : > { %v4502_v51 = vpop.f32.mrf.mxu1  ;;  %v4566_v62 = vpop.f32.mrf.mxu0  ;;  %3019 = vmatmul.mubr.bf16.vlgmr.msra.gmra.mxu1 %v5245_v59  ;;  %3341 = vmatmul.mubr.bf16.vlgmr.msra.gmra.mxu0 %v5913_v23 }
 0x153   : > { %3026 = vmatprep.mubr.bf16.mxu1 %v5907_v56  ;;  %3348 = vmatprep.mubr.bf16.mxu0 %v5923_v26 }
 0x154   : > { %v4503_v63 = vpop.f32.mrf.mxu1  ;;  %v4567_v0 = vpop.f32.mrf.mxu0 }
 0x155   : > { %v4504_v15 = vadd.f32 %v4503_v63, %v4502_v51  ;;  %v4568_v12 = vadd.f32 %v4567_v0, %v4566_v62  ;;  %v4449_v51 = vadd.f32 %v6067_v53, %v6063_v36  ;;  %v4452_v36 = vadd.f32 %v6077_v33, %v6071_v31 }
 0x156   : > { %v4505_v3 = vpop.f32.mrf.mxu1  ;;  %v4569_v6 = vpop.f32.mrf.mxu0 }
 0x157   : > { %v993_v27 = vadd.f32 %v4504_v15, %v4440_v1 }
 0x158   : > { %v4506_v17 = vpop.f32.mrf.mxu1  ;;  %v4570_v8 = vpop.f32.mrf.mxu0 }
 0x159   : > { %v1378_v29 = vadd.f32 %v4568_v12, %v993_v27  ;;  %v4507_v32 = vadd.f32 %v4506_v17, %v4505_v3  ;;  %v4571_v4 = vadd.f32 %v4570_v8, %v4569_v6 }
 0x15a   : > { %v4508_v56 = vpop.f32.mrf.mxu1  ;;  %v4572_v35 = vpop.f32.mrf.mxu0  ;;  %3027 = vmatmul.mubr.bf16.gmra.mxu1 %v5915_v25  ;;  %3349 = vmatmul.mubr.bf16.gmra.mxu0 %v5947_v37 }
 0x15b   : > { %1394 = vst [vmem:[#allocation3] sm:$0xff] %v1378_v29  ;;  %v996_v2 = vadd.f32 %v4507_v32, %v4443_v50  ;;  %3034 = vmatprep.mubr.bf16.mxu1 %v5905_v14  ;;  %3356 = vmatprep.mubr.bf16.mxu0 %v5949_v38  ;;  %v4455_v50 = vadd.f32 %v6083_v45, %v6081_v42 }
 0x15c   : > { %v4509_v43 = vpop.f32.mrf.mxu1  ;;  %v4573_v44 = vpop.f32.mrf.mxu0  ;;  %v4458_v42 = vadd.f32 %v6092_v48, %v6087_v24 }
 0x15d   : > { %v1379_v11 = vadd.f32 %v4571_v4, %v996_v2  ;;  %v4510_v46 = vadd.f32 %v4509_v43, %v4508_v56  ;;  %v4574_v58 = vadd.f32 %v4573_v44, %v4572_v35 }
 0x15e   : > { %v4511_v52 = vpop.f32.mrf.mxu1  ;;  %v4575_v54 = vpop.f32.mrf.mxu0 }
 0x15f   : > { %1395 = vst [vmem:[#allocation3 + $0x8] sm:$0xff] %v1379_v11  ;;  %v1001_v25 = vadd.f32 %v4510_v46, %v4446_v9 }
 0x160   : > { %v4512_v59 = vpop.f32.mrf.mxu1  ;;  %v4576_v61 = vpop.f32.mrf.mxu0 }
 0x161   : > { %v1380_v14 = vadd.f32 %v4574_v58, %v1001_v25  ;;  %v4513_v62 = vadd.f32 %v4512_v59, %v4511_v52  ;;  %v4577_v39 = vadd.f32 %v4576_v61, %v4575_v54  ;;  %v4461_v52 = vadd.f32 %v6098_v60, %v6096_v57 }
 0x162   : > { %v4514_v63 = vpop.f32.mrf.mxu1  ;;  %v4578_v0 = vpop.f32.mrf.mxu0  ;;  %3035 = vmatmul.mubr.bf16.gmra.mxu1 %v5913_v23  ;;  %3357 = vmatmul.mubr.bf16.gmra.mxu0 %v5979_v28 }
 0x163   : > { %1396 = vst [vmem:[#allocation3 + $0x10] sm:$0xff] %v1380_v14  ;;  %v1004_v16 = vadd.f32 %v4513_v62, %v4449_v51  ;;  %3042 = vmatprep.mubr.bf16.mxu1 %v5923_v26  ;;  %3364 = vmatprep.mubr.bf16.mxu0 %v5887_v18 }
 0x164   : > { %v4515_v1 = vpop.f32.mrf.mxu1  ;;  %v4579_v15 = vpop.f32.mrf.mxu0 }
 0x165   : > { %v1381_v53 = vadd.f32 %v4577_v39, %v1004_v16  ;;  %v4516_v3 = vadd.f32 %v4515_v1, %v4514_v63  ;;  %v4580_v12 = vadd.f32 %v4579_v15, %v4578_v0 }
 0x166   : > { %v4517_v6 = vpop.f32.mrf.mxu1  ;;  %v4581_v27 = vpop.f32.mrf.mxu0 }
 0x167   : > { %1397 = vst [vmem:[#allocation3 + $0x18] sm:$0xff] %v1381_v53  ;;  %v1009_v23 = vadd.f32 %v4516_v3, %v4452_v36  ;;  %v3097_v3 = vld [vmem:[#allocation2 + $0x70] sm:$0xff] }
 0x168   : > { %v4518_v17 = vpop.f32.mrf.mxu1  ;;  %v4582_v8 = vpop.f32.mrf.mxu0 }
 0x169   : > { %v1382_v26 = vadd.f32 %v4580_v12, %v1009_v23  ;;  %v4519_v29 = vadd.f32 %v4518_v17, %v4517_v6  ;;  %v4583_v33 = vadd.f32 %v4582_v8, %v4581_v27  ;;  %v3098_v6 = vld [vmem:[#allocation2 + $0x90] sm:$0xff] }
 0x16a   : > { %v4520_v32 = vpop.f32.mrf.mxu1  ;;  %v4584_v56 = vpop.f32.mrf.mxu0  ;;  %3043 = vmatmul.mubr.bf16.gmra.mxu1 %v5947_v37  ;;  %3365 = vmatmul.mubr.bf16.gmra.mxu0 %v5892_v49 }
 0x16b   : > { %1398 = vst [vmem:[#allocation3 + $0x20] sm:$0xff] %v1382_v26  ;;  %v1012_v31 = vadd.f32 %v4519_v29, %v4455_v50  ;;  %3050 = vmatprep.mubr.bf16.mxu1 %v5949_v38  ;;  %3372 = vmatprep.mubr.bf16.mxu0 %v5894_v19  ;;  %v4322_v50 = vcombine.high %v3097_v3, %v3098_v6 }
 0x16c   : > { %v4521_v35 = vpop.f32.mrf.mxu1  ;;  %v4585_v2 = vpop.f32.mrf.mxu0 }
 0x16d   : > { %v1383_v45 = vadd.f32 %v4583_v33, %v1012_v31  ;;  %v4522_v4 = vadd.f32 %v4521_v35, %v4520_v32  ;;  %v4586_v9 = vadd.f32 %v4585_v2, %v4584_v56 }
 0x16e   : > { %v4523_v43 = vpop.f32.mrf.mxu1  ;;  %v4587_v44 = vpop.f32.mrf.mxu0 }
 0x16f   : > { %1399 = vst [vmem:[#allocation3 + $0x28] sm:$0xff] %v1383_v45  ;;  %v1017_v37 = vadd.f32 %v4522_v4, %v4458_v42  ;;  %v4321_v4 = vcombine.low %v3097_v3, %v3098_v6 }
 0x170   : > { %v4524_v11 = vpop.f32.mrf.mxu1  ;;  %v4588_v46 = vpop.f32.mrf.mxu0 }
 0x171   : > { %v1384_v38 = vadd.f32 %v4586_v9, %v1017_v37  ;;  %v4525_v54 = vadd.f32 %v4524_v11, %v4523_v43  ;;  %v4589_v48 = vadd.f32 %v4588_v46, %v4587_v44 }
 0x172   : > { %v4526_v25 = vpop.f32.mrf.mxu1  ;;  %v4590_v58 = vpop.f32.mrf.mxu0  ;;  %3051 = vmatmul.mubr.bf16.gmra.mxu1 %v5979_v28  ;;  %3373 = vmatmul.mubr.bf16.gmra.mxu0 %v5899_v21 }
 0x173   : > { %1400 = vst [vmem:[#allocation3 + $0x30] sm:$0xff] %v1384_v38  ;;  %v1020_v24 = vadd.f32 %v4525_v54, %v4461_v52  ;;  %3058 = vmatprep.mubr.bf16.mxu1 %v5887_v18  ;;  %3380 = vmatprep.mubr.bf16.mxu0 %v6031_v22 }
 0x174   : > { %v4527_v59 = vpop.f32.mrf.mxu1  ;;  %v4591_v61 = vpop.f32.mrf.mxu0 }
 0x175   : > { %v1385_v51 = vadd.f32 %v4589_v48, %v1020_v24  ;;  %v4528_v14 = vadd.f32 %v4527_v59, %v4526_v25  ;;  %v4592_v63 = vadd.f32 %v4591_v61, %v4590_v58 }
 0x176   : > { %v4529_v57 = vpop.f32.mrf.mxu1  ;;  %v4593_v60 = vpop.f32.mrf.mxu0 }
 0x177   : > { %1401 = vst [vmem:[#allocation3 + $0x38] sm:$0xff] %v1385_v51  ;;  %v1025_v62 = vadd.f32 %v4528_v14, %v6041_v7 }
 0x178   : > { %v4530_v28 = vpop.f32.mrf.mxu1  ;;  %v4594_v0 = vpop.f32.mrf.mxu0 }
 0x179   : > { %v1386_v16 = vadd.f32 %v4592_v63, %v1025_v62  ;;  %v4531_v39 = vadd.f32 %v4530_v28, %v4529_v57  ;;  %v4595_v36 = vadd.f32 %v4594_v0, %v4593_v60 }
 0x17a   : > { %v4532_v1 = vpop.f32.mrf.mxu1  ;;  %v4596_v15 = vpop.f32.mrf.mxu0  ;;  %3059 = vmatmul.mubr.bf16.gmra.mxu1 %v5892_v49  ;;  %3381 = vmatmul.mubr.bf16.gmra.mxu0 %v6045_v34 }
 0x17b   : > { %1402 = vst [vmem:[#allocation3 + $0x40] sm:$0xff] %v1386_v16  ;;  %v1028_v18 = vadd.f32 %v4531_v39, %v6051_v13  ;;  %3066 = vmatprep.mubr.bf16.mxu1 %v5894_v19  ;;  %3388 = vmatprep.mubr.bf16.mxu0 %v6047_v10 }
 0x17c   : > { %v4533_v7 = vpop.f32.mrf.mxu1  ;;  %v4597_v53 = vpop.f32.mrf.mxu0 }
 0x17d   : > { %v1387_v27 = vadd.f32 %v4595_v36, %v1028_v18  ;;  %v4534_v23 = vadd.f32 %v4533_v7, %v4532_v1  ;;  %v4598_v8 = vadd.f32 %v4597_v53, %v4596_v15 }
 0x17e   : > { %v4535_v12 = vpop.f32.mrf.mxu1  ;;  %v4599_v17 = vpop.f32.mrf.mxu0 }
 0x17f   : > { %1403 = vst [vmem:[#allocation3 + $0x48] sm:$0xff] %v1387_v27  ;;  %v1033_v49 = vadd.f32 %v4534_v23, %v6061_v20 }
 0x180   : > { %v4536_v26 = vpop.f32.mrf.mxu1  ;;  %v4600_v13 = vpop.f32.mrf.mxu0 }
 0x181   : > { %v1388_v29 = vadd.f32 %v4598_v8, %v1033_v49  ;;  %v4537_v32 = vadd.f32 %v4536_v26, %v4535_v12  ;;  %v4601_v31 = vadd.f32 %v4600_v13, %v4599_v17 }
 0x182   : > { %v4538_v19 = vpop.f32.mrf.mxu1  ;;  %v4602_v56 = vpop.f32.mrf.mxu0  ;;  %3067 = vmatmul.mubr.bf16.gmra.mxu1 %v5899_v21  ;;  %3389 = vmatmul.mubr.bf16.gmra.mxu0 %v6065_v40 }
 0x183   : > { %1404 = vst [vmem:[#allocation3 + $0x50] sm:$0xff] %v1388_v29  ;;  %v1036_v10 = vadd.f32 %v4537_v32, %v6069_v30  ;;  %3074 = vmatprep.mubr.bf16.mxu1 %v6031_v22  ;;  %3396 = vmatprep.mubr.bf16.mxu0 %v4322_v50 }
 0x184   : > { %v4539_v20 = vpop.f32.mrf.mxu1  ;;  %v4603_v33 = vpop.f32.mrf.mxu0 }
 0x185   : > { %v1389_v35 = vadd.f32 %v4601_v31, %v1036_v10  ;;  %v4540_v2 = vadd.f32 %v4539_v20, %v4538_v19  ;;  %v4604_v21 = vadd.f32 %v4603_v33, %v4602_v56 }
 0x186   : > { %v4541_v42 = vpop.f32.mrf.mxu1  ;;  %v4605_v45 = vpop.f32.mrf.mxu0 }
 0x187   : > { %1405 = vst [vmem:[#allocation3 + $0x58] sm:$0xff] %v1389_v35  ;;  %v1041_v43 = vadd.f32 %v4540_v2, %v6079_v41 }
 0x188   : > { %v4542_v44 = vpop.f32.mrf.mxu1  ;;  %v4606_v40 = vpop.f32.mrf.mxu0 }
 0x189   : > { %v1390_v37 = vadd.f32 %v4604_v21, %v1041_v43  ;;  %v4543_v9 = vadd.f32 %v4542_v44, %v4541_v42  ;;  %v4607_v46 = vadd.f32 %v4606_v40, %v4605_v45 }
 0x18a   : > { %v4544_v30 = vpop.f32.mrf.mxu1  ;;  %v4608_v11 = vpop.f32.mrf.mxu0  ;;  %3075 = vmatmul.mubr.bf16.gmra.mxu1 %v6045_v34  ;;  %3397 = vmatmul.mubr.bf16.gmra.mxu0 %v4321_v4 }
 0x18b   : > { %1406 = vst [vmem:[#allocation3 + $0x60] sm:$0xff] %v1390_v37  ;;  %v1044_v22 = vadd.f32 %v4543_v9, %v6085_v47 }
 0x18c   : > { %v4545_v52 = vpop.f32.mrf.mxu1  ;;  %v4609_v38 = vpop.f32.mrf.mxu0 }
 0x18d   : > { %v1391_v54 = vadd.f32 %v4607_v46, %v1044_v22  ;;  %v4546_v25 = vadd.f32 %v4545_v52, %v4544_v30  ;;  %v4610_v48 = vadd.f32 %v4609_v38, %v4608_v11 }
 0x18e   : > { %v4547_v58 = vpop.f32.mrf.mxu1  ;;  %v4611_v41 = vpop.f32.mrf.mxu0 }
 0x18f   : > { %1407 = vst [vmem:[#allocation3 + $0x68] sm:$0xff] %v1391_v54  ;;  %v1049_v24 = vadd.f32 %v4546_v25, %v6094_v55 }
 0x190   : > { %v4548_v59 = vpop.f32.mrf.mxu1  ;;  %v4612_v61 = vpop.f32.mrf.mxu0 }
 0x191   : > { %v1392_v51 = vadd.f32 %v4610_v48, %v1049_v24  ;;  %v4549_v14 = vadd.f32 %v4548_v59, %v4547_v58  ;;  %v4613_v60 = vadd.f32 %v4612_v61, %v4611_v41 }
 0x192   : > { %v6152_v34 = vpop.f32.mrf.mxu1  ;;  %v6154_v57 = vpop.f32.mrf.mxu0 }
 0x193   : > { %1408 = vst [vmem:[#allocation3 + $0x70] sm:$0xff] %v1392_v51  ;;  %v1052_v47 = vadd.f32 %v4549_v14, %v6100_v5 }
 0x194   : > { %v4631_v62 = vpop.f32.mrf.mxu1  ;;  %v4695_v63 = vpop.f32.mrf.mxu0 }
 0x195   : > { %v1393_v28 = vadd.f32 %v4613_v60, %v1052_v47  ;;  %v4632_v60 = vadd.f32 %v4631_v62, %v6152_v34 }
 0x196   : > { %v6157_v0 = vpop.f32.mrf.mxu1  ;;  %v6159_v16 = vpop.f32.mrf.mxu0 }
 0x197   : > { %1409 = vst [vmem:[#allocation3 + $0x78] sm:$0xff] %v1393_v28  ;;  %v4696_v28 = vadd.f32 %v4695_v63, %v6154_v57 }
 0x198   : > { %v6161_v55 = vpop.f32.mrf.mxu1  ;;  %v6163_v39 = vpop.f32.mrf.mxu0 }
 0x19a   : > { %v6165_v1 = vpop.f32.mrf.mxu1  ;;  %v6167_v15 = vpop.f32.mrf.mxu0 }
 0x19c   : > { %v6169_v18 = vpop.f32.mrf.mxu1  ;;  %v6171_v5 = vpop.f32.mrf.mxu0 }
 0x19d   : > { %v4638_v63 = vadd.f32 %v6169_v18, %v6165_v1 }
 0x19e   : > { %v6173_v36 = vpop.f32.mrf.mxu1  ;;  %v6175_v7 = vpop.f32.mrf.mxu0 }
 0x1a0   : > { %v6177_v53 = vpop.f32.mrf.mxu1  ;;  %v6179_v3 = vpop.f32.mrf.mxu0 }
 0x1a2   : > { %v6181_v6 = vpop.f32.mrf.mxu1  ;;  %v6183_v27 = vpop.f32.mrf.mxu0 }
 0x1a4   : > { %v6185_v23 = vpop.f32.mrf.mxu1  ;;  %v6187_v12 = vpop.f32.mrf.mxu0 }
 0x1a6   : > { %v6189_v17 = vpop.f32.mrf.mxu1  ;;  %v6191_v49 = vpop.f32.mrf.mxu0 }
 0x1a8   : > { %v6193_v8 = vpop.f32.mrf.mxu1  ;;  %v6195_v50 = vpop.f32.mrf.mxu0 }
 0x1aa   : > { %v6197_v26 = vpop.f32.mrf.mxu1  ;;  %v6199_v13 = vpop.f32.mrf.mxu0 }
 0x1ac   : > { %v6201_v29 = vpop.f32.mrf.mxu1  ;;  %v6203_v32 = vpop.f32.mrf.mxu0 }
 0x1ae   : > { %v6205_v19 = vpop.f32.mrf.mxu1  ;;  %v6207_v56 = vpop.f32.mrf.mxu0 }
 0x1b0   : > { %v6209_v10 = vpop.f32.mrf.mxu1  ;;  %v6211_v31 = vpop.f32.mrf.mxu0 }
 0x1b2   : > { %v6213_v20 = vpop.f32.mrf.mxu1  ;;  %v6215_v33 = vpop.f32.mrf.mxu0 }
 0x1b4   : > { %v6217_v35 = vpop.f32.mrf.mxu1  ;;  %v6219_v2 = vpop.f32.mrf.mxu0 }
 0x1b6   : > { %v6221_v42 = vpop.f32.mrf.mxu1  ;;  %v6223_v45 = vpop.f32.mrf.mxu0 }
 0x1b8   : > { %v6225_v4 = vpop.f32.mrf.mxu1  ;;  %v6227_v43 = vpop.f32.mrf.mxu0 }
 0x1ba   : > { %v6229_v21 = vpop.f32.mrf.mxu1  ;;  %v6231_v44 = vpop.f32.mrf.mxu0 }
 0x1bc   : > { %v6233_v40 = vpop.f32.mrf.mxu1  ;;  %v6235_v37 = vpop.f32.mrf.mxu0 }
 0x1be   : > { %v6237_v9 = vpop.f32.mrf.mxu1  ;;  %v6239_v30 = vpop.f32.mrf.mxu0 }
 0x1c0   : > { %v6241_v11 = vpop.f32.mrf.mxu1  ;;  %v6243_v22 = vpop.f32.mrf.mxu0 }
 0x1c2   : > { %v6245_v46 = vpop.f32.mrf.mxu1  ;;  %v6247_v52 = vpop.f32.mrf.mxu0 }
 0x1c4   : > { %v6249_v38 = vpop.f32.mrf.mxu1  ;;  %v6251_v54 = vpop.f32.mrf.mxu0 }
 0x1c5   : > { %6445 = vst [vmem:[#allocation11_spill] sm:$0xff] %v6251_v54 }
 0x1c6   : > { %v6253_v25 = vpop.f32.mrf.mxu1  ;;  %v6255_v58 = vpop.f32.mrf.mxu0 }
 0x1c7   : > { %6446 = vst [vmem:[#allocation12_spill] sm:$0xff] %v6253_v25  ;;  %6447 = vst [vmem:[#allocation13_spill] sm:$0xff] %v6255_v58  ;;  %v1991_v25 = vadd.f32 %v4696_v28, %v4632_v60  ;;  %v4702_v60 = vadd.f32 %v6171_v5, %v6167_v15  ;;  %v2391_v28 = vld [vmem:[#allocation3 + $0x1] sm:$0xff]  ;;  %v4705_v15 = vadd.f32 %v6179_v3, %v6175_v7 }
 0x1c8   : > { %v6257_v41 = vpop.f32.mrf.mxu1  ;;  %v6259_v24 = vpop.f32.mrf.mxu0 }
 0x1c9   : > { %6448 = vst [vmem:[#allocation14_spill] sm:$0xff] %v6257_v41  ;;  %6449 = vst [vmem:[#allocation15_spill] sm:$0xff] %v6259_v24 }
 0x1ca   : > { %v6261_v48 = vpop.f32.mrf.mxu1  ;;  %v6263_v59 = vpop.f32.mrf.mxu0 }
 0x1cb   : > { %6450 = vst [vmem:[#allocation16_spill] sm:$0xff] %v6261_v48  ;;  %6451 = vst [vmem:[#allocation17_spill] sm:$0xff] %v6263_v59 }
 0x1cc   : > { %v6265_v61 = vpop.f32.mrf.mxu1  ;;  %v6267_v51 = vpop.f32.mrf.mxu0 }
 0x1cd   : > { %6452 = vst [vmem:[#allocation18_spill] sm:$0xff] %v6265_v61  ;;  %6453 = vst [vmem:[#allocation19_spill] sm:$0xff] %v6267_v51  ;;  %v4635_v51 = vadd.f32 %v6161_v55, %v6157_v0 }
 0x1ce   : > { %v6269_v14 = vpop.f32.mrf.mxu1  ;;  %v6271_v47 = vpop.f32.mrf.mxu0 }
 0x1cf   : > { %6454 = vst [vmem:[#allocation20_spill] sm:$0xff] %v6269_v14  ;;  %6455 = vst [vmem:[#allocation21_spill] sm:$0xff] %v6271_v47  ;;  %v4699_v14 = vadd.f32 %v6163_v39, %v6159_v16 }
 0x1d0   : > { %v6275_v58 = vpop.f32.mrf.mxu1  ;;  %v6277_v41 = vpop.f32.mrf.mxu0 }
 0x1d1   : > { %6456 = vst [vmem:[#allocation22_spill] sm:$0xff] %v6275_v58  ;;  %6457 = vst [vmem:[#allocation23_spill] sm:$0xff] %v6277_v41  ;;  %v1994_v0 = vadd.f32 %v4699_v14, %v4635_v51 }
 0x1d2   : > { %v4758_v24 = vpop.f32.mrf.mxu1  ;;  %v4822_v48 = vpop.f32.mrf.mxu0 }
 0x1d4   : > { %v4759_v59 = vpop.f32.mrf.mxu1  ;;  %v4823_v54 = vpop.f32.mrf.mxu0 }
 0x1d5   : > { %v4760_v47 = vadd.f32 %v4759_v59, %v4758_v24  ;;  %v6283_v61 = vadd.f32 %v4823_v54, %v4822_v48  ;;  %v1999_v48 = vadd.f32 %v4702_v60, %v4638_v63  ;;  %v2392_v59 = vld [vmem:[#allocation3 + $0x9] sm:$0x7f] }
 0x1d6   : > { %v4761_v34 = vpop.f32.mrf.mxu1  ;;  %v6285_v57 = vpop.f32.mrf.mxu0 }
 0x1d7   : > { %v2375_v62 = vadd.f32 %v4760_v47, %v1991_v25  ;;  %v4641_v25 = vadd.f32 %v6177_v53, %v6173_v36  ;;  %v4708_v36 = vadd.f32 %v6187_v12, %v6183_v27  ;;  %v2393_v53 = vld [vmem:[#allocation3 + $0x11] sm:$0xff]  ;;  %v4711_v27 = vadd.f32 %v6195_v50, %v6191_v49 }
 0x1d8   : > { %v4762_v41 = vpop.f32.mrf.mxu1  ;;  %v6291_v58 = vpop.f32.mrf.mxu0 }
 0x1d9   : > { %6458 = vst [vmem:[#allocation24_spill] sm:$0xff] %v6291_v58  ;;  %v2407_v55 = vadd.f32 %v2391_v28, %v2375_v62  ;;  %v4763_v16 = vadd.f32 %v4762_v41, %v4761_v34  ;;  %v4644_v34 = vadd.f32 %v6185_v23, %v6181_v6  ;;  %v2002_v7 = vadd.f32 %v4705_v15, %v4641_v25 }
 0x1da   : > { %v4764_v39 = vpop.f32.mrf.mxu1  ;;  %v4828_v54 = vpop.f32.mrf.mxu0 }
 0x1db   : > { %2423 = vst [vmem:[#allocation3 + $0x1] sm:$0xff] %v2407_v55  ;;  %v2376_v24 = vadd.f32 %v4763_v16, %v1994_v0  ;;  %v2007_v16 = vadd.f32 %v4708_v36, %v4644_v34 }
 0x1dc   : > { %v4765_v1 = vpop.f32.mrf.mxu1  ;;  %v4829_v18 = vpop.f32.mrf.mxu0 }
 0x1dd   : > { %v2408_v5 = vadd.f32 %v2392_v59, %v2376_v24  ;;  %v4766_v47 = vadd.f32 %v4765_v1, %v4764_v39  ;;  %v6297_v58 = vadd.f32 %v4829_v18, %v4828_v54  ;;  %v4647_v39 = vadd.f32 %v6193_v8, %v6189_v17  ;;  %v2394_v54 = vld [vmem:[#allocation3 + $0x19] sm:$0x7f]  ;;  %v2395_v8 = vld [vmem:[#allocation3 + $0x21] sm:$0xff] }
 0x1de   : > { %v4767_v51 = vpop.f32.mrf.mxu1  ;;  %v6299_v41 = vpop.f32.mrf.mxu0  ;;  %v4650_v18 = vadd.f32 %v6201_v29, %v6197_v26  ;;  %v4714_v17 = vadd.f32 %v6203_v32, %v6199_v13  ;;  %v4717_v13 = vadd.f32 %v6211_v31, %v6207_v56 }
 0x1df   : > { %2424 = vst [vmem:[#allocation3 + $0x9] sm:$0x7f] %v2408_v5  ;;  %v2377_v14 = vadd.f32 %v4766_v47, %v1999_v48  ;;  %v2010_v49 = vadd.f32 %v4711_v27, %v4647_v39 }
 0x1e0   : > { %v4768_v62 = vpop.f32.mrf.mxu1  ;;  %v6305_v63 = vpop.f32.mrf.mxu0  ;;  %v2015_v36 = vadd.f32 %v4714_v17, %v4650_v18 }
 0x1e1   : > { %v2409_v3 = vadd.f32 %v2393_v53, %v2377_v14  ;;  %v4769_v60 = vadd.f32 %v4768_v62, %v4767_v51  ;;  %v4653_v53 = vadd.f32 %v6209_v10, %v6205_v19  ;;  %v2396_v62 = vld [vmem:[#allocation3 + $0x29] sm:$0x7f]  ;;  %v4720_v19 = vadd.f32 %v6219_v2, %v6215_v33  ;;  %v2397_v10 = vld [vmem:[#allocation3 + $0x31] sm:$0xff] }
 0x1e2   : > { %v4770_v28 = vpop.f32.mrf.mxu1  ;;  %v4834_v0 = vpop.f32.mrf.mxu0  ;;  %v4723_v33 = vadd.f32 %v6227_v43, %v6223_v45 }
 0x1e3   : > { %2425 = vst [vmem:[#allocation3 + $0x11] sm:$0xff] %v2409_v3  ;;  %v2378_v55 = vadd.f32 %v4769_v60, %v2002_v7  ;;  %v2018_v56 = vadd.f32 %v4717_v13, %v4653_v53 }
 0x1e4   : > { %v4771_v6 = vpop.f32.mrf.mxu1  ;;  %v4835_v23 = vpop.f32.mrf.mxu0 }
 0x1e5   : > { %v2410_v12 = vadd.f32 %v2394_v54, %v2378_v55  ;;  %v4772_v24 = vadd.f32 %v4771_v6, %v4770_v28  ;;  %v6311_v48 = vadd.f32 %v4835_v23, %v4834_v0  ;;  %v4656_v55 = vadd.f32 %v6217_v35, %v6213_v20 }
 0x1e6   : > { %v4773_v25 = vpop.f32.mrf.mxu1  ;;  %v6313_v59 = vpop.f32.mrf.mxu0 }
 0x1e7   : > { %2426 = vst [vmem:[#allocation3 + $0x19] sm:$0x7f] %v2410_v12  ;;  %v2379_v1 = vadd.f32 %v4772_v24, %v2007_v16  ;;  %v2023_v12 = vadd.f32 %v4720_v19, %v4656_v55  ;;  %v4659_v24 = vadd.f32 %v6225_v4, %v6221_v42  ;;  %v4726_v42 = vadd.f32 %v6235_v37, %v6231_v44  ;;  %v2399_v4 = vld [vmem:[#allocation3 + $0x41] sm:$0xff]  ;;  %v2401_v55 = vld [vmem:[#allocation3 + $0x51] sm:$0xff] }
 0x1e8   : > { %v4774_v15 = vpop.f32.mrf.mxu1  ;;  %v6319_v5 = vpop.f32.mrf.mxu0  ;;  %v4729_v44 = vadd.f32 %v6243_v22, %v6239_v30 }
 0x1e9   : > { %v2411_v50 = vadd.f32 %v2395_v8, %v2379_v1  ;;  %v4775_v47 = vadd.f32 %v4774_v15, %v4773_v25  ;;  %v2398_v25 = vld [vmem:[#allocation3 + $0x39] sm:$0x7f]  ;;  %v2026_v45 = vadd.f32 %v4723_v33, %v4659_v24 }
 0x1ea   : > { %v4776_v51 = vpop.f32.mrf.mxu1  ;;  %v4840_v14 = vpop.f32.mrf.mxu0  ;;  %v2402_v24 = vld [vmem:[#allocation3 + $0x59] sm:$0x7f] }
 0x1eb   : > { %2427 = vst [vmem:[#allocation3 + $0x21] sm:$0xff] %v2411_v50  ;;  %v2380_v34 = vadd.f32 %v4775_v47, %v2010_v49  ;;  %v4662_v49 = vadd.f32 %v6233_v40, %v6229_v21 }
 0x1ec   : > { %v4777_v26 = vpop.f32.mrf.mxu1  ;;  %v4841_v29 = vpop.f32.mrf.mxu0 }
 0x1ed   : > { %v2412_v32 = vadd.f32 %v2396_v62, %v2380_v34  ;;  %v4778_v7 = vadd.f32 %v4777_v26, %v4776_v51  ;;  %v6325_v3 = vadd.f32 %v4841_v29, %v4840_v14  ;;  %v2031_v53 = vadd.f32 %v4726_v42, %v4662_v49  ;;  %v2400_v26 = vld [vmem:[#allocation3 + $0x49] sm:$0x7f]  ;;  %v6465_v42 = vld [vmem:[#allocation18_spill] sm:$0xff] }
 0x1ee   : > { %v4779_v60 = vpop.f32.mrf.mxu1  ;;  %v6327_v28 = vpop.f32.mrf.mxu0  ;;  %v4665_v62 = vadd.f32 %v6241_v11, %v6237_v9  ;;  %v6459_v9 = vld [vmem:[#allocation11_spill] sm:$0xff]  ;;  %v6464_v49 = vld [vmem:[#allocation16_spill] sm:$0xff] }
 0x1ef   : > { %2428 = vst [vmem:[#allocation3 + $0x29] sm:$0x7f] %v2412_v32  ;;  %v2381_v0 = vadd.f32 %v4778_v7, %v2015_v36  ;;  %v4732_v11 = vadd.f32 %v6459_v9, %v6247_v52  ;;  %v6463_v52 = vld [vmem:[#allocation15_spill] sm:$0xff] }
 0x1f0   : > { %v4780_v16 = vpop.f32.mrf.mxu1  ;;  %v6333_v39 = vpop.f32.mrf.mxu0  ;;  %v2034_v30 = vadd.f32 %v4729_v44, %v4665_v62 }
 0x1f1   : > { %v2413_v31 = vadd.f32 %v2397_v10, %v2381_v0  ;;  %v4781_v54 = vadd.f32 %v4780_v16, %v4779_v60  ;;  %v4668_v0 = vadd.f32 %v6249_v38, %v6245_v46 }
 0x1f2   : > { %v4782_v6 = vpop.f32.mrf.mxu1  ;;  %v4846_v23 = vpop.f32.mrf.mxu0 }
 0x1f3   : > { %2429 = vst [vmem:[#allocation3 + $0x31] sm:$0xff] %v2413_v31  ;;  %v2382_v27 = vadd.f32 %v4781_v54, %v2018_v56 }
 0x1f4   : > { %v4783_v20 = vpop.f32.mrf.mxu1  ;;  %v4847_v35 = vpop.f32.mrf.mxu0 }
 0x1f5   : > { %v2414_v2 = vadd.f32 %v2398_v25, %v2382_v27  ;;  %v4784_v1 = vadd.f32 %v4783_v20, %v4782_v6  ;;  %v6339_v18 = vadd.f32 %v4847_v35, %v4846_v23  ;;  %v2039_v6 = vadd.f32 %v4732_v11, %v4668_v0  ;;  %v6460_v23 = vld [vmem:[#allocation12_spill] sm:$0xff]  ;;  %v6461_v27 = vld [vmem:[#allocation14_spill] sm:$0xff]  ;;  %v6462_v25 = vld [vmem:[#allocation13_spill] sm:$0xff] }
 0x1f6   : > { %v4785_v17 = vpop.f32.mrf.mxu1  ;;  %v6341_v8 = vpop.f32.mrf.mxu0  ;;  %v4735_v20 = vadd.f32 %v6463_v52, %v6462_v25  ;;  %v6470_v11 = vld [vmem:[#allocation21_spill] sm:$0xff] }
 0x1f7   : > { %2430 = vst [vmem:[#allocation3 + $0x39] sm:$0x7f] %v2414_v2  ;;  %v2383_v15 = vadd.f32 %v4784_v1, %v2023_v12  ;;  %v4671_v12 = vadd.f32 %v6461_v27, %v6460_v23 }
 0x1f8   : > { %v4786_v50 = vpop.f32.mrf.mxu1  ;;  %v6347_v47 = vpop.f32.mrf.mxu0 }
 0x1f9   : > { %v2415_v43 = vadd.f32 %v2399_v4, %v2383_v15  ;;  %v4787_v51 = vadd.f32 %v4786_v50, %v4785_v17  ;;  %v4674_v4 = vadd.f32 %v6465_v42, %v6464_v49  ;;  %v6466_v50 = vld [vmem:[#allocation17_spill] sm:$0xff] }
 0x1fa   : > { %v4788_v14 = vpop.f32.mrf.mxu1  ;;  %v4852_v34 = vpop.f32.mrf.mxu0 }
 0x1fb   : > { %2431 = vst [vmem:[#allocation3 + $0x41] sm:$0xff] %v2415_v43  ;;  %v2384_v36 = vadd.f32 %v4787_v51, %v2026_v45  ;;  %v6467_v45 = vld [vmem:[#allocation19_spill] sm:$0xff] }
 0x1fc   : > { %v4789_v21 = vpop.f32.mrf.mxu1  ;;  %v4853_v40 = vpop.f32.mrf.mxu0  ;;  %v4738_v43 = vadd.f32 %v6467_v45, %v6466_v50  ;;  %v2403_v51 = vld [vmem:[#allocation3 + $0x61] sm:$0xff] }
 0x1fd   : > { %v2416_v37 = vadd.f32 %v2400_v26, %v2384_v36  ;;  %v4790_v29 = vadd.f32 %v4789_v21, %v4788_v14  ;;  %v6353_v13 = vadd.f32 %v4853_v40, %v4852_v34  ;;  %v2042_v36 = vadd.f32 %v4735_v20, %v4671_v12  ;;  %v2406_v20 = vld [vmem:[#allocation3 + $0x79] sm:$0x7f] }
 0x1fe   : > { %v4791_v32 = vpop.f32.mrf.mxu1  ;;  %v6355_v7 = vpop.f32.mrf.mxu0  ;;  %v2047_v44 = vadd.f32 %v4738_v43, %v4674_v4  ;;  %v6472_v43 = vld [vmem:[#allocation24_spill] sm:$0xff] }
 0x1ff   : > { %2432 = vst [vmem:[#allocation3 + $0x49] sm:$0x7f] %v2416_v37  ;;  %v2385_v60 = vadd.f32 %v4790_v29, %v2031_v53  ;;  %v6468_v37 = vld [vmem:[#allocation20_spill] sm:$0xff]  ;;  %v6469_v29 = vld [vmem:[#allocation22_spill] sm:$0xff] }
 0x200   : > { %v4792_v19 = vpop.f32.mrf.mxu1  ;;  %v6361_v10 = vpop.f32.mrf.mxu0 }
 0x201   : > { %v2417_v22 = vadd.f32 %v2401_v55, %v2385_v60  ;;  %v4793_v16 = vadd.f32 %v4792_v19, %v4791_v32  ;;  %v4677_v32 = vadd.f32 %v6469_v29, %v6468_v37  ;;  %v2404_v60 = vld [vmem:[#allocation3 + $0x69] sm:$0x7f]  ;;  %v6471_v55 = vld [vmem:[#allocation23_spill] sm:$0xff] }
 0x202   : > { %v4794_v56 = vpop.f32.mrf.mxu1  ;;  %v4858_v31 = vpop.f32.mrf.mxu0  ;;  %v4741_v19 = vadd.f32 %v6471_v55, %v6470_v11  ;;  %v3422_v55 = vld [vmem:[#allocation3 + $0x8] sm:$0x7f] }
 0x203   : > { %2433 = vst [vmem:[#allocation3 + $0x51] sm:$0xff] %v2417_v22  ;;  %v2386_v54 = vadd.f32 %v4793_v16, %v2034_v30 }
 0x204   : > { %v4795_v46 = vpop.f32.mrf.mxu1  ;;  %v4859_v38 = vpop.f32.mrf.mxu0  ;;  %v2050_v12 = vadd.f32 %v4741_v19, %v4677_v32 }
 0x205   : > { %v2418_v35 = vadd.f32 %v2402_v24, %v2386_v54  ;;  %v4796_v33 = vadd.f32 %v4795_v46, %v4794_v56  ;;  %v6367_v2 = vadd.f32 %v4859_v38, %v4858_v31 }
 0x206   : > { %v4797_v1 = vpop.f32.mrf.mxu1  ;;  %v6369_v17 = vpop.f32.mrf.mxu0 }
 0x207   : > { %2434 = vst [vmem:[#allocation3 + $0x59] sm:$0x7f] %v2418_v35  ;;  %v2387_v15 = vadd.f32 %v4796_v33, %v2039_v6  ;;  %v2405_v6 = vld [vmem:[#allocation3 + $0x71] sm:$0xff] }
 0x208   : > { %v4798_v14 = vpop.f32.mrf.mxu1  ;;  %v6375_v34 = vpop.f32.mrf.mxu0 }
 0x209   : > { %v2419_v53 = vadd.f32 %v2403_v51, %v2387_v15  ;;  %v4799_v62 = vadd.f32 %v4798_v14, %v4797_v1  ;;  %v4827_v51 = vadd.f32 %v6472_v43, %v6285_v57  ;;  %v4833_v57 = vadd.f32 %v6305_v63, %v6299_v41 }
 0x20a   : > { %v4800_v26 = vpop.f32.mrf.mxu1  ;;  %v4864_v21 = vpop.f32.mrf.mxu0 }
 0x20b   : > { %2435 = vst [vmem:[#allocation3 + $0x61] sm:$0xff] %v2419_v53  ;;  %v2388_v40 = vadd.f32 %v4799_v62, %v2042_v36 }
 0x20c   : > { %v4801_v0 = vpop.f32.mrf.mxu1  ;;  %v4865_v9 = vpop.f32.mrf.mxu0 }
 0x20d   : > { %v2420_v30 = vadd.f32 %v2404_v60, %v2388_v40  ;;  %v4802_v22 = vadd.f32 %v4801_v0, %v4800_v26  ;;  %v6381_v16 = vadd.f32 %v4865_v9, %v4864_v21 }
 0x20e   : > { %v4803_v56 = vpop.f32.mrf.mxu1  ;;  %v6383_v31 = vpop.f32.mrf.mxu0 }
 0x20f   : > { %2436 = vst [vmem:[#allocation3 + $0x69] sm:$0x7f] %v2420_v30  ;;  %v2389_v54 = vadd.f32 %v4802_v22, %v2047_v44  ;;  %v3421_v22 = vld [vmem:[#allocation3] sm:$0xff] }
 0x210   : > { %v4804_v23 = vpop.f32.mrf.mxu1  ;;  %v6385_v27 = vpop.f32.mrf.mxu0 }
 0x211   : > { %v2421_v24 = vadd.f32 %v2405_v6, %v2389_v54  ;;  %v4805_v46 = vadd.f32 %v4804_v23, %v4803_v56 }
 0x212   : > { %v4886_v38 = vpop.f32.mrf.mxu1  ;;  %v4950_v25 = vpop.f32.mrf.mxu0 }
 0x213   : > { %2437 = vst [vmem:[#allocation3 + $0x71] sm:$0xff] %v2421_v24  ;;  %v2390_v52 = vadd.f32 %v4805_v46, %v2050_v12 }
 0x214   : > { %v4887_v35 = vpop.f32.mrf.mxu1  ;;  %v4951_v33 = vpop.f32.mrf.mxu0 }
 0x215   : > { %v2422_v1 = vadd.f32 %v2406_v20, %v2390_v52  ;;  %v4888_v15 = vadd.f32 %v4887_v35, %v4886_v38  ;;  %v4952_v14 = vadd.f32 %v4951_v33, %v4950_v25 }
 0x216   : > { %v4889_v49 = vpop.f32.mrf.mxu1  ;;  %v4953_v42 = vpop.f32.mrf.mxu0 }
 0x217   : > { %2438 = vst [vmem:[#allocation3 + $0x79] sm:$0x7f] %v2422_v1  ;;  %v3021_v4 = vadd.f32 %v4888_v15, %v6283_v61 }
 0x218   : > { %v4890_v50 = vpop.f32.mrf.mxu1  ;;  %v4954_v45 = vpop.f32.mrf.mxu0 }
 0x219   : > { %v4891_v36 = vadd.f32 %v4890_v50, %v4889_v49  ;;  %v3405_v26 = vadd.f32 %v4952_v14, %v3021_v4  ;;  %v4955_v40 = vadd.f32 %v4954_v45, %v4953_v42  ;;  %v4839_v42 = vadd.f32 %v6319_v5, %v6313_v59  ;;  %v3424_v50 = vld [vmem:[#allocation3 + $0x18] sm:$0x7f] }
 0x21a   : > { %v4892_v53 = vpop.f32.mrf.mxu1  ;;  %v4956_v62 = vpop.f32.mrf.mxu0 }
 0x21b   : > { %v3024_v21 = vadd.f32 %v4891_v36, %v4827_v51  ;;  %v3454_v61 = vrot.slane %v3405_v26, 1  ;;  %v3423_v51 = vld [vmem:[#allocation3 + $0x10] sm:$0xff] }
 0x21c   : > { %v4893_v44 = vpop.f32.mrf.mxu1  ;;  %v4957_v37 = vpop.f32.mrf.mxu0 }
 0x21d   : > { %v3406_v29 = vadd.f32 %v4955_v40, %v3024_v21  ;;  %v4894_v32 = vadd.f32 %v4893_v44, %v4892_v53  ;;  %v4958_v6 = vadd.f32 %v4957_v37, %v4956_v62 }
 0x21e   : > { %v4895_v60 = vpop.f32.mrf.mxu1  ;;  %v4959_v0 = vpop.f32.mrf.mxu0 }
 0x21f   : > { %v3455_v9 = vrot.slane %v3406_v29, 1  ;;  %v3029_v11 = vadd.f32 %v4894_v32, %v6297_v58 }
 0x220   : > { %v4896_v19 = vpop.f32.mrf.mxu1  ;;  %v4960_v30 = vpop.f32.mrf.mxu0 }
 0x221   : > { %v3456_v56 = vsel %vm3453_vm0, %v3454_v61, %v3455_v9  ;;  %v3495_v54 = vadd.f32 %v3455_v9, %v3422_v55  ;;  %v4897_v23 = vadd.f32 %v4896_v19, %v4895_v60  ;;  %v3407_v38 = vadd.f32 %v4958_v6, %v3029_v11  ;;  %v3426_v6 = vld [vmem:[#allocation3 + $0x28] sm:$0x7f] }
 0x222   : > { %v3494_v12 = vadd.f32 %v3456_v56, %v3421_v22  ;;  %v4898_v24 = vpop.f32.mrf.mxu1  ;;  %v4962_v46 = vpop.f32.mrf.mxu0  ;;  %v4961_v52 = vadd.f32 %v4960_v30, %v4959_v0  ;;  %v4845_v56 = vadd.f32 %v6333_v39, %v6327_v28 }
 0x223   : > { %3511 = vst [vmem:[#allocation3 + $0x8] sm:$0x7f] %v3495_v54  ;;  %v3032_v25 = vadd.f32 %v4897_v23, %v4833_v57  ;;  %v3457_v1 = vrot.slane %v3407_v38, 1 }
 0x224   : > { %3510 = vst [vmem:[#allocation3] sm:$0xff] %v3494_v12  ;;  %v4899_v58 = vpop.f32.mrf.mxu1  ;;  %v4963_v20 = vpop.f32.mrf.mxu0  ;;  %v3542_v4 = vmul.f32 0.999995, %v3494_v12 }
 0x225   : > { %v3408_v41 = vadd.f32 %v4961_v52, %v3032_v25  ;;  %v4900_v63 = vadd.f32 %v4899_v58, %v4898_v24  ;;  %v4964_v53 = vadd.f32 %v4963_v20, %v4962_v46  ;;  %v3425_v24 = vld [vmem:[#allocation3 + $0x20] sm:$0xff] }
 0x226   : > { %v4901_v35 = vpop.f32.mrf.mxu1  ;;  %v4965_v33 = vpop.f32.mrf.mxu0  ;;  %v3558_v60 = vmax.f32 %v3542_v4, 0.0 }
 0x227   : > { %v3458_v15 = vrot.slane %v3408_v41, 1  ;;  %v3037_v49 = vadd.f32 %v4900_v63, %v6311_v48 }
 0x228   : > { %v4902_v45 = vpop.f32.mrf.mxu1  ;;  %v4966_v43 = vpop.f32.mrf.mxu0 }
 0x229   : > { %v3459_v14 = vsel %vm3453_vm0, %v3457_v1, %v3458_v15  ;;  %v3497_v36 = vadd.f32 %v3458_v15, %v3424_v50  ;;  %v4903_v62 = vadd.f32 %v4902_v45, %v4901_v35  ;;  %v3409_v48 = vadd.f32 %v4964_v53, %v3037_v49 }
 0x22a   : > { %v3527_v26 = vld [vmem:[#allocation3 + $0x8] sm:$0xff]  ;;  %v3496_v21 = vadd.f32 %v3459_v14, %v3423_v51  ;;  %v4904_v40 = vpop.f32.mrf.mxu1  ;;  %v4968_v44 = vpop.f32.mrf.mxu0  ;;  %v4967_v32 = vadd.f32 %v4966_v43, %v4965_v33  ;;  %v4851_v53 = vadd.f32 %v6347_v47, %v6341_v8 }
 0x22b   : > { %v3543_v37 = vmul.f32 0.999995, %v3527_v26  ;;  %3513 = vst [vmem:[#allocation3 + $0x18] sm:$0x7f] %v3497_v36  ;;  %v3040_v29 = vadd.f32 %v4903_v62, %v4839_v42  ;;  %v3460_v19 = vrot.slane %v3409_v48, 1 }
 0x22c   : > { %3512 = vst [vmem:[#allocation3 + $0x10] sm:$0xff] %v3496_v21  ;;  %v4905_v59 = vpop.f32.mrf.mxu1  ;;  %v4969_v5 = vpop.f32.mrf.mxu0  ;;  %v3544_v54 = vmul.f32 0.999995, %v3496_v21  ;;  %v3428_v26 = vld [vmem:[#allocation3 + $0x38] sm:$0x7f] }
 0x22d   : > { %v3559_v0 = vmax.f32 %v3543_v37, 0.0  ;;  %v3410_v61 = vadd.f32 %v4967_v32, %v3040_v29  ;;  %v4906_v9 = vadd.f32 %v4905_v59, %v4904_v40  ;;  %v4970_v25 = vadd.f32 %v4969_v5, %v4968_v44  ;;  %v3427_v44 = vld [vmem:[#allocation3 + $0x30] sm:$0xff] }
 0x22e   : > { %v4907_v11 = vpop.f32.mrf.mxu1  ;;  %v4971_v57 = vpop.f32.mrf.mxu0  ;;  %v3560_v15 = vmax.f32 %v3544_v54, 0.0 }
 0x22f   : > { %v4378_v55 = vpack.c.bf16 %v3559_v0, %v3558_v60  ;;  %v3461_v30 = vrot.slane %v3410_v61, 1  ;;  %v3045_v22 = vadd.f32 %v4906_v9, %v6325_v3 }
 0x230   : > { %v4908_v23 = vpop.f32.mrf.mxu1  ;;  %v4972_v12 = vpop.f32.mrf.mxu0 }
 0x231   : > { %4379 = vst [vmem:[%s5357_s25] sm:$0xff] %v4378_v55   ;;  %v3462_v46 = vsel %vm3453_vm0, %v3460_v19, %v3461_v30  ;;  %v3499_v38 = vadd.f32 %v3461_v30, %v3426_v6  ;;  %v4909_v52 = vadd.f32 %v4908_v23, %v4907_v11  ;;  %v3411_v3 = vadd.f32 %v4970_v25, %v3045_v22 }
 0x232   : > { %v3529_v58 = vld [vmem:[#allocation3 + $0x18] sm:$0xff]  ;;  %v3498_v20 = vadd.f32 %v3462_v46, %v3425_v24  ;;  %v4910_v41 = vpop.f32.mrf.mxu1  ;;  %v4974_v63 = vpop.f32.mrf.mxu0  ;;  %v4973_v28 = vadd.f32 %v4972_v12, %v4971_v57  ;;  %v4857_v24 = vadd.f32 %v6361_v10, %v6355_v7 }
 0x233   : > { %v3545_v35 = vmul.f32 0.999995, %v3529_v58  ;;  %3515 = vst [vmem:[#allocation3 + $0x28] sm:$0x7f] %v3499_v38  ;;  %v3048_v33 = vadd.f32 %v4909_v52, %v4845_v56  ;;  %v3463_v51 = vrot.slane %v3411_v3, 1  ;;  %v3429_v58 = vld [vmem:[#allocation3 + $0x40] sm:$0xff] }
 0x234   : > { %3514 = vst [vmem:[#allocation3 + $0x20] sm:$0xff] %v3498_v20  ;;  %v4911_v39 = vpop.f32.mrf.mxu1  ;;  %v4975_v1 = vpop.f32.mrf.mxu0  ;;  %v3546_v62 = vmul.f32 0.999995, %v3498_v20  ;;  %v3430_v38 = vld [vmem:[#allocation3 + $0x48] sm:$0x7f] }
 0x235   : > { %v3561_v49 = vmax.f32 %v3545_v35, 0.0  ;;  %v3412_v42 = vadd.f32 %v4973_v28, %v3048_v33  ;;  %v4912_v4 = vadd.f32 %v4911_v39, %v4910_v41  ;;  %v4976_v29 = vadd.f32 %v4975_v1, %v4974_v63 }
 0x236   : > { %v4913_v50 = vpop.f32.mrf.mxu1  ;;  %v4977_v45 = vpop.f32.mrf.mxu0  ;;  %v3562_v57 = vmax.f32 %v3546_v62, 0.0 }
 0x237   : > { %v4383_v43 = vpack.c.bf16 %v3561_v49, %v3560_v15  ;;  %v3464_v14 = vrot.slane %v3412_v42, 1  ;;  %v3053_v36 = vadd.f32 %v4912_v4, %v6339_v18 }
 0x238   : > { %v4914_v21 = vpop.f32.mrf.mxu1  ;;  %v4978_v40 = vpop.f32.mrf.mxu0 }
 0x239   : > { %4415 = vst [vmem:[%s5357_s25 + $0x8] sm:$0xff] %v4383_v43   ;;  %v3465_v37 = vsel %vm3453_vm0, %v3463_v51, %v3464_v14  ;;  %v3501_v48 = vadd.f32 %v3464_v14, %v3428_v26  ;;  %v4915_v32 = vadd.f32 %v4914_v21, %v4913_v50  ;;  %v3413_v18 = vadd.f32 %v4976_v29, %v3053_v36 }
 0x23a   : > { %v3531_v59 = vld [vmem:[#allocation3 + $0x28] sm:$0xff]  ;;  %v3500_v5 = vadd.f32 %v3465_v37, %v3427_v44  ;;  %v4916_v60 = vpop.f32.mrf.mxu1  ;;  %v4980_v0 = vpop.f32.mrf.mxu0  ;;  %v4979_v8 = vadd.f32 %v4978_v40, %v4977_v45  ;;  %v4863_v26 = vadd.f32 %v6375_v34, %v6369_v17  ;;  %v3432_v40 = vld [vmem:[#allocation3 + $0x58] sm:$0x7f] }
 0x23b   : > { %v3547_v61 = vmul.f32 0.999995, %v3531_v59  ;;  %3517 = vst [vmem:[#allocation3 + $0x38] sm:$0x7f] %v3501_v48  ;;  %v3056_v9 = vadd.f32 %v4915_v32, %v4851_v53  ;;  %v3466_v6 = vrot.slane %v3413_v18, 1  ;;  %v3431_v48 = vld [vmem:[#allocation3 + $0x50] sm:$0xff] }
 0x23c   : > { %3516 = vst [vmem:[#allocation3 + $0x30] sm:$0xff] %v3500_v5  ;;  %v4917_v47 = vpop.f32.mrf.mxu1  ;;  %v4981_v11 = vpop.f32.mrf.mxu0  ;;  %v3548_v46 = vmul.f32 0.999995, %v3500_v5 }
 0x23d   : > { %v3563_v55 = vmax.f32 %v3547_v61, 0.0  ;;  %v3414_v19 = vadd.f32 %v4979_v8, %v3056_v9  ;;  %v4918_v30 = vadd.f32 %v4917_v47, %v4916_v60  ;;  %v4982_v63 = vadd.f32 %v4981_v11, %v4980_v0 }
 0x23e   : > { %v4919_v22 = vpop.f32.mrf.mxu1  ;;  %v4983_v56 = vpop.f32.mrf.mxu0  ;;  %v3564_v42 = vmax.f32 %v3548_v46, 0.0  ;;  %v3434_v46 = vld [vmem:[#allocation3 + $0x68] sm:$0x7f] }
 0x23f   : > { %v4388_v54 = vpack.c.bf16 %v3563_v55, %v3562_v57  ;;  %v3467_v23 = vrot.slane %v3414_v19, 1  ;;  %v3061_v12 = vadd.f32 %v4918_v30, %v6353_v13 }
 0x240   : > { %v4920_v25 = vpop.f32.mrf.mxu1  ;;  %v4984_v52 = vpop.f32.mrf.mxu0 }
 0x241   : > { %4416 = vst [vmem:[%s5357_s25 + $0x10] sm:$0xff] %v4388_v54   ;;  %v3468_v20 = vsel %vm3453_vm0, %v3466_v6, %v3467_v23  ;;  %v3503_v41 = vadd.f32 %v3467_v23, %v3430_v38  ;;  %v4921_v35 = vadd.f32 %v4920_v25, %v4919_v22  ;;  %v3415_v13 = vadd.f32 %v4982_v63, %v3061_v12 }
 0x242   : > { %v3533_v3 = vld [vmem:[#allocation3 + $0x38] sm:$0xff]  ;;  %v3502_v33 = vadd.f32 %v3468_v20, %v3429_v58  ;;  %v4922_v28 = vpop.f32.mrf.mxu1  ;;  %v4986_v39 = vpop.f32.mrf.mxu0  ;;  %v4985_v7 = vadd.f32 %v4984_v52, %v4983_v56  ;;  %v4869_v12 = vadd.f32 %v6385_v27, %v6383_v31  ;;  %v3433_v52 = vld [vmem:[#allocation3 + $0x60] sm:$0xff] }
 0x243   : > { %v3549_v1 = vmul.f32 0.999995, %v3533_v3  ;;  %3519 = vst [vmem:[#allocation3 + $0x48] sm:$0x7f] %v3503_v41  ;;  %v3064_v15 = vadd.f32 %v4921_v35, %v4857_v24  ;;  %v3469_v36 = vrot.slane %v3415_v13, 1 }
 0x244   : > { %3518 = vst [vmem:[#allocation3 + $0x40] sm:$0xff] %v3502_v33  ;;  %v4923_v10 = vpop.f32.mrf.mxu1  ;;  %v4987_v49 = vpop.f32.mrf.mxu0  ;;  %v3550_v21 = vmul.f32 0.999995, %v3502_v33 }
 0x245   : > { %v3565_v4 = vmax.f32 %v3549_v1, 0.0  ;;  %v3416_v50 = vadd.f32 %v4985_v7, %v3064_v15  ;;  %v4924_v45 = vadd.f32 %v4923_v10, %v4922_v28  ;;  %v4988_v59 = vadd.f32 %v4987_v49, %v4986_v39  ;;  %v3436_v10 = vld [vmem:[#allocation3 + $0x78] sm:$0x7f] }
 0x246   : > { %v4925_v43 = vpop.f32.mrf.mxu1  ;;  %v4989_v51 = vpop.f32.mrf.mxu0  ;;  %v3566_v11 = vmax.f32 %v3550_v21, 0.0 }
 0x247   : > { %v4393_v14 = vpack.c.bf16 %v3565_v4, %v3564_v42  ;;  %v3470_v53 = vrot.slane %v3416_v50, 1  ;;  %v3069_v62 = vadd.f32 %v4924_v45, %v6367_v2  ;;  %v3435_v42 = vld [vmem:[#allocation3 + $0x70] sm:$0xff] }
 0x248   : > { %v4926_v44 = vpop.f32.mrf.mxu1  ;;  %v4990_v37 = vpop.f32.mrf.mxu0 }
 0x249   : > { %4417 = vst [vmem:[%s5357_s25 + $0x18] sm:$0xff] %v4393_v14   ;;  %v3471_v29 = vsel %vm3453_vm0, %v3469_v36, %v3470_v53  ;;  %v3505_v32 = vadd.f32 %v3470_v53, %v3432_v40  ;;  %v4927_v5 = vadd.f32 %v4926_v44, %v4925_v43  ;;  %v3417_v2 = vadd.f32 %v4988_v59, %v3069_v62 }
 0x24a   : > { %v3535_v60 = vld [vmem:[#allocation3 + $0x48] sm:$0xff]  ;;  %v3504_v0 = vadd.f32 %v3471_v29, %v3431_v48  ;;  %v4928_v61 = vpop.f32.mrf.mxu1  ;;  %v4992_v18 = vpop.f32.mrf.mxu0  ;;  %v4991_v17 = vadd.f32 %v4990_v37, %v4989_v51 }
 0x24b   : > { %v3551_v9 = vmul.f32 0.999995, %v3535_v60  ;;  %3521 = vst [vmem:[#allocation3 + $0x58] sm:$0x7f] %v3505_v32  ;;  %v3072_v8 = vadd.f32 %v4927_v5, %v4863_v26  ;;  %v3472_v54 = vrot.slane %v3417_v2, 1 }
 0x24c   : > { %3520 = vst [vmem:[#allocation3 + $0x50] sm:$0xff] %v3504_v0  ;;  %v4929_v34 = vpop.f32.mrf.mxu1  ;;  %v4993_v47 = vpop.f32.mrf.mxu0  ;;  %v3552_v24 = vmul.f32 0.999995, %v3504_v0 }
 0x24d   : > { %v3567_v57 = vmax.f32 %v3551_v9, 0.0  ;;  %v3418_v55 = vadd.f32 %v4991_v17, %v3072_v8  ;;  %v4930_v19 = vadd.f32 %v4929_v34, %v4928_v61  ;;  %v4994_v41 = vadd.f32 %v4993_v47, %v4992_v18 }
 0x24e   : > { %v4931_v30 = vpop.f32.mrf.mxu1  ;;  %v4995_v22 = vpop.f32.mrf.mxu0  ;;  %v3568_v31 = vmax.f32 %v3552_v24, 0.0 }
 0x24f   : > { %v4398_v56 = vpack.c.bf16 %v3567_v57, %v3566_v11  ;;  %v3473_v6 = vrot.slane %v3418_v55, 1  ;;  %v3077_v23 = vadd.f32 %v4930_v19, %v6381_v16 }
 0x250   : > { %v4932_v38 = vpop.f32.mrf.mxu1  ;;  %v4996_v25 = vpop.f32.mrf.mxu0 }
 0x251   : > { %4418 = vst [vmem:[%s5357_s25 + $0x20] sm:$0xff] %v4398_v56   ;;  %v3474_v58 = vsel %vm3453_vm0, %v3472_v54, %v3473_v6  ;;  %v3507_v20 = vadd.f32 %v3473_v6, %v3434_v46  ;;  %v4933_v63 = vadd.f32 %v4932_v38, %v4931_v30  ;;  %v3419_v16 = vadd.f32 %v4994_v41, %v3077_v23 }
 0x252   : > { %v3537_v35 = vld [vmem:[#allocation3 + $0x58] sm:$0xff]  ;;  %v3506_v3 = vadd.f32 %v3474_v58, %v3433_v52  ;;  %v4997_v39 = vadd.f32 %v4996_v25, %v4995_v22 }
 0x253   : > { %v3553_v33 = vmul.f32 0.999995, %v3537_v35  ;;  %3523 = vst [vmem:[#allocation3 + $0x68] sm:$0x7f] %v3507_v20  ;;  %v3080_v28 = vadd.f32 %v4933_v63, %v4869_v12  ;;  %v3475_v15 = vrot.slane %v3419_v16, 1 }
 0x254   : > { %3522 = vst [vmem:[#allocation3 + $0x60] sm:$0xff] %v3506_v3  ;;  %v3554_v49 = vmul.f32 0.999995, %v3506_v3 }
 0x255   : > { %v3569_v27 = vmax.f32 %v3553_v33, 0.0  ;;  %v3420_v1 = vadd.f32 %v4997_v39, %v3080_v28 }
 0x256   : > { %v3570_v14 = vmax.f32 %v3554_v49, 0.0 }
 0x257   : > { %v4403_v13 = vpack.c.bf16 %v3569_v27, %v3568_v31  ;;  %v3476_v7 = vrot.slane %v3420_v1, 1 }
 0x259   : > { %4419 = vst [vmem:[%s5357_s25 + $0x28] sm:$0xff] %v4403_v13   ;;  %v3477_v4 = vsel %vm3453_vm0, %v3475_v15, %v3476_v7  ;;  %v3509_v50 = vadd.f32 %v3476_v7, %v3436_v10 }
 0x25a   : > { %v3539_v45 = vld [vmem:[#allocation3 + $0x68] sm:$0xff]  ;;  %v3508_v43 = vadd.f32 %v3477_v4, %v3435_v42 }
 0x25b   : > { %v3555_v51 = vmul.f32 0.999995, %v3539_v45  ;;  %3525 = vst [vmem:[#allocation3 + $0x78] sm:$0x7f] %v3509_v50 }
 0x25c   : > { %3524 = vst [vmem:[#allocation3 + $0x70] sm:$0xff] %v3508_v43  ;;  %v3556_v62 = vmul.f32 0.999995, %v3508_v43 }
 0x25d   : > { %v3571_v36 = vmax.f32 %v3555_v51, 0.0 }
 0x25e   : > { %v3572_v40 = vmax.f32 %v3556_v62, 0.0 }
 0x25f   : > { %v4408_v53 = vpack.c.bf16 %v3571_v36, %v3570_v14 }
 0x261   : > { %4420 = vst [vmem:[%s5357_s25 + $0x30] sm:$0xff] %v4408_v53  }
 0x262   : > { %v3541_v26 = vld [vmem:[#allocation3 + $0x78] sm:$0xff] }
 0x263   : > { %v3557_v21 = vmul.f32 0.999995, %v3541_v26 }
 0x265   : > { %v3573_v44 = vmax.f32 %v3557_v21, 0.0 }
 0x267   : > { %v4413_v37 = vpack.c.bf16 %v3573_v44, %v3572_v40 }
 0x269   : > { %4421 = vst [vmem:[%s5357_s25 + $0x38] sm:$0xff] %v4413_v37  }
 0x26a PF: > { %s12_s13 = sadd.s32 1, %s5294_s13   ;;  %s6473_s9 = smov %s5286_s11 }
 0x26b   : > { %p9_p12 = scmp.ge.s32.totalorder %s12_s13, 6   ;;  %s6474_s10 = smov %s5290_s12 }
 0x26c   : > { %s6475_s11 = smov %s6478_s14  ;;  %s6476_s12 = smov %s6482_s15 }
 0x26d   :  { %11 = sbr.rel (!%p9_p12) target bundleno = 3 (0x3), region = 204 }
 0x272   :  { %3686 = vsyncmov [#allocation4] }
 0x275   :  { %s3687_s25 = vpop.sfrf %3686 }
 0x276   :  { %p4357_p13 = scmp.ne.s32.totalorder %s3687_s25, 0 }
 0x278   :  { %3691 = shalt.err (%p4357_p13)  }

</bundles_post_ra>
